<compile_context>
chip_gen: v6e
topology: v6e:2x2x1
jax: 0.10.0
libtpu: 0.0.40
codegen_flags: <defaults>
</compile_context>

<pallas_src>
import functools

import jax
import jax.numpy as jnp
from jax import lax
from jax.experimental import pallas as pl
from jax.experimental.pallas import tpu as pltpu


# ----------------------------------------------------------------------------
# Fused kernel: conv1x1+bn+relu -> conv3x3+bn+relu -> conv1x1+bn+add+relu
# Grid: (N, H // TH).  Each step produces TH output rows of one image.
# ----------------------------------------------------------------------------
def _bottleneck_kernel(xb_ref, xhbm_ref, w1_ref, b1_ref, w2_ref, b2_ref,
                       w3_ref, b3_ref, o_ref, t1p_ref, halo_ref, sem_ref,
                       *, use_halo):
    TH, W, Cin = xb_ref.shape                  # body rows (batch dim squeezed)
    planes = w1_ref.shape[1]
    Cout = w3_ref.shape[1]
    f32, bf16 = jnp.float32, jnp.bfloat16

    # ---- kick off the halo-row DMAs first so they overlap the body conv1 ----
    if use_halo:
        H = xhbm_ref.shape[1]
        n = pl.program_id(0)
        r = pl.program_id(1)
        nr = pl.num_programs(1)
        row0 = r * TH
        row_top = jnp.maximum(row0 - 1, 0)           # clamped; masked to 0 below
        row_bot = jnp.minimum(row0 + TH, H - 1)
        cp_top = pltpu.make_async_copy(xhbm_ref.at[n, pl.ds(row_top, 1)],
                                       halo_ref.at[pl.ds(0, 1)], sem_ref.at[0])
        cp_bot = pltpu.make_async_copy(xhbm_ref.at[n, pl.ds(row_bot, 1)],
                                       halo_ref.at[pl.ds(1, 1)], sem_ref.at[1])
        cp_top.start()
        cp_bot.start()

    # ---- stage 1 (body rows): 1x1 conv (BN1 scale folded in) + bias + ReLU ----
    xb = xb_ref[...]                                             # (TH, W, Cin) bf16
    t1b = jnp.dot(xb.reshape(TH * W, Cin), w1_ref[...],
                  preferred_element_type=f32)
    t1b = jnp.maximum(t1b + b1_ref[...], 0.0)                    # (TH*W, planes) f32

    # ---- stage 1 (halo rows): only needed for conv2's receptive field ----
    if use_halo:
        cp_top.wait()
        cp_bot.wait()
        t1h = jnp.dot(halo_ref[...].reshape(2 * W, Cin), w1_ref[...],
                      preferred_element_type=f32)
        t1h = jnp.maximum(t1h + b1_ref[...], 0.0).reshape(2, W, planes)
        # halo rows outside the image implement conv2's ZERO padding, not
        # relu(bn(conv1(edge_row))) -> mask the activation.
        top_valid = (r > 0).astype(f32)
        bot_valid = (r < nr - 1).astype(f32)
        t1_top = (t1h[0:1] * top_valid).astype(bf16)             # (1, W, planes)
        t1_bot = (t1h[1:2] * bot_valid).astype(bf16)
    else:
        t1_top = jnp.zeros((1, W, planes), bf16)
        t1_bot = jnp.zeros((1, W, planes), bf16)

    # ---- conv1 output, zero-padded for the 3x3, resident in a bf16 scratch ----
    # Only the two border columns are zeroed; the interior is fully overwritten.
    zcol = jnp.zeros((TH + 2, 1, planes), bf16)
    t1p_ref[:, 0:1, :] = zcol
    t1p_ref[:, W + 1:W + 2, :] = zcol
    t1p_ref[0:1, 1:W + 1, :] = t1_top
    t1p_ref[TH + 1:TH + 2, 1:W + 1, :] = t1_bot
    t1p_ref[1:TH + 1, 1:W + 1, :] = t1b.reshape(TH, W, planes).astype(bf16)

    # ---- stage 2: 3x3 conv as 9 accumulating MXU dots (BN2 scale folded) ----
    acc = jnp.zeros((TH * W, planes), f32)
    for ky in range(3):
        for kx in range(3):
            tap = t1p_ref[ky:ky + TH, kx:kx + W, :].reshape(TH * W, planes)
            acc = acc + jnp.dot(tap, w2_ref[ky * 3 + kx],
                                preferred_element_type=f32)
    t2 = jnp.maximum(acc + b2_ref[...], 0.0)                     # (TH*W, planes) f32

    # ---- stage 3: 1x1 conv (BN3 scale folded) + bias + residual + ReLU ----
    y = jnp.dot(t2.astype(bf16), w3_ref[...], preferred_element_type=f32)
    y = y + b3_ref[...]
    y = y + xb.reshape(TH * W, Cin).astype(f32)                  # identity residual
    y = jnp.maximum(y, 0.0)
    o_ref[...] = y.reshape(TH, W, Cout).astype(o_ref.dtype)


# ----------------------------------------------------------------------------
# Tile-size / VMEM budgeting
# ----------------------------------------------------------------------------
def _vmem_capacity_bytes():
    try:
        return int(pltpu.get_tpu_info().vmem_capacity_bytes)
    except Exception:
        return 64 * 2 ** 20          # conservative (covers v7x); v5e/v6e have 128 MiB


def _estimate_vmem_bytes(TH, W, Cin, planes, Cout):
    bf = 2
    act_io = 2 * TH * W * (Cin + Cout) * bf                       # double-buffered x / out blocks
    weights = 2 * 2 * (Cin * planes + 9 * planes * planes + planes * Cout)
    halo = 2 * W * Cin * bf
    t1p = (TH + 2) * (W + 2) * planes * bf                        # padded conv1 scratch
    temps = (TH * W * (Cin * 4 + planes * 12 + Cout * 8)          # f32 temps / tap copies
             + (TH + 2) * W * planes * 4)
    return act_io + weights + halo + t1p + temps


def _pick_tile_h(H, W, Cin, planes, Cout, budget, max_tile_h=None):
    cap = H if max_tile_h is None else max(1, min(H, max_tile_h))
    for th in range(cap, 0, -1):
        if H % th == 0 and _estimate_vmem_bytes(th, W, Cin, planes, Cout) <= budget:
            return th
    return 1


# ----------------------------------------------------------------------------
# Parameter preparation (BN folded into weights; weights cast to bf16 once)
# ----------------------------------------------------------------------------
def _prepare_weights(params):
    f32, bf16 = jnp.float32, jnp.bfloat16
    s1, b1 = params["bn1_s"].reshape(1, -1), params["bn1_b"].reshape(1, -1)
    s2, b2 = params["bn2_s"].reshape(1, -1), params["bn2_b"].reshape(1, -1)
    s3, b3 = params["bn3_s"].reshape(1, -1), params["bn3_b"].reshape(1, -1)
    w1 = (params["w1"] * s1).astype(bf16)                          # (Cin, planes)
    w2_hwio = (params["w2"] * s2.reshape(1, 1, 1, -1)).astype(bf16)  # (3,3,planes,planes)
    planes = w2_hwio.shape[2]
    w2 = w2_hwio.reshape(9, planes, planes)                        # tap-major for the kernel
    w3 = (params["w3"] * s3).astype(bf16)                          # (planes, Cout)
    return w1, b1.astype(f32), w2, w2_hwio, b2.astype(f32), w3, b3.astype(f32)


# ----------------------------------------------------------------------------
# Wrapper (NHWC, bf16 activations end-to-end)
# ----------------------------------------------------------------------------
def bottleneck_forward_nhwc(x, params, *, max_tile_h=None):
    N, H, W, Cin = x.shape
    w1, b1, w2, _, b2, w3, b3 = _prepare_weights(params)
    planes = w1.shape[1]
    Cout = w3.shape[1]
    assert Cin == Cout, "identity residual requires inplanes == planes * expansion"

    x = x.astype(jnp.bfloat16)     # no-op if the network already runs bf16 NHWC

    cap = _vmem_capacity_bytes()
    budget = (7 * cap) // 10
    TH = _pick_tile_h(H, W, Cin, planes, Cout, budget, max_tile_h)
    RT = H // TH
    use_halo = RT > 1
    est = _estimate_vmem_bytes(TH, W, Cin, planes, Cout)
    vmem_limit = int(min(cap, max(32 * 2 ** 20, 2 * est)))

    def full_spec(arr):
        nd = arr.ndim
        return pl.BlockSpec(arr.shape, lambda n, r, _nd=nd: (0,) * _nd)

    kernel = functools.partial(_bottleneck_kernel, use_halo=use_halo)
    return pl.pallas_call(
        kernel,
        out_shape=jax.ShapeDtypeStruct((N, H, W, Cout), jnp.bfloat16),
        grid=(N, RT),
        in_specs=[
            # TH body rows, auto-pipelined / double-buffered by Pallas
            pl.BlockSpec((None, TH, W, Cin), lambda n, r: (n, r, 0, 0)),
            # raw HBM view of x, used only for the 2 halo-row DMAs
            pl.BlockSpec(memory_space=pl.ANY),
            full_spec(w1), full_spec(b1),
            full_spec(w2), full_spec(b2),
            full_spec(w3), full_spec(b3),
        ],
        out_specs=pl.BlockSpec((None, TH, W, Cout), lambda n, r: (n, r, 0, 0)),
        scratch_shapes=[
            pltpu.VMEM((TH + 2, W + 2, planes), jnp.bfloat16),   # padded conv1 output
            pltpu.VMEM((2, W, Cin), jnp.bfloat16),               # halo rows of x
            pltpu.SemaphoreType.DMA((2,)),
        ],
        compiler_params=pltpu.CompilerParams(
            dimension_semantics=("parallel", "parallel"),
            vmem_limit_bytes=vmem_limit),
    )(x, x, w1, b1, w2, b2, w3, b3)


def bottleneck_forward_nchw(x_nchw, params, **kw):
    """PyTorch-layout convenience wrapper.
    TODO(synk): keep the whole network NHWC/bf16 end-to-end; each transpose here
    costs a full HBM round trip and exists only for NCHW parity."""
    x = jnp.transpose(x_nchw, (0, 2, 3, 1))
    y = bottleneck_forward_nhwc(x, params, **kw)
    return jnp.transpose(y, (0, 3, 1, 2))


# ----------------------------------------------------------------------------
# Parameters
# ----------------------------------------------------------------------------
def _fold_bn(gamma, beta, mean, var, eps=1e-5):
    scale = gamma / jnp.sqrt(var + eps)
    bias = beta - mean * scale
    return scale.reshape(1, -1), bias.reshape(1, -1)


def init_bottleneck_params(key, inplanes, planes):
    expansion = 4
    ks = jax.random.split(key, 6)
    p = {}
    p["w1"] = 0.1 * jax.random.normal(ks[0], (inplanes, planes), jnp.float32)
    p["w2"] = 0.1 * jax.random.normal(ks[1], (3, 3, planes, planes), jnp.float32)
    p["w3"] = 0.1 * jax.random.normal(ks[2], (planes, planes * expansion), jnp.float32)

    def bn(k, c):
        kk = jax.random.split(k, 4)
        gamma = 1.0 + 0.1 * jax.random.normal(kk[0], (c,), jnp.float32)
        beta = 0.1 * jax.random.normal(kk[1], (c,), jnp.float32)
        mean = 0.1 * jax.random.normal(kk[2], (c,), jnp.float32)
        var = jnp.abs(jax.random.normal(kk[3], (c,), jnp.float32)) + 0.5
        return _fold_bn(gamma, beta, mean, var)

    p["bn1_s"], p["bn1_b"] = bn(ks[3], planes)
    p["bn2_s"], p["bn2_b"] = bn(ks[4], planes)
    p["bn3_s"], p["bn3_b"] = bn(ks[5], planes * expansion)
    return p


# ----------------------------------------------------------------------------
# Pure-JAX reference (same folded-BN bf16-operand / f32-accumulate numerics)
# ----------------------------------------------------------------------------
def _ref_forward_nhwc(x, params):
    w1, b1, _, w2_hwio, b2, w3, b3 = _prepare_weights(params)
    f32, bf16 = jnp.float32, jnp.bfloat16
    dn = ("NHWC", "HWIO", "NHWC")
    xb = x.astype(bf16)
    o = lax.conv_general_dilated(xb, w1[None, None], (1, 1), "VALID",
                                 dimension_numbers=dn, preferred_element_type=f32)
    o = jnp.maximum(o + b1.reshape(-1), 0.0)
    o = lax.conv_general_dilated(o.astype(bf16), w2_hwio, (1, 1), [(1, 1), (1, 1)],
                                 dimension_numbers=dn, preferred_element_type=f32)
    o = jnp.maximum(o + b2.reshape(-1), 0.0)
    o = lax.conv_general_dilated(o.astype(bf16), w3[None, None], (1, 1), "VALID",
                                 dimension_numbers=dn, preferred_element_type=f32)
    o = o + b3.reshape(-1)
    o = jnp.maximum(o + xb.astype(f32), 0.0)
    return o


# ----------------------------------------------------------------------------
if __name__ == "__main__":
    key = jax.random.PRNGKey(0)
    k_x, k_p = jax.random.split(key)

    N, planes, H, W = 2, 8, 16, 16
    inplanes = planes * 4            # identity residual requires inplanes == planes*4
    x = jax.random.normal(k_x, (N, H, W, inplanes), jnp.float32).astype(jnp.bfloat16)
    params = init_bottleneck_params(k_p, inplanes, planes)

    # 1) default tiling (TH == H here -> no halo DMA path)
    out_full = jax.block_until_ready(bottleneck_forward_nhwc(x, params))
    # 2) forced row tiling (TH = 4 -> exercises the halo-row DMA + masking path)
    out_tiled = jax.block_until_ready(bottleneck_forward_nhwc(x, params, max_tile_h=4))

    ref = jax.block_until_ready(_ref_forward_nhwc(x, params))

    for name, out in (("full", out_full), ("tiled", out_tiled)):
        assert out.shape == (N, H, W, inplanes), (name, out.shape)
        err = float(jnp.max(jnp.abs(out.astype(jnp.float32) - ref)))
        assert err < 5e-2, f"{name}: mismatch vs reference, max_err={err}"

    print("KERNEL_OK")
</pallas_src>

<mosaic_0001>
module attributes {stable_mosaic.version = 11 : i64} {
  func.func @_bottleneck_kernel(%arg0: i32, %arg1: i32, %arg2: memref<1x16x16x32xbf16, #tpu.memory_space<vmem>>, %arg3: memref<2x16x16x32xbf16, #tpu.memory_space<any>>, %arg4: memref<32x8xbf16, #tpu.memory_space<vmem>>, %arg5: memref<1x8xf32, #tpu.memory_space<vmem>>, %arg6: memref<9x8x8xbf16, #tpu.memory_space<vmem>>, %arg7: memref<1x8xf32, #tpu.memory_space<vmem>>, %arg8: memref<8x32xbf16, #tpu.memory_space<vmem>>, %arg9: memref<1x32xf32, #tpu.memory_space<vmem>>, %arg10: memref<1x16x16x32xbf16, #tpu.memory_space<vmem>>, %arg11: memref<18x18x8xbf16, #tpu.memory_space<vmem>>, %arg12: memref<2x16x32xbf16, #tpu.memory_space<vmem>>, %arg13: memref<2x!tpu.dma_semaphore, #tpu.memory_space<semaphore_mem>>) attributes {dimension_semantics = [#tpu.dimension_semantics<parallel>, #tpu.dimension_semantics<parallel>], iteration_bounds = array<i64: 2, 1>, scalar_prefetch = 0 : i64, scratch_operands = 3 : i64, tpu.core_type = #tpu.core_type<tc>, window_params = [{transform_indices = @transform_0, window_bounds = array<i64: 1, 16, 16, 32>}, {}, {pipeline_mode = #tpu.pipeline_mode<synchronous>, transform_indices = @transform_2, window_bounds = array<i64: 32, 8>}, {pipeline_mode = #tpu.pipeline_mode<synchronous>, transform_indices = @transform_3, window_bounds = array<i64: 1, 8>}, {pipeline_mode = #tpu.pipeline_mode<synchronous>, transform_indices = @transform_4, window_bounds = array<i64: 9, 8, 8>}, {pipeline_mode = #tpu.pipeline_mode<synchronous>, transform_indices = @transform_5, window_bounds = array<i64: 1, 8>}, {pipeline_mode = #tpu.pipeline_mode<synchronous>, transform_indices = @transform_6, window_bounds = array<i64: 8, 32>}, {pipeline_mode = #tpu.pipeline_mode<synchronous>, transform_indices = @transform_7, window_bounds = array<i64: 1, 32>}, {transform_indices = @transform_8, window_bounds = array<i64: 1, 16, 16, 32>}]} {
    %c0 = arith.constant 0 : index
    %c0_0 = arith.constant 0 : index
    %c0_1 = arith.constant 0 : index
    %c0_2 = arith.constant 0 : index
    %0 = vector.load %arg2[%c0, %c0_0, %c0_1, %c0_2] : memref<1x16x16x32xbf16, #tpu.memory_space<vmem>>, vector<1x16x16x32xbf16>
    %1 = vector.shape_cast %0 : vector<1x16x16x32xbf16> to vector<16x16x32xbf16>
    %2 = vector.shape_cast %1 : vector<16x16x32xbf16> to vector<256x32xbf16>
    %c0_3 = arith.constant 0 : index
    %c0_4 = arith.constant 0 : index
    %3 = vector.load %arg4[%c0_3, %c0_4] : memref<32x8xbf16, #tpu.memory_space<vmem>>, vector<32x8xbf16>
    %cst = arith.constant dense<0.000000e+00> : vector<256x8xf32>
    %4 = tpu.matmul %2, %3, %cst {dimension_numbers = #tpu.dot_dimension_numbers<[1], [0], [0], [1], [0, 0, 1, 1], [], []>} : vector<256x32xbf16>, vector<32x8xbf16>, vector<256x8xf32> -> vector<256x8xf32>
    %c0_5 = arith.constant 0 : index
    %c0_6 = arith.constant 0 : index
    %5 = vector.load %arg5[%c0_5, %c0_6] : memref<1x8xf32, #tpu.memory_space<vmem>>, vector<1x8xf32>
    %6 = vector.broadcast %5 : vector<1x8xf32> to vector<256x8xf32>
    %7 = arith.addf %4, %6 : vector<256x8xf32>
    %cst_7 = arith.constant 0.000000e+00 : f32
    %8 = vector.broadcast %cst_7 : f32 to vector<256x8xf32>
    %9 = arith.maximumf %7, %8 : vector<256x8xf32>
    %cst_8 = arith.constant 0.000000e+00 : bf16
    %10 = vector.broadcast %cst_8 : bf16 to vector<1x16x8xbf16>
    %cst_9 = arith.constant 0.000000e+00 : bf16
    %11 = vector.broadcast %cst_9 : bf16 to vector<1x16x8xbf16>
    %cst_10 = arith.constant 0.000000e+00 : bf16
    %12 = vector.broadcast %cst_10 : bf16 to vector<18x1x8xbf16>
    %c0_11 = arith.constant 0 : index
    %c0_12 = arith.constant 0 : index
    %c0_13 = arith.constant 0 : index
    %13 = vector.load %arg11[%c0_11, %c0_12, %c0_13] : memref<18x18x8xbf16, #tpu.memory_space<vmem>>, vector<18x1x8xbf16>
    tpu.vector_store %arg11[%c0_11, %c0_12, %c0_13], %12 {strides = array<i32>} : memref<18x18x8xbf16, #tpu.memory_space<vmem>>, vector<18x1x8xbf16>,
    %c0_14 = arith.constant 0 : index
    %c17 = arith.constant 17 : index
    %c0_15 = arith.constant 0 : index
    %14 = vector.load %arg11[%c0_14, %c17, %c0_15] : memref<18x18x8xbf16, #tpu.memory_space<vmem>>, vector<18x1x8xbf16>
    tpu.vector_store %arg11[%c0_14, %c17, %c0_15], %12 {strides = array<i32>} : memref<18x18x8xbf16, #tpu.memory_space<vmem>>, vector<18x1x8xbf16>,
    %c0_16 = arith.constant 0 : index
    %c1 = arith.constant 1 : index
    %c0_17 = arith.constant 0 : index
    %15 = vector.load %arg11[%c0_16, %c1, %c0_17] : memref<18x18x8xbf16, #tpu.memory_space<vmem>>, vector<1x16x8xbf16>
    tpu.vector_store %arg11[%c0_16, %c1, %c0_17], %10 {strides = array<i32>} : memref<18x18x8xbf16, #tpu.memory_space<vmem>>, vector<1x16x8xbf16>,
    %c17_18 = arith.constant 17 : index
    %c1_19 = arith.constant 1 : index
    %c0_20 = arith.constant 0 : index
    %16 = vector.load %arg11[%c17_18, %c1_19, %c0_20] : memref<18x18x8xbf16, #tpu.memory_space<vmem>>, vector<1x16x8xbf16>
    tpu.vector_store %arg11[%c17_18, %c1_19, %c0_20], %11 {strides = array<i32>} : memref<18x18x8xbf16, #tpu.memory_space<vmem>>, vector<1x16x8xbf16>,
    %17 = vector.shape_cast %9 : vector<256x8xf32> to vector<16x16x8xf32>
    %18 = arith.truncf %17 : vector<16x16x8xf32> to vector<16x16x8xbf16>
    %c1_21 = arith.constant 1 : index
    %c1_22 = arith.constant 1 : index
    %c0_23 = arith.constant 0 : index
    %19 = vector.load %arg11[%c1_21, %c1_22, %c0_23] : memref<18x18x8xbf16, #tpu.memory_space<vmem>>, vector<16x16x8xbf16>
    tpu.vector_store %arg11[%c1_21, %c1_22, %c0_23], %18 {strides = array<i32>} : memref<18x18x8xbf16, #tpu.memory_space<vmem>>, vector<16x16x8xbf16>,
    %cst_24 = arith.constant 0.000000e+00 : f32
    %20 = vector.broadcast %cst_24 : f32 to vector<256x8xf32>
    %c0_25 = arith.constant 0 : index
    %c0_26 = arith.constant 0 : index
    %c0_27 = arith.constant 0 : index
    %21 = vector.load %arg11[%c0_25, %c0_26, %c0_27] : memref<18x18x8xbf16, #tpu.memory_space<vmem>>, vector<16x16x8xbf16>
    %22 = vector.shape_cast %21 : vector<16x16x8xbf16> to vector<256x8xbf16>
    %c0_28 = arith.constant 0 : index
    %c0_29 = arith.constant 0 : index
    %c0_30 = arith.constant 0 : index
    %23 = vector.load %arg6[%c0_28, %c0_29, %c0_30] : memref<9x8x8xbf16, #tpu.memory_space<vmem>>, vector<1x8x8xbf16>
    %24 = vector.shape_cast %23 : vector<1x8x8xbf16> to vector<8x8xbf16>
    %cst_31 = arith.constant dense<0.000000e+00> : vector<256x8xf32>
    %25 = tpu.matmul %22, %24, %cst_31 {dimension_numbers = #tpu.dot_dimension_numbers<[1], [0], [0], [1], [0, 0, 1, 1], [], []>} : vector<256x8xbf16>, vector<8x8xbf16>, vector<256x8xf32> -> vector<256x8xf32>
    %26 = arith.addf %20, %25 : vector<256x8xf32>
    %c0_32 = arith.constant 0 : index
    %c1_33 = arith.constant 1 : index
    %c0_34 = arith.constant 0 : index
    %27 = vector.load %arg11[%c0_32, %c1_33, %c0_34] : memref<18x18x8xbf16, #tpu.memory_space<vmem>>, vector<16x16x8xbf16>
    %28 = vector.shape_cast %27 : vector<16x16x8xbf16> to vector<256x8xbf16>
    %c1_35 = arith.constant 1 : index
    %c0_36 = arith.constant 0 : index
    %c0_37 = arith.constant 0 : index
    %29 = vector.load %arg6[%c1_35, %c0_36, %c0_37] : memref<9x8x8xbf16, #tpu.memory_space<vmem>>, vector<1x8x8xbf16>
    %30 = vector.shape_cast %29 : vector<1x8x8xbf16> to vector<8x8xbf16>
    %cst_38 = arith.constant dense<0.000000e+00> : vector<256x8xf32>
    %31 = tpu.matmul %28, %30, %cst_38 {dimension_numbers = #tpu.dot_dimension_numbers<[1], [0], [0], [1], [0, 0, 1, 1], [], []>} : vector<256x8xbf16>, vector<8x8xbf16>, vector<256x8xf32> -> vector<256x8xf32>
    %32 = arith.addf %26, %31 : vector<256x8xf32>
    %c0_39 = arith.constant 0 : index
    %c2 = arith.constant 2 : index
    %c0_40 = arith.constant 0 : index
    %33 = vector.load %arg11[%c0_39, %c2, %c0_40] : memref<18x18x8xbf16, #tpu.memory_space<vmem>>, vector<16x16x8xbf16>
    %34 = vector.shape_cast %33 : vector<16x16x8xbf16> to vector<256x8xbf16>
    %c2_41 = arith.constant 2 : index
    %c0_42 = arith.constant 0 : index
    %c0_43 = arith.constant 0 : index
    %35 = vector.load %arg6[%c2_41, %c0_42, %c0_43] : memref<9x8x8xbf16, #tpu.memory_space<vmem>>, vector<1x8x8xbf16>
    %36 = vector.shape_cast %35 : vector<1x8x8xbf16> to vector<8x8xbf16>
    %cst_44 = arith.constant dense<0.000000e+00> : vector<256x8xf32>
    %37 = tpu.matmul %34, %36, %cst_44 {dimension_numbers = #tpu.dot_dimension_numbers<[1], [0], [0], [1], [0, 0, 1, 1], [], []>} : vector<256x8xbf16>, vector<8x8xbf16>, vector<256x8xf32> -> vector<256x8xf32>
    %38 = arith.addf %32, %37 : vector<256x8xf32>
    %c1_45 = arith.constant 1 : index
    %c0_46 = arith.constant 0 : index
    %c0_47 = arith.constant 0 : index
    %39 = vector.load %arg11[%c1_45, %c0_46, %c0_47] : memref<18x18x8xbf16, #tpu.memory_space<vmem>>, vector<16x16x8xbf16>
    %40 = vector.shape_cast %39 : vector<16x16x8xbf16> to vector<256x8xbf16>
    %c3 = arith.constant 3 : index
    %c0_48 = arith.constant 0 : index
    %c0_49 = arith.constant 0 : index
    %41 = vector.load %arg6[%c3, %c0_48, %c0_49] : memref<9x8x8xbf16, #tpu.memory_space<vmem>>, vector<1x8x8xbf16>
    %42 = vector.shape_cast %41 : vector<1x8x8xbf16> to vector<8x8xbf16>
    %cst_50 = arith.constant dense<0.000000e+00> : vector<256x8xf32>
    %43 = tpu.matmul %40, %42, %cst_50 {dimension_numbers = #tpu.dot_dimension_numbers<[1], [0], [0], [1], [0, 0, 1, 1], [], []>} : vector<256x8xbf16>, vector<8x8xbf16>, vector<256x8xf32> -> vector<256x8xf32>
    %44 = arith.addf %38, %43 : vector<256x8xf32>
    %c1_51 = arith.constant 1 : index
    %c1_52 = arith.constant 1 : index
    %c0_53 = arith.constant 0 : index
    %45 = vector.load %arg11[%c1_51, %c1_52, %c0_53] : memref<18x18x8xbf16, #tpu.memory_space<vmem>>, vector<16x16x8xbf16>
    %46 = vector.shape_cast %45 : vector<16x16x8xbf16> to vector<256x8xbf16>
    %c4 = arith.constant 4 : index
    %c0_54 = arith.constant 0 : index
    %c0_55 = arith.constant 0 : index
    %47 = vector.load %arg6[%c4, %c0_54, %c0_55] : memref<9x8x8xbf16, #tpu.memory_space<vmem>>, vector<1x8x8xbf16>
    %48 = vector.shape_cast %47 : vector<1x8x8xbf16> to vector<8x8xbf16>
    %cst_56 = arith.constant dense<0.000000e+00> : vector<256x8xf32>
    %49 = tpu.matmul %46, %48, %cst_56 {dimension_numbers = #tpu.dot_dimension_numbers<[1], [0], [0], [1], [0, 0, 1, 1], [], []>} : vector<256x8xbf16>, vector<8x8xbf16>, vector<256x8xf32> -> vector<256x8xf32>
    %50 = arith.addf %44, %49 : vector<256x8xf32>
    %c1_57 = arith.constant 1 : index
    %c2_58 = arith.constant 2 : index
    %c0_59 = arith.constant 0 : index
    %51 = vector.load %arg11[%c1_57, %c2_58, %c0_59] : memref<18x18x8xbf16, #tpu.memory_space<vmem>>, vector<16x16x8xbf16>
    %52 = vector.shape_cast %51 : vector<16x16x8xbf16> to vector<256x8xbf16>
    %c5 = arith.constant 5 : index
    %c0_60 = arith.constant 0 : index
    %c0_61 = arith.constant 0 : index
    %53 = vector.load %arg6[%c5, %c0_60, %c0_61] : memref<9x8x8xbf16, #tpu.memory_space<vmem>>, vector<1x8x8xbf16>
    %54 = vector.shape_cast %53 : vector<1x8x8xbf16> to vector<8x8xbf16>
    %cst_62 = arith.constant dense<0.000000e+00> : vector<256x8xf32>
    %55 = tpu.matmul %52, %54, %cst_62 {dimension_numbers = #tpu.dot_dimension_numbers<[1], [0], [0], [1], [0, 0, 1, 1], [], []>} : vector<256x8xbf16>, vector<8x8xbf16>, vector<256x8xf32> -> vector<256x8xf32>
    %56 = arith.addf %50, %55 : vector<256x8xf32>
    %c2_63 = arith.constant 2 : index
    %c0_64 = arith.constant 0 : index
    %c0_65 = arith.constant 0 : index
    %57 = vector.load %arg11[%c2_63, %c0_64, %c0_65] : memref<18x18x8xbf16, #tpu.memory_space<vmem>>, vector<16x16x8xbf16>
    %58 = vector.shape_cast %57 : vector<16x16x8xbf16> to vector<256x8xbf16>
    %c6 = arith.constant 6 : index
    %c0_66 = arith.constant 0 : index
    %c0_67 = arith.constant 0 : index
    %59 = vector.load %arg6[%c6, %c0_66, %c0_67] : memref<9x8x8xbf16, #tpu.memory_space<vmem>>, vector<1x8x8xbf16>
    %60 = vector.shape_cast %59 : vector<1x8x8xbf16> to vector<8x8xbf16>
    %cst_68 = arith.constant dense<0.000000e+00> : vector<256x8xf32>
    %61 = tpu.matmul %58, %60, %cst_68 {dimension_numbers = #tpu.dot_dimension_numbers<[1], [0], [0], [1], [0, 0, 1, 1], [], []>} : vector<256x8xbf16>, vector<8x8xbf16>, vector<256x8xf32> -> vector<256x8xf32>
    %62 = arith.addf %56, %61 : vector<256x8xf32>
    %c2_69 = arith.constant 2 : index
    %c1_70 = arith.constant 1 : index
    %c0_71 = arith.constant 0 : index
    %63 = vector.load %arg11[%c2_69, %c1_70, %c0_71] : memref<18x18x8xbf16, #tpu.memory_space<vmem>>, vector<16x16x8xbf16>
    %64 = vector.shape_cast %63 : vector<16x16x8xbf16> to vector<256x8xbf16>
    %c7 = arith.constant 7 : index
    %c0_72 = arith.constant 0 : index
    %c0_73 = arith.constant 0 : index
    %65 = vector.load %arg6[%c7, %c0_72, %c0_73] : memref<9x8x8xbf16, #tpu.memory_space<vmem>>, vector<1x8x8xbf16>
    %66 = vector.shape_cast %65 : vector<1x8x8xbf16> to vector<8x8xbf16>
    %cst_74 = arith.constant dense<0.000000e+00> : vector<256x8xf32>
    %67 = tpu.matmul %64, %66, %cst_74 {dimension_numbers = #tpu.dot_dimension_numbers<[1], [0], [0], [1], [0, 0, 1, 1], [], []>} : vector<256x8xbf16>, vector<8x8xbf16>, vector<256x8xf32> -> vector<256x8xf32>
    %68 = arith.addf %62, %67 : vector<256x8xf32>
    %c2_75 = arith.constant 2 : index
    %c2_76 = arith.constant 2 : index
    %c0_77 = arith.constant 0 : index
    %69 = vector.load %arg11[%c2_75, %c2_76, %c0_77] : memref<18x18x8xbf16, #tpu.memory_space<vmem>>, vector<16x16x8xbf16>
    %70 = vector.shape_cast %69 : vector<16x16x8xbf16> to vector<256x8xbf16>
    %c8 = arith.constant 8 : index
    %c0_78 = arith.constant 0 : index
    %c0_79 = arith.constant 0 : index
    %71 = vector.load %arg6[%c8, %c0_78, %c0_79] : memref<9x8x8xbf16, #tpu.memory_space<vmem>>, vector<1x8x8xbf16>
    %72 = vector.shape_cast %71 : vector<1x8x8xbf16> to vector<8x8xbf16>
    %cst_80 = arith.constant dense<0.000000e+00> : vector<256x8xf32>
    %73 = tpu.matmul %70, %72, %cst_80 {dimension_numbers = #tpu.dot_dimension_numbers<[1], [0], [0], [1], [0, 0, 1, 1], [], []>} : vector<256x8xbf16>, vector<8x8xbf16>, vector<256x8xf32> -> vector<256x8xf32>
    %74 = arith.addf %68, %73 : vector<256x8xf32>
    %c0_81 = arith.constant 0 : index
    %c0_82 = arith.constant 0 : index
    %75 = vector.load %arg7[%c0_81, %c0_82] : memref<1x8xf32, #tpu.memory_space<vmem>>, vector<1x8xf32>
    %76 = vector.broadcast %75 : vector<1x8xf32> to vector<256x8xf32>
    %77 = arith.addf %74, %76 : vector<256x8xf32>
    %cst_83 = arith.constant 0.000000e+00 : f32
    %78 = vector.broadcast %cst_83 : f32 to vector<256x8xf32>
    %79 = arith.maximumf %77, %78 : vector<256x8xf32>
    %80 = arith.truncf %79 : vector<256x8xf32> to vector<256x8xbf16>
    %c0_84 = arith.constant 0 : index
    %c0_85 = arith.constant 0 : index
    %81 = vector.load %arg8[%c0_84, %c0_85] : memref<8x32xbf16, #tpu.memory_space<vmem>>, vector<8x32xbf16>
    %cst_86 = arith.constant dense<0.000000e+00> : vector<256x32xf32>
    %82 = tpu.matmul %80, %81, %cst_86 {dimension_numbers = #tpu.dot_dimension_numbers<[1], [0], [0], [1], [0, 0, 1, 1], [], []>} : vector<256x8xbf16>, vector<8x32xbf16>, vector<256x32xf32> -> vector<256x32xf32>
    %c0_87 = arith.constant 0 : index
    %c0_88 = arith.constant 0 : index
    %83 = vector.load %arg9[%c0_87, %c0_88] : memref<1x32xf32, #tpu.memory_space<vmem>>, vector<1x32xf32>
    %84 = vector.broadcast %83 : vector<1x32xf32> to vector<256x32xf32>
    %85 = arith.addf %82, %84 : vector<256x32xf32>
    %86 = vector.shape_cast %1 : vector<16x16x32xbf16> to vector<256x32xbf16>
    %87 = arith.extf %86 : vector<256x32xbf16> to vector<256x32xf32>
    %88 = arith.addf %85, %87 : vector<256x32xf32>
    %cst_89 = arith.constant 0.000000e+00 : f32
    %89 = vector.broadcast %cst_89 : f32 to vector<256x32xf32>
    %90 = arith.maximumf %88, %89 : vector<256x32xf32>
    %91 = vector.shape_cast %90 : vector<256x32xf32> to vector<16x16x32xf32>
    %92 = arith.truncf %91 : vector<16x16x32xf32> to vector<16x16x32xbf16>
    %c0_90 = arith.constant 0 : index
    %c0_91 = arith.constant 0 : index
    %c0_92 = arith.constant 0 : index
    %c0_93 = arith.constant 0 : index
    %93 = vector.load %arg10[%c0_90, %c0_91, %c0_92, %c0_93] : memref<1x16x16x32xbf16, #tpu.memory_space<vmem>>, vector<1x16x16x32xbf16>
    %94 = vector.shape_cast %93 : vector<1x16x16x32xbf16> to vector<16x16x32xbf16>
    %95 = vector.shape_cast %92 : vector<16x16x32xbf16> to vector<1x16x16x32xbf16>
    tpu.vector_store %arg10[%c0_90, %c0_91, %c0_92, %c0_93], %95 {strides = array<i32>} : memref<1x16x16x32xbf16, #tpu.memory_space<vmem>>, vector<1x16x16x32xbf16>,
    return
  }
  func.func @transform_0(%arg0: i32, %arg1: i32) -> (i32, i32, i32, i32) {
    %c0_i32 = arith.constant 0 : i32
    %c0_i32_0 = arith.constant 0 : i32
    %c0_i32_1 = arith.constant 0 : i32
    return %arg0, %arg1, %c0_i32, %c0_i32_0 : i32, i32, i32, i32
  }
  func.func @transform_2(%arg0: i32, %arg1: i32) -> (i32, i32) {
    %c0_i32 = arith.constant 0 : i32
    %c0_i32_0 = arith.constant 0 : i32
    %c0_i32_1 = arith.constant 0 : i32
    return %c0_i32, %c0_i32_0 : i32, i32
  }
  func.func @transform_3(%arg0: i32, %arg1: i32) -> (i32, i32) {
    %c0_i32 = arith.constant 0 : i32
    %c0_i32_0 = arith.constant 0 : i32
    %c0_i32_1 = arith.constant 0 : i32
    return %c0_i32, %c0_i32_0 : i32, i32
  }
  func.func @transform_4(%arg0: i32, %arg1: i32) -> (i32, i32, i32) {
    %c0_i32 = arith.constant 0 : i32
    %c0_i32_0 = arith.constant 0 : i32
    %c0_i32_1 = arith.constant 0 : i32
    %c0_i32_2 = arith.constant 0 : i32
    return %c0_i32, %c0_i32_0, %c0_i32_1 : i32, i32, i32
  }
  func.func @transform_5(%arg0: i32, %arg1: i32) -> (i32, i32) {
    %c0_i32 = arith.constant 0 : i32
    %c0_i32_0 = arith.constant 0 : i32
    %c0_i32_1 = arith.constant 0 : i32
    return %c0_i32, %c0_i32_0 : i32, i32
  }
  func.func @transform_6(%arg0: i32, %arg1: i32) -> (i32, i32) {
    %c0_i32 = arith.constant 0 : i32
    %c0_i32_0 = arith.constant 0 : i32
    %c0_i32_1 = arith.constant 0 : i32
    return %c0_i32, %c0_i32_0 : i32, i32
  }
  func.func @transform_7(%arg0: i32, %arg1: i32) -> (i32, i32) {
    %c0_i32 = arith.constant 0 : i32
    %c0_i32_0 = arith.constant 0 : i32
    %c0_i32_1 = arith.constant 0 : i32
    return %c0_i32, %c0_i32_0 : i32, i32
  }
  func.func @transform_8(%arg0: i32, %arg1: i32) -> (i32, i32, i32, i32) {
    %c0_i32 = arith.constant 0 : i32
    %c0_i32_0 = arith.constant 0 : i32
    %c0_i32_1 = arith.constant 0 : i32
    return %arg0, %arg1, %c0_i32, %c0_i32_0 : i32, i32, i32, i32
  }
}

</mosaic_0001>

<bundles_post_ra>
// kernel: tpu_custom_call.1
= control target key start
LH: loop header
LB: loop body
LE: loop exit
PB: predicated region body
PF: predicated region fallthrough
CT: control target
= control target key end

     0   :  { %13 = vsyncpa [#allocation6], 0  ;;  %s10989_s0 = inlined_call_operand.hbm [shape: bf16[2,16,16,32], index: 0, kind: input, shape index: {}]   ;;  %s10990_s1 = inlined_call_operand.hbm [shape: bf16[2,16,16,32], index: 1, kind: input, shape index: {}]   ;;  %s10991_s2 = inlined_call_operand.vmem [shape: bf16[32,8], index: 2, kind: input, shape index: {}]   ;;  %s10992_s3 = inlined_call_operand.vmem [shape: f32[1,8], index: 3, kind: input, shape index: {}]   ;;  %s10993_s4 = inlined_call_operand.vmem [shape: bf16[9,8,8], index: 4, kind: input, shape index: {}]   ;;  %s10994_s5 = inlined_call_operand.vmem [shape: f32[1,8], index: 5, kind: input, shape index: {}]   ;;  %s10995_s6 = inlined_call_operand.vmem [shape: bf16[8,32], index: 6, kind: input, shape index: {}]   ;;  %s10996_s7 = inlined_call_operand.vmem [shape: f32[1,32], index: 7, kind: input, shape index: {}]   ;;  %s10997_s8 = inlined_call_operand.hbm [shape: bf16[2,16,16,32], index: 8, kind: output, shape index: {}]  }
   0x1   :  { %15 = vsyncpa [#allocation6 + $0x1], 0 }
   0x2   :  { %16 = vsyncpa [#allocation7], 0 }
   0x3   :  { %18 = vsyncpa [#allocation7 + $0x1], 0  ;;  %s8059_s26 = smov 0   ;;  %s8061_s27 = smov 0  }
   0x4   :  { %s8063_s28 = smov 0   ;;  %s8065_s29 = smov 0  }
   0x5   :  { %s8067_s30 = smov 0   ;;  %s8069_s9 = smov 0  }
   0x6 LB: > { %s6598_s10 = sadd.s32 4294967295, %s8005_s9   ;;  %s6599_s11 = sadd.s32 4294967294, %s8005_s9   ;;  %s8005_s9 = sphi %s8069_s9, %s24_s9   ;;  %s8001_s30 = sphi %s8067_s30, %s11256_s30   ;;  %s7997_s29 = sphi %s8065_s29, %s11255_s29   ;;  %s7993_s28 = sphi %s8063_s28, %s11254_s28   ;;  %s7989_s27 = sphi %s8061_s27, %s11253_s27   ;;  %s7985_s26 = sphi %s8059_s26, %s11252_s26  }
   0x7   : > { %s36_s12 = sadd.s32 1, %s8001_s30  ;;  %s45_s13 = sadd.s32 1, %s7993_s28 }
   0x8   : > { %p38_p0 = scmp.ge.s32.totalorder %s36_s12, 2  ;;  %p52_p1 = scmp.ne.s32.totalorder %s7993_s28, %s7989_s27 }
   0x9   : > { %p53_p2 = scmp.eq.s32.totalorder %s8005_s9, 0  ;;  %p58_p3 = scmp.ne.s32.totalorder %s7989_s27, %s7985_s26 }
   0xa   : > { %s11258_s12 = smov (%p38_p0, %s36_s12), 0  ;;  %p59_p5 = scmp.eq.s32.totalorder %s6598_s10, 0 }
   0xb   : > { %11020 = sst [smem:[#allocation11_spill]] %s11258_s12  ;;  %p8100_p4 = por %p53_p2, %p52_p1 }
   0xc   : > { %s40_s15 = ssub.s32 %s8001_s30, %s11258_s12  ;;  %p210_p6 = scmp.eq.s32.totalorder %s6598_s10, 1 }
   0xd   : > { %p43_p7 = scmp.eq.s32.totalorder %s40_s15, 0  ;;  %p8106_p8 = por %p59_p5, %p58_p3 }
   0xe   : > { %p8110_p9 = por %p210_p6, %p52_p1  ;;  %p216_p10 = scmp.eq.s32.totalorder %s6599_s11, 1 }
   0xf   : > { %s8115_s18 = scalar_select %p43_p7, %s7993_s28, %s45_s13  }
  0x10   : > { %p8117_p11 = por %p216_p10, %p58_p3  ;;  %p7731_p13 = scmp.lt.s32.totalorder %s8005_s9, 2 }
  0x11   : > { %s254_s20 = sand.u32 1, %s7993_s28   ;;  %s7076_s22 = sshll.u32 %s8001_s30, 11 }
  0x12   : > { %s6602_s21 = sshll.u32 %s254_s20, 7  ;;  %s267_s25 = scalar_lea.hbm %s10989_s0, %s7076_s22 }
  0x13   : > { %s258_s1 = scalar_lea.vmem [#allocation5], %s6602_s21  ;;  %p8130_p0 = pnand %p7731_p13, %p8100_p4 }
  0x14   : > { %s268_s10 = sshll.u32 %s258_s1, 4  ;;  %p6605_p1 = scmp.ge.s32.totalorder %s8005_s9, 1  ;;  %s269_s10 = int_to_ptr.vmem [resolvable:$true] %s268_s10 }
  0x15   : > { %s255_s13 = scalar_lea.sflag [#allocation6], %s254_s20  ;;  %p7899_p2 = pneg %p8130_p0 }
  0x16   : > { %s7910_s15 = scalar_lea.vmem %s269_s10, 2048  ;;  %s8007_s12 = smov [#allocation5]  }
  0x17   : > { %p7911_p3 = scmp.ne.s32.totalorder %s269_s10, %s7910_s15  ;;  %s7915_s23 = sshll.u32 %s8007_s12, 4  ;;  %s7916_s23 = int_to_ptr.vmem [resolvable:$false] %s7915_s23 }
  0x18   : > { %s7917_s21 = scalar_lea.vmem %s7916_s23, 4096  ;;  %p7918_p7 = scmp.lt.s32.totalorder %s269_s10, %s7916_s23 }
  0x19   : > { %p7913_p5 = pnand %p7911_p3, %p7899_p2  ;;  %p7919_p10 = scmp.lt.s32.totalorder %s7917_s21, %s7910_s15 }
  0x1b   : > { %p7914_p6 = pneg %p7913_p5  ;;  %p7920_p12 = por %p7919_p10, %p7918_p7 }
  0x1d   : > { %p7921_p4 = pnand %p7920_p12, %p7914_p6 }
  0x1f   : > { %7924 = shalt.err (!%p7921_p4)
}
  0x20   : > { %s8008_s14 = smov 64   ;;  %s8009_s20 = smov 4  }
  0x21   : > { %7726 = dma.hbm_to_vmem [thread:$0]  (!%p8130_p0), %s267_s25, 2048, %s269_s10, %s255_s13, %s8008_s14, %s8008_s14, %s8009_s20  }
  0x22   : > { %p276_p13 = scmp.lt.s32.totalorder %s8005_s9, 3 }
  0x24   : > { %p277_p2 = pnand %p6605_p1, %p276_p13 }
  0x26   : > { %280 = sbr.rel (%p277_p2) target bundleno = 1105 (0x451), region = 48 }
  0x2b   : > { %s8143_s12 = sand.u32 1, %s7989_s27  }
  0x2c   : > { %s6606_s22 = sshll.u32 %s8143_s12, 7  ;;  %s283_s24 = scalar_lea.sflag [#allocation6], %s8143_s12 }
  0x2d   : > { %s8149_s1 = scalar_lea.vmem [#allocation5], %s6606_s22 }
  0x2e   : > { %7976 = dma.done.wait (%p8106_p8), %s283_s24, 2048  }
  0x2f   : > { %7978 = vsyncadd (%p8106_p8), %s283_s24, 4294965248  ;;  %v7786_v0 = vld [vmem:[%s10991_s2 + $0x8] sm:$0xff]   ;;  %v7787_v1 = vld [vmem:[%s10991_s2] sm:$0xff]   ;;  %vm455_vm0 = vcmask 261120   ;;  %vm697_vm1 = vcmask 57344   ;;  %v11026_v18 = vmov 0 }
  0x30   : > { %7330 = vmatprep.subr.bf16.mxu0 %v7786_v0  ;;  %v320_v2 = vld [vmem:[%s8149_s1] sm:$0xff]   ;;  %v322_v3 = vld [vmem:[%s8149_s1 + $0x8] sm:$0xff]   ;;  %v324_v4 = vld [vmem:[%s8149_s1 + $0x10] sm:$0xff]   ;;  %vm698_vm2 = vsmask.f32 256  ;;  %v11029_v23 = vmov 0 }
  0x31   : > { %7331 = vmatpush3.bf16.msra.mxu0 %v7786_v0  ;;  %7334 = vmatprep.mubr.msk.bf16.mxu0 %vm455_vm0, %v320_v2  ;;  %v326_v5 = vld [vmem:[%s8149_s1 + $0x18] sm:$0xff]   ;;  %v328_v6 = vld [vmem:[%s8149_s1 + $0x20] sm:$0xff]   ;;  %v330_v7 = vld [vmem:[%s8149_s1 + $0x28] sm:$0xff]   ;;  %vm754_vm4 = vsmask.f32 7938  ;;  %vm810_vm6 = vcmask 60416  }
  0x32   : > { %7332 = vmatprep.subr.bf16.mxu0 %v7787_v1  ;;  %v332_v8 = vld [vmem:[%s8149_s1 + $0x30] sm:$0xff]   ;;  %v334_v9 = vld [vmem:[%s8149_s1 + $0x38] sm:$0xff]   ;;  %v336_v10 = vld [vmem:[%s8149_s1 + $0x40] sm:$0xff]   ;;  %v8010_v49 = vmov 0   ;;  %vm1894_vm8 = vcmask 1043456   ;;  %vm1845_vm12 = vcmask 64512  }
  0x33   : > { %v338_v11 = vld [vmem:[%s8149_s1 + $0x48] sm:$0xff]   ;;  %v340_v12 = vld [vmem:[%s8149_s1 + $0x50] sm:$0xff]   ;;  %v342_v13 = vld [vmem:[%s8149_s1 + $0x58] sm:$0xff]   ;;  %816 = vst.msk [vmem:[#allocation2 + $0x4] sm:$0xf] %vm810_vm6, %v8010_v49  ;;  %vm2399_vm13 = vcmask 1042432  }
  0x34   : > { %v344_v14 = vld [vmem:[%s8149_s1 + $0x60] sm:$0xff]   ;;  %v346_v15 = vld [vmem:[%s8149_s1 + $0x68] sm:$0xff]   ;;  %v348_v16 = vld [vmem:[%s8149_s1 + $0x70] sm:$0xff]   ;;  %824 = vst.msk [vmem:[#allocation2 + $0xd0] sm:$0xf] %vm810_vm6, %v8010_v49  ;;  %vm2400_vm14 = vcmask 1046532  }
  0x35   : > { %7333 = vmatpush3.bf16.msra.mxu0 %v7787_v1  ;;  %v350_v17 = vld [vmem:[%s8149_s1 + $0x78] sm:$0xff]   ;;  %vm8194_vm3 = vmand %vm697_vm1, %vm698_vm2  ;;  %v706_v19 = vld [vmem:[#allocation2 + $0x18] sm:$0x1]  ;;  %vm1408_vm9 = vsmask.f32 3328  ;;  %s10828_s10 = scalar_lea.vmem [#allocation8], %s6606_s22 }
  0x36   : > { %v11027_v18 = vsel %vm8194_vm3, 4294967295, %v11026_v18  ;;  %v707_v20 = vsel %vm8194_vm3, 0, %v706_v19  ;;  %v703_v21 = vld [vmem:[#allocation2 + $0xc] sm:$0x1]  ;;  %vm8203_vm5 = vmand %vm697_vm1, %vm754_vm4  ;;  %v762_v24 = vld [vmem:[#allocation2 + $0x20] sm:$0x1] }
  0x37   : > { %11028 = vst [vmem:[#allocation12_spill] sm:$0xff] %v11027_v18  ;;  %708 = vst [vmem:[#allocation2 + $0x18] sm:$0x1] %v707_v20  ;;  %v704_v22 = vsel %vm8194_vm3, 0, %v703_v21  ;;  %v11030_v23 = vsel %vm8203_vm5, 4294967295, %v11029_v23  ;;  %v763_v25 = vsel %vm8203_vm5, 0, %v762_v24 }
  0x38   : > { %7335 = vmatmul.mubr.msk.bf16.vlgmr.msra.gmra.mxu0 %vm455_vm0, %v322_v3  ;;  %705 = vst [vmem:[#allocation2 + $0xc] sm:$0x1] %v704_v22  ;;  %11031 = vst [vmem:[#allocation13_spill] sm:$0xff] %v11030_v23  ;;  %v759_v26 = vld [vmem:[#allocation2 + $0x14] sm:$0x1]  ;;  %s7141_s22 = sshll.u32 %s7997_s29, 11 }
  0x39   : > { %7338 = vmatprep.mubr.msk.bf16.mxu0 %vm455_vm0, %v324_v4  ;;  %764 = vst [vmem:[#allocation2 + $0x20] sm:$0x1] %v763_v25  ;;  %v760_v27 = vsel %vm8203_vm5, 0, %v759_v26  ;;  %v712_v28 = vld [vmem:[#allocation2 + $0x30] sm:$0x1]  ;;  %vm8229_vm7 = vmand %vm810_vm6, %vm754_vm4  ;;  %s10935_s16 = scalar_lea.hbm %s10997_s8, %s7141_s22  ;;  %s6482_s29 = scalar_lea.sflag [#allocation7], %s8143_s12 }
  0x3a   : > { %761 = vst [vmem:[#allocation2 + $0x14] sm:$0x1] %v760_v27  ;;  %v713_v29 = vsel %vm8194_vm3, 0, %v712_v28  ;;  %v709_v30 = vld [vmem:[#allocation2 + $0x24] sm:$0x1]  ;;  %vm8322_vm15 = vmor %vm2399_vm13, %vm2400_vm14  ;;  %s8011_s23 = smov [#allocation8]  }
  0x3b   : > { %714 = vst [vmem:[#allocation2 + $0x30] sm:$0x1] %v713_v29  ;;  %v710_v31 = vsel %vm8194_vm3, 0, %v709_v30  ;;  %v768_v32 = vld [vmem:[#allocation2 + $0x38] sm:$0x1]  ;;  %s7929_s21 = sshll.u32 %s8011_s23, 4  ;;  %s7930_s21 = int_to_ptr.vmem [resolvable:$false] %s7929_s21 }
  0x3c   : > { %711 = vst [vmem:[#allocation2 + $0x24] sm:$0x1] %v710_v31  ;;  %v700_v33 = vld [vmem:[#allocation2] sm:$0x1]  ;;  %v769_v34 = vsel %vm8203_vm5, 0, %v768_v32  ;;  %s7931_s14 = scalar_lea.vmem %s7930_s21, 4096 }
  0x3d   : > { %v701_v35 = vsel %vm8194_vm3, 0, %v700_v33  ;;  %770 = vst [vmem:[#allocation2 + $0x38] sm:$0x1] %v769_v34  ;;  %v765_v36 = vld [vmem:[#allocation2 + $0x2c] sm:$0x1] }
  0x3e   : > { %702 = vst [vmem:[#allocation2] sm:$0x1] %v701_v35  ;;  %v766_v37 = vsel %vm8203_vm5, 0, %v765_v36  ;;  %v756_v38 = vld [vmem:[#allocation2 + $0x8] sm:$0x1] }
  0x3f   : > { %767 = vst [vmem:[#allocation2 + $0x2c] sm:$0x1] %v766_v37  ;;  %v718_v39 = vld [vmem:[#allocation2 + $0x48] sm:$0x1]  ;;  %v757_v40 = vsel %vm8203_vm5, 0, %v756_v38 }
  0x40   : > { %7339 = vmatmul.mubr.msk.bf16.gmra.mxu0 %vm455_vm0, %v326_v5  ;;  %v719_v41 = vsel %vm8194_vm3, 0, %v718_v39  ;;  %758 = vst [vmem:[#allocation2 + $0x8] sm:$0x1] %v757_v40  ;;  %v715_v42 = vld [vmem:[#allocation2 + $0x3c] sm:$0x1] }
  0x41   : > { %7342 = vmatprep.mubr.msk.bf16.mxu0 %vm455_vm0, %v328_v6  ;;  %720 = vst [vmem:[#allocation2 + $0x48] sm:$0x1] %v719_v41  ;;  %v716_v43 = vsel %vm8194_vm3, 0, %v715_v42  ;;  %v774_v45 = vld [vmem:[#allocation2 + $0x50] sm:$0x1] }
  0x42   : > { %717 = vst [vmem:[#allocation2 + $0x3c] sm:$0x1] %v716_v43  ;;  %v775_v47 = vsel %vm8203_vm5, 0, %v774_v45  ;;  %v771_v51 = vld [vmem:[#allocation2 + $0x44] sm:$0x1] }
  0x43   : > { %776 = vst [vmem:[#allocation2 + $0x50] sm:$0x1] %v775_v47  ;;  %v772_v53 = vsel %vm8203_vm5, 0, %v771_v51  ;;  %v6675_v54 = vld [vmem:[%s10993_s4 + $0x4] sm:$0xf] }
  0x44   : > { %773 = vst [vmem:[#allocation2 + $0x44] sm:$0x1] %v772_v53  ;;  %7708 = vmatprep.subr.msk.bf16.mxu0 %vm1894_vm8, %v6675_v54  ;;  %v1896_v55 = vsel %vm1894_vm8, %v6675_v54, 0  ;;  %v724_v56 = vld [vmem:[#allocation2 + $0x60] sm:$0x1]  ;;  %7709 = vmatprep.subr.msk.bf16.mxu1 %vm1894_vm8, %v6675_v54 }
  0x45   : > { %v812_v46 = vld [vmem:[#allocation2] sm:$0xf]  ;;  %7367 = vmatpush3.bf16.msra.mxu0 %v1896_v55  ;;  %v725_v57 = vsel %vm8194_vm3, 0, %v724_v56  ;;  %v721_v58 = vld [vmem:[#allocation2 + $0x54] sm:$0x1]  ;;  %7707 = vmatpush3.bf16.msra.mxu1 %v1896_v55 }
  0x46   : > { %v813_v48 = vsel %vm8229_vm7, 0, %v812_v46  ;;  %726 = vst [vmem:[#allocation2 + $0x60] sm:$0x1] %v725_v57  ;;  %v722_v59 = vsel %vm8194_vm3, 0, %v721_v58  ;;  %v8253_v61 = vld [vmem:[#allocation2 + $0x4] sm:$0xf] }
  0x47   : > { %814 = vst [vmem:[#allocation2] sm:$0xf] %v813_v48  ;;  %v817_v50 = vld [vmem:[#allocation2 + $0x8] sm:$0x1]  ;;  %723 = vst [vmem:[#allocation2 + $0x54] sm:$0x1] %v722_v59 }
  0x48   : > { %7343 = vmatmul.mubr.msk.bf16.gmra.mxu0 %vm455_vm0, %v330_v7  ;;  %v818_v52 = vsel %vm8194_vm3, 0, %v817_v50  ;;  %v780_v62 = vld [vmem:[#allocation2 + $0x68] sm:$0x1]  ;;  %v1421_v2 = vshll.u32 %v8253_v61, 16  ;;  %v777_v3 = vld [vmem:[#allocation2 + $0x5c] sm:$0x1] }
  0x49   : > { %7346 = vmatprep.mubr.msk.bf16.mxu0 %vm455_vm0, %v332_v8  ;;  %819 = vst [vmem:[#allocation2 + $0x8] sm:$0x1] %v818_v52  ;;  %v781_v63 = vsel %vm8203_vm5, 0, %v780_v62  ;;  %v1425_v5 = vshrl.u32 %v8253_v61, 16  ;;  %v778_v6 = vsel %vm8203_vm5, 0, %v777_v3  ;;  %v2404_v59 = vrot.slane %v8253_v61, 5 }
  0x4a   : > { %782 = vst [vmem:[#allocation2 + $0x68] sm:$0x1] %v781_v63  ;;  %779 = vst [vmem:[#allocation2 + $0x5c] sm:$0x1] %v778_v6  ;;  %vm1409_vm10 = vsmask.f32 7440 }
  0x4b   : > { %vm8268_vm11 = vmor %vm1408_vm9, %vm1409_vm10  ;;  %v786_v25 = vld [vmem:[#allocation2 + $0x80] sm:$0x1]  ;;  %v783_v29 = vld [vmem:[#allocation2 + $0x74] sm:$0x1] }
  0x4c   : > { %v787_v27 = vsel %vm8203_vm5, 0, %v786_v25  ;;  %v784_v30 = vsel %vm8203_vm5, 0, %v783_v29  ;;  %v736_v31 = vld [vmem:[#allocation2 + $0x90] sm:$0x1]  ;;  %v733_v33 = vld [vmem:[#allocation2 + $0x84] sm:$0x1] }
  0x4d   : > { %788 = vst [vmem:[#allocation2 + $0x80] sm:$0x1] %v787_v27  ;;  %785 = vst [vmem:[#allocation2 + $0x74] sm:$0x1] %v784_v30  ;;  %v737_v32 = vsel %vm8194_vm3, 0, %v736_v31  ;;  %v734_v34 = vsel %vm8194_vm3, 0, %v733_v33 }
  0x4e   : > { %v1359_v60 = vld [vmem:[#allocation2] sm:$0xf]  ;;  %738 = vst [vmem:[#allocation2 + $0x90] sm:$0x1] %v737_v32  ;;  %735 = vst [vmem:[#allocation2 + $0x84] sm:$0x1] %v734_v34 }
  0x4f   : > { %v1412_v0 = vshrl.u32 %v1359_v60, 16  ;;  %v1415_v1 = vshll.u32 %v1359_v60, 16  ;;  %v792_v35 = vld [vmem:[#allocation2 + $0x98] sm:$0x1]  ;;  %v789_v37 = vld [vmem:[#allocation2 + $0x8c] sm:$0x1] }
  0x50   : > { %7347 = vmatmul.mubr.msk.bf16.gmra.mxu0 %vm455_vm0, %v334_v9  ;;  %v8258_v4 = vld [vmem:[#allocation2 + $0x8] sm:$0x1]  ;;  %v1423_v9 = vrot.slane %v1421_v2, 5  ;;  %v793_v36 = vsel %vm8203_vm5, 0, %v792_v35  ;;  %v790_v38 = vsel %vm8203_vm5, 0, %v789_v37 }
  0x51   : > { %7350 = vmatprep.mubr.msk.bf16.mxu0 %vm455_vm0, %v336_v10  ;;  %v1414_v7 = vrot.slane %v1412_v0, 4  ;;  %v1417_v8 = vrot.slane %v1415_v1, 5  ;;  %v730_v10 = vld [vmem:[#allocation2 + $0x78] sm:$0x1]  ;;  %794 = vst [vmem:[#allocation2 + $0x98] sm:$0x1] %v793_v36 }
  0x52   : > { %791 = vst [vmem:[#allocation2 + $0x8c] sm:$0x1] %v790_v38  ;;  %v742_v39 = vld [vmem:[#allocation2 + $0xa8] sm:$0x1]  ;;  %v739_v41 = vld [vmem:[#allocation2 + $0x9c] sm:$0x1] }
  0x53   : > { %v743_v40 = vsel %vm8194_vm3, 0, %v742_v39  ;;  %v740_v42 = vsel %vm8194_vm3, 0, %v739_v41  ;;  %v798_v43 = vld [vmem:[#allocation2 + $0xb0] sm:$0x1]  ;;  %v795_v46 = vld [vmem:[#allocation2 + $0xa4] sm:$0x1] }
  0x54   : > { %744 = vst [vmem:[#allocation2 + $0xa8] sm:$0x1] %v743_v40  ;;  %741 = vst [vmem:[#allocation2 + $0x9c] sm:$0x1] %v740_v42  ;;  %v799_v45 = vsel %vm8203_vm5, 0, %v798_v43  ;;  %v796_v47 = vsel %vm8203_vm5, 0, %v795_v46 }
  0x55   : > { %800 = vst [vmem:[#allocation2 + $0xb0] sm:$0x1] %v799_v45  ;;  %797 = vst [vmem:[#allocation2 + $0xa4] sm:$0x1] %v796_v47  ;;  %v748_v48 = vld [vmem:[#allocation2 + $0xc0] sm:$0x1] }
  0x56   : > { %v749_v49 = vsel %vm8194_vm3, 0, %v748_v48  ;;  %v6756_v50 = vld [vmem:[%s10993_s4 + $0x8] sm:$0xf]  ;;  %v745_v51 = vld [vmem:[#allocation2 + $0xb4] sm:$0x1]  ;;  %v2406_v1 = vrot.slane %v2404_v59, 4 }
  0x57   : > { %750 = vst [vmem:[#allocation2 + $0xc0] sm:$0x1] %v749_v49  ;;  %7711 = vmatprep.subr.msk.bf16.mxu0 %vm1894_vm8, %v6756_v50  ;;  %v804_v52 = vld [vmem:[#allocation2 + $0xc8] sm:$0x1]  ;;  %v746_v53 = vsel %vm8194_vm3, 0, %v745_v51  ;;  %v2407_v2 = vrot.slane %v8258_v4, 5 }
  0x58   : > { %7351 = vmatmul.mubr.msk.bf16.gmra.mxu0 %vm455_vm0, %v338_v11  ;;  %v1427_v11 = vrot.slane %v1425_v5, 4  ;;  %v805_v54 = vsel %vm8203_vm5, 0, %v804_v52  ;;  %v801_v55 = vld [vmem:[#allocation2 + $0xbc] sm:$0x1]  ;;  %747 = vst [vmem:[#allocation2 + $0xb4] sm:$0x1] %v746_v53 }
  0x59   : > { %7354 = vmatprep.mubr.msk.bf16.mxu0 %vm455_vm0, %v340_v12  ;;  %v1431_v12 = vshll.u32 %v8258_v4, 16  ;;  %806 = vst [vmem:[#allocation2 + $0xc8] sm:$0x1] %v805_v54  ;;  %v802_v56 = vsel %vm8203_vm5, 0, %v801_v55  ;;  %v1391_v57 = vld [vmem:[%s10993_s4] sm:$0xf]  ;;  %v8333_v4 = vsel %vm8322_vm15, %v2406_v1, %v2407_v2 }
  0x5a   : > { %803 = vst [vmem:[#allocation2 + $0xbc] sm:$0x1] %v802_v56  ;;  %7710 = vmatprep.subr.msk.bf16.mxu1 %vm1894_vm8, %v1391_v57  ;;  %v2351_v58 = vld [vmem:[#allocation2] sm:$0xe]  ;;  %v8317_v60 = vld [vmem:[%s10992_s3] ss:$0 sm:$0xff] }
  0x5b   : > { %v6740_v63 = vrot.slane %v2351_v58, 9  ;;  %v1254_v27 = vld [vmem:[#allocation2 + $0x18] sm:$0xf]  ;;  %v8343_v32 = vsel %vm1894_vm8, %v1391_v57, 0  ;;  %v1247_v37 = vld [vmem:[#allocation2 + $0xc] sm:$0xf] }
  0x5c   : > { %v1258_v49 = vld [vmem:[#allocation2 + $0x20] sm:$0x1] }
  0x60   : > { %7355 = vmatmul.mubr.msk.bf16.gmra.mxu0 %vm455_vm0, %v342_v13  ;;  %v731_v13 = vsel %vm8194_vm3, 0, %v730_v10 }
  0x61   : > { %7358 = vmatprep.mubr.msk.bf16.mxu0 %vm455_vm0, %v344_v14  ;;  %v1418_v14 = vor.u32 %v1417_v8, %v1414_v7  ;;  %732 = vst [vmem:[#allocation2 + $0x78] sm:$0x1] %v731_v13  ;;  %v8328_v8 = vsel %vm8322_vm15, %v6740_v63, %v2404_v59 }
  0x63   : > { %v1419_v20 = vrot.slane %v1418_v14, 4 }
  0x65   : > { %v1424_v24 = vsel %vm8268_vm11, %v1419_v20, %v1423_v9  ;;  %v6757_v20 = vcombine.low %v8328_v8, %v8333_v4 }
  0x68   : > { %7359 = vmatmul.mubr.msk.bf16.gmra.mxu0 %vm455_vm0, %v346_v15  ;;  %v727_v15 = vld [vmem:[#allocation2 + $0x6c] sm:$0x1] }
  0x69   : > { %7362 = vmatprep.mubr.msk.bf16.mxu0 %vm455_vm0, %v348_v16  ;;  %v1428_v16 = vor.u32 %v1427_v11, %v1423_v9  ;;  %v728_v19 = vsel %vm8194_vm3, 0, %v727_v15 }
  0x6a   : > { %729 = vst [vmem:[#allocation2 + $0x6c] sm:$0x1] %v728_v19  ;;  %v8337_v19 = vsel %vm1894_vm8, %v6756_v50, 0 }
  0x6b   : > { %v1429_v22 = vrot.slane %v1428_v16, 4 }
  0x70   : > { %7363 = vmatmul.mubr.msk.bf16.gmra.mxu0 %vm455_vm0, %v350_v17  ;;  %v1433_v17 = vrot.slane %v1431_v12, 5  ;;  %vm924_vm0 = vsmask.f32 4368 }
  0x71   : > { %vm8350_vm1 = vmor %vm698_vm2, %vm924_vm0  ;;  %vm6448_vm2 = vcmask 257024  }
  0x72   : > { %v1434_v26 = vsel %vm8268_vm11, %v1429_v22, %v1433_v17 }
  0x73   : > { %v6676_v28 = vcombine.low %v1424_v24, %v1434_v26 }
  0x75   : > { %7368 = vmatprep.mubr.msk.bf16.mxu0 %vm1845_vm12, %v6676_v28 }
  0xf8   : > { %v7336_v62 = vpop.f32.mrf.mxu0 }
  0xf9   : > { %v547_v0 = vadd.f32 %v7336_v62, %v8317_v60 }
  0xfa   : > { %v538_v3 = vpop.f32.mrf.mxu0 }
  0xfb   : > { %v667_v5 = vmax.f32 %v547_v0, 0.0  ;;  %v539_v6 = vadd.f32 %v8317_v60, %v538_v3 }
  0xfc   : > { %v7337_v7 = vpop.f32.mrf.mxu0 }
  0xfd   : > { %v7079_v9 = vpack.c.bf16 %v667_v5, %v667_v5  ;;  %v665_v10 = vmax.f32 %v539_v6, 0.0  ;;  %v550_v11 = vadd.f32 %v7337_v7, %v8317_v60  ;;  %v1251_v5 = vld [vmem:[#allocation2 + $0x14] sm:$0x1] }
  0xfe   : > { %v541_v12 = vpop.f32.mrf.mxu0 }
  0xff   : > { %v944_v13 = vshrl.u32 %v7079_v9, 16  ;;  %v7077_v14 = vpack.c.bf16 %v665_v10, %v665_v10  ;;  %v668_v15 = vmax.f32 %v550_v11, 0.0  ;;  %v542_v16 = vadd.f32 %v8317_v60, %v541_v12 }
 0x100   : > { %v7340_v17 = vpop.f32.mrf.mxu0  ;;  %v947_v24 = vshll.u32 %v7079_v9, 16 }
 0x101   : > { %v946_v22 = vrot.slane %v944_v13, 7  ;;  %v927_v25 = vshrl.u32 %v7077_v14, 16  ;;  %v7080_v26 = vpack.c.bf16 %v668_v15, %v668_v15  ;;  %v930_v28 = vshll.u32 %v7077_v14, 16  ;;  %v1268_v14 = vld [vmem:[#allocation2 + $0x30] sm:$0xf] }
 0x102   : > { %v666_v29 = vmax.f32 %v542_v16, 0.0  ;;  %v563_v30 = vadd.f32 %v7340_v17, %v8317_v60  ;;  %v554_v31 = vpop.f32.mrf.mxu0 }
 0x103   : > { %v949_v33 = vor.u32 %v947_v24, %v946_v22  ;;  %v950_v34 = vrot.slane %v946_v22, 4  ;;  %v929_v35 = vrot.slane %v927_v25, 7  ;;  %v952_v36 = vshrl.u32 %v7080_v26, 16 }
 0x104   : > { %v955_v38 = vshll.u32 %v7080_v26, 16  ;;  %v7078_v39 = vpack.c.bf16 %v666_v29, %v666_v29  ;;  %v671_v40 = vmax.f32 %v563_v30, 0.0  ;;  %v555_v41 = vadd.f32 %v8317_v60, %v554_v31  ;;  %v7341_v42 = vpop.f32.mrf.mxu0 }
 0x105   : > { %v1255_v43 = vsel %vm8229_vm7, %v949_v33, %v1254_v27  ;;  %v932_v45 = vor.u32 %v930_v28, %v929_v35  ;;  %v933_v46 = vrot.slane %v929_v35, 4  ;;  %v954_v47 = vrot.slane %v952_v36, 7  ;;  %v1261_v35 = vld [vmem:[#allocation2 + $0x24] sm:$0xf] }
 0x106   : > { %1256 = vst [vmem:[#allocation2 + $0x18] sm:$0xf] %v1255_v43  ;;  %v935_v50 = vshrl.u32 %v7078_v39, 16  ;;  %v938_v51 = vshll.u32 %v7078_v39, 16  ;;  %v7083_v52 = vpack.c.bf16 %v671_v40, %v671_v40  ;;  %v669_v53 = vmax.f32 %v555_v41, 0.0  ;;  %v557_v54 = vpop.f32.mrf.mxu0 }
 0x107   : > { %v1248_v55 = vsel %vm8229_vm7, %v932_v45, %v1247_v37  ;;  %v957_v56 = vor.u32 %v955_v38, %v954_v47  ;;  %v959_v57 = vrot.slane %v954_v47, 4  ;;  %v566_v58 = vadd.f32 %v7341_v42, %v8317_v60  ;;  %v1272_v45 = vld [vmem:[#allocation2 + $0x38] sm:$0x1] }
 0x108   : > { %1249 = vst [vmem:[#allocation2 + $0xc] sm:$0xf] %v1248_v55  ;;  %v937_v59 = vrot.slane %v935_v50, 7  ;;  %v978_v62 = vshrl.u32 %v7083_v52, 16  ;;  %v981_v63 = vshll.u32 %v7083_v52, 16  ;;  %v7081_v0 = vpack.c.bf16 %v669_v53, %v669_v53  ;;  %v7344_v1 = vpop.f32.mrf.mxu0 }
 0x109   : > { %v958_v2 = vsel %vm8350_vm1, %v950_v34, %v957_v56  ;;  %v1259_v3 = vsel %vm8194_vm3, %v959_v57, %v1258_v49  ;;  %v672_v6 = vmax.f32 %v566_v58, 0.0  ;;  %v558_v7 = vadd.f32 %v8317_v60, %v557_v54  ;;  %v1265_v56 = vld [vmem:[#allocation2 + $0x2c] sm:$0x1] }
 0x10a   : > { %1257 = vst.msk [vmem:[#allocation2 + $0x1c] sm:$0xf] %vm810_vm6, %v958_v2  ;;  %1260 = vst [vmem:[#allocation2 + $0x20] sm:$0x1] %v1259_v3  ;;  %v940_v9 = vor.u32 %v938_v51, %v937_v59  ;;  %v942_v10 = vrot.slane %v937_v59, 4  ;;  %v980_v11 = vrot.slane %v978_v62, 7  ;;  %v570_v13 = vpop.f32.mrf.mxu0  ;;  %v579_v22 = vadd.f32 %v7344_v1, %v8317_v60 }
 0x10b   : > { %v961_v12 = vshrl.u32 %v7081_v0, 16  ;;  %v964_v15 = vshll.u32 %v7081_v0, 16  ;;  %v7084_v16 = vpack.c.bf16 %v672_v6, %v672_v6  ;;  %v670_v17 = vmax.f32 %v558_v7, 0.0 }
 0x10c   : > { %v941_v24 = vsel %vm8350_vm1, %v933_v46, %v940_v9  ;;  %v1252_v25 = vsel %vm8194_vm3, %v942_v10, %v1251_v5  ;;  %v983_v26 = vor.u32 %v981_v63, %v980_v11  ;;  %v984_v27 = vrot.slane %v980_v11, 4  ;;  %v7345_v28 = vpop.f32.mrf.mxu0 }
 0x10d   : > { %1250 = vst.msk [vmem:[#allocation2 + $0x10] sm:$0xf] %vm810_vm6, %v941_v24  ;;  %1253 = vst [vmem:[#allocation2 + $0x14] sm:$0x1] %v1252_v25  ;;  %v963_v29 = vrot.slane %v961_v12, 7  ;;  %v986_v30 = vshrl.u32 %v7084_v16, 16  ;;  %v7082_v33 = vpack.c.bf16 %v670_v17, %v670_v17  ;;  %v571_v37 = vadd.f32 %v8317_v60, %v570_v13 }
 0x10e   : > { %v989_v31 = vshll.u32 %v7084_v16, 16  ;;  %v1269_v34 = vsel %vm8229_vm7, %v983_v26, %v1268_v14  ;;  %v675_v36 = vmax.f32 %v579_v22, 0.0  ;;  %v582_v38 = vadd.f32 %v7345_v28, %v8317_v60  ;;  %v573_v39 = vpop.f32.mrf.mxu0  ;;  %v1282_v13 = vld [vmem:[#allocation2 + $0x48] sm:$0xf]  ;;  %v1275_v26 = vld [vmem:[#allocation2 + $0x3c] sm:$0xf] }
 0x10f   : > { %1270 = vst [vmem:[#allocation2 + $0x30] sm:$0xf] %v1269_v34  ;;  %v966_v40 = vor.u32 %v964_v15, %v963_v29  ;;  %v967_v41 = vrot.slane %v963_v29, 4  ;;  %v988_v42 = vrot.slane %v986_v30, 7  ;;  %v969_v43 = vshrl.u32 %v7082_v33, 16 }
 0x110   : > { %v972_v46 = vshll.u32 %v7082_v33, 16  ;;  %v7087_v47 = vpack.c.bf16 %v675_v36, %v675_v36  ;;  %v673_v49 = vmax.f32 %v571_v37, 0.0  ;;  %v676_v50 = vmax.f32 %v582_v38, 0.0  ;;  %v7348_v51 = vpop.f32.mrf.mxu0  ;;  %v1286_v36 = vld [vmem:[#allocation2 + $0x50] sm:$0x1] }
 0x111   : > { %v1262_v52 = vsel %vm8229_vm7, %v966_v40, %v1261_v35  ;;  %v991_v53 = vor.u32 %v989_v31, %v988_v42  ;;  %v993_v54 = vrot.slane %v988_v42, 4  ;;  %v971_v55 = vrot.slane %v969_v43, 7 }
 0x112   : > { %1263 = vst [vmem:[#allocation2 + $0x24] sm:$0xf] %v1262_v52  ;;  %v1012_v57 = vshrl.u32 %v7087_v47, 16  ;;  %v1015_v58 = vshll.u32 %v7087_v47, 16  ;;  %v7085_v59 = vpack.c.bf16 %v673_v49, %v673_v49  ;;  %v7088_v62 = vpack.c.bf16 %v676_v50, %v676_v50  ;;  %v586_v63 = vpop.f32.mrf.mxu0 }
 0x113   : > { %v992_v0 = vsel %vm8350_vm1, %v984_v27, %v991_v53  ;;  %v1273_v1 = vsel %vm8194_vm3, %v993_v54, %v1272_v45  ;;  %v974_v2 = vor.u32 %v972_v46, %v971_v55  ;;  %v976_v3 = vrot.slane %v971_v55, 4 }
 0x114   : > { %1271 = vst.msk [vmem:[#allocation2 + $0x34] sm:$0xf] %vm810_vm6, %v992_v0  ;;  %1274 = vst [vmem:[#allocation2 + $0x38] sm:$0x1] %v1273_v1  ;;  %v1014_v5 = vrot.slane %v1012_v57, 7  ;;  %v995_v6 = vshrl.u32 %v7085_v59, 16  ;;  %v7349_v10 = vpop.f32.mrf.mxu0  ;;  %v574_v15 = vadd.f32 %v8317_v60, %v573_v39  ;;  %v595_v28 = vadd.f32 %v7348_v51, %v8317_v60 }
 0x115   : > { %v998_v7 = vshll.u32 %v7085_v59, 16  ;;  %v1020_v9 = vshrl.u32 %v7088_v62, 16  ;;  %v975_v11 = vsel %vm8350_vm1, %v967_v41, %v974_v2  ;;  %v1266_v12 = vsel %vm8194_vm3, %v976_v3, %v1265_v56 }
 0x116   : > { %v1023_v14 = vshll.u32 %v7088_v62, 16  ;;  %1264 = vst.msk [vmem:[#allocation2 + $0x28] sm:$0xf] %vm810_vm6, %v975_v11  ;;  %1267 = vst [vmem:[#allocation2 + $0x2c] sm:$0x1] %v1266_v12  ;;  %v1017_v16 = vor.u32 %v1015_v58, %v1014_v5  ;;  %v1018_v17 = vrot.slane %v1014_v5, 4  ;;  %v589_v25 = vpop.f32.mrf.mxu0  ;;  %v587_v29 = vadd.f32 %v8317_v60, %v586_v63 }
 0x117   : > { %v997_v22 = vrot.slane %v995_v6, 7  ;;  %v1022_v24 = vrot.slane %v1020_v9, 7  ;;  %v674_v27 = vmax.f32 %v574_v15, 0.0  ;;  %v598_v30 = vadd.f32 %v7349_v10, %v8317_v60  ;;  %v1279_v63 = vld [vmem:[#allocation2 + $0x44] sm:$0x1] }
 0x118   : > { %v1283_v31 = vsel %vm8229_vm7, %v1017_v16, %v1282_v13  ;;  %v7352_v37 = vpop.f32.mrf.mxu0  ;;  %v679_v40 = vmax.f32 %v595_v28, 0.0  ;;  %v677_v41 = vmax.f32 %v587_v29, 0.0  ;;  %v590_v46 = vadd.f32 %v8317_v60, %v589_v25  ;;  %v1296_v11 = vld [vmem:[#allocation2 + $0x60] sm:$0xf]  ;;  %v1289_v25 = vld [vmem:[#allocation2 + $0x54] sm:$0xf] }
 0x119   : > { %v1000_v33 = vor.u32 %v998_v7, %v997_v22  ;;  %v1001_v34 = vrot.slane %v997_v22, 4  ;;  %v1025_v35 = vor.u32 %v1023_v14, %v1022_v24  ;;  %1284 = vst [vmem:[#allocation2 + $0x48] sm:$0xf] %v1283_v31  ;;  %v1027_v38 = vrot.slane %v1022_v24, 4 }
 0x11a   : > { %v7086_v39 = vpack.c.bf16 %v674_v27, %v674_v27  ;;  %v680_v45 = vmax.f32 %v598_v30, 0.0  ;;  %v602_v47 = vpop.f32.mrf.mxu0  ;;  %v7091_v52 = vpack.c.bf16 %v679_v40, %v679_v40  ;;  %v7089_v53 = vpack.c.bf16 %v677_v41, %v677_v41  ;;  %v1293_v41 = vld [vmem:[#allocation2 + $0x5c] sm:$0x1] }
 0x11b   : > { %v1276_v42 = vsel %vm8229_vm7, %v1000_v33, %v1275_v26  ;;  %v1026_v43 = vsel %vm8350_vm1, %v1018_v17, %v1025_v35  ;;  %v1287_v49 = vsel %vm8194_vm3, %v1027_v38, %v1286_v36  ;;  %v678_v55 = vmax.f32 %v590_v46, 0.0  ;;  %v1300_v26 = vld [vmem:[#allocation2 + $0x68] sm:$0x1] }
 0x11c   : > { %1277 = vst [vmem:[#allocation2 + $0x3c] sm:$0xf] %v1276_v42  ;;  %1285 = vst.msk [vmem:[#allocation2 + $0x4c] sm:$0xf] %vm810_vm6, %v1026_v43  ;;  %v1003_v50 = vshrl.u32 %v7086_v39, 16  ;;  %v1006_v51 = vshll.u32 %v7086_v39, 16  ;;  %v7092_v54 = vpack.c.bf16 %v680_v45, %v680_v45  ;;  %v611_v56 = vadd.f32 %v7352_v37, %v8317_v60  ;;  %v7353_v10 = vpop.f32.mrf.mxu0 }
 0x11d   : > { %1288 = vst [vmem:[#allocation2 + $0x50] sm:$0x1] %v1287_v49  ;;  %v1046_v58 = vshrl.u32 %v7091_v52, 16  ;;  %v1049_v59 = vshll.u32 %v7091_v52, 16  ;;  %v603_v62 = vadd.f32 %v8317_v60, %v602_v47  ;;  %v1029_v0 = vshrl.u32 %v7089_v53, 16 }
 0x11e   : > { %v1005_v57 = vrot.slane %v1003_v50, 7  ;;  %v1032_v1 = vshll.u32 %v7089_v53, 16  ;;  %v1054_v2 = vshrl.u32 %v7092_v54, 16  ;;  %v1057_v3 = vshll.u32 %v7092_v54, 16  ;;  %v605_v36 = vpop.f32.mrf.mxu0  ;;  %v1361_v37 = vld [vmem:[#allocation2 + $0xc] sm:$0xf] }
 0x11f   : > { %v1048_v7 = vrot.slane %v1046_v58, 7  ;;  %v7090_v9 = vpack.c.bf16 %v678_v55, %v678_v55  ;;  %v1031_v12 = vrot.slane %v1029_v0, 7  ;;  %v683_v14 = vmax.f32 %v611_v56, 0.0  ;;  %v1310_v56 = vld [vmem:[#allocation2 + $0x78] sm:$0xf] }
 0x120   : > { %v1008_v5 = vor.u32 %v1006_v51, %v1005_v57  ;;  %v1010_v6 = vrot.slane %v1005_v57, 4  ;;  %v1056_v13 = vrot.slane %v1054_v2, 7  ;;  %v681_v15 = vmax.f32 %v603_v62, 0.0  ;;  %v8417_v62 = vld [vmem:[#allocation2 + $0x10] sm:$0xf] }
 0x121   : > { %v1051_v22 = vor.u32 %v1049_v59, %v1048_v7  ;;  %v1052_v24 = vrot.slane %v1048_v7, 4  ;;  %v1034_v27 = vor.u32 %v1032_v1, %v1031_v12  ;;  %v1035_v28 = vrot.slane %v1031_v12, 4  ;;  %v7356_v1 = vpop.f32.mrf.mxu0  ;;  %v1303_v7 = vld [vmem:[#allocation2 + $0x6c] sm:$0xf] }
 0x122   : > { %v1009_v16 = vsel %vm8350_vm1, %v1001_v34, %v1008_v5  ;;  %v1280_v17 = vsel %vm8194_vm3, %v1010_v6, %v1279_v63  ;;  %v1059_v29 = vor.u32 %v1057_v3, %v1056_v13  ;;  %v1061_v30 = vrot.slane %v1056_v13, 4 }
 0x123   : > { %1278 = vst.msk [vmem:[#allocation2 + $0x40] sm:$0xf] %vm810_vm6, %v1009_v16  ;;  %1281 = vst [vmem:[#allocation2 + $0x44] sm:$0x1] %v1280_v17  ;;  %v1297_v31 = vsel %vm8229_vm7, %v1051_v22, %v1296_v11  ;;  %v1037_v33 = vshrl.u32 %v7090_v9, 16  ;;  %v1040_v35 = vshll.u32 %v7090_v9, 16  ;;  %v7095_v34 = vpack.c.bf16 %v683_v14, %v683_v14 }
 0x124   : > { %1298 = vst [vmem:[#allocation2 + $0x60] sm:$0xf] %v1297_v31  ;;  %v1290_v38 = vsel %vm8229_vm7, %v1034_v27, %v1289_v25  ;;  %v1060_v39 = vsel %vm8350_vm1, %v1052_v24, %v1059_v29  ;;  %v1301_v40 = vsel %vm8194_vm3, %v1061_v30, %v1300_v26  ;;  %v7093_v42 = vpack.c.bf16 %v681_v15, %v681_v15  ;;  %v8426_v14 = vld [vmem:[#allocation2 + $0x14] sm:$0x1]  ;;  %v1363_v27 = vld [vmem:[#allocation2 + $0x18] sm:$0xf] }
 0x125   : > { %1291 = vst [vmem:[#allocation2 + $0x54] sm:$0xf] %v1290_v38  ;;  %1299 = vst.msk [vmem:[#allocation2 + $0x64] sm:$0xf] %vm810_vm6, %v1060_v39  ;;  %v1039_v43 = vrot.slane %v1037_v33, 7  ;;  %v1080_v45 = vshrl.u32 %v7095_v34, 16  ;;  %v614_v47 = vadd.f32 %v7353_v10, %v8317_v60  ;;  %v606_v51 = vadd.f32 %v8317_v60, %v605_v36 }
 0x126   : > { %1302 = vst [vmem:[#allocation2 + $0x68] sm:$0x1] %v1301_v40  ;;  %v1083_v46 = vshll.u32 %v7095_v34, 16  ;;  %v1063_v49 = vshrl.u32 %v7093_v42, 16  ;;  %v1066_v50 = vshll.u32 %v7093_v42, 16  ;;  %v1436_v52 = vshrl.u32 %v1361_v37, 16 }
 0x127   : > { %v1042_v53 = vor.u32 %v1040_v35, %v1039_v43  ;;  %v1044_v54 = vrot.slane %v1039_v43, 4  ;;  %v1082_v55 = vrot.slane %v1080_v45, 7  ;;  %v684_v57 = vmax.f32 %v614_v47, 0.0  ;;  %v1314_v34 = vld [vmem:[#allocation2 + $0x80] sm:$0x1] }
 0x128   : > { %v1065_v58 = vrot.slane %v1063_v49, 7  ;;  %v682_v59 = vmax.f32 %v606_v51, 0.0  ;;  %v1438_v63 = vrot.slane %v1436_v52, 4  ;;  %v1439_v0 = vshll.u32 %v1361_v37, 16  ;;  %v1307_v39 = vld [vmem:[#allocation2 + $0x74] sm:$0x1] }
 0x129   : > { %v1043_v2 = vsel %vm8350_vm1, %v1035_v28, %v1042_v53  ;;  %v1294_v3 = vsel %vm8194_vm3, %v1044_v54, %v1293_v41  ;;  %v1085_v5 = vor.u32 %v1083_v46, %v1082_v55  ;;  %v1086_v6 = vrot.slane %v1082_v55, 4  ;;  %v618_v28 = vpop.f32.mrf.mxu0 }
 0x12a   : > { %1292 = vst.msk [vmem:[#allocation2 + $0x58] sm:$0xf] %vm810_vm6, %v1043_v2  ;;  %1295 = vst [vmem:[#allocation2 + $0x5c] sm:$0x1] %v1294_v3  ;;  %v1068_v9 = vor.u32 %v1066_v50, %v1065_v58  ;;  %v1069_v10 = vrot.slane %v1065_v58, 4  ;;  %v7096_v11 = vpack.c.bf16 %v684_v57, %v684_v57  ;;  %v7094_v12 = vpack.c.bf16 %v682_v59, %v682_v59 }
 0x12b   : > { %v1311_v13 = vsel %vm8229_vm7, %v1085_v5, %v1310_v56  ;;  %v1441_v15 = vrot.slane %v1439_v0, 5  ;;  %v1445_v16 = vshll.u32 %v8417_v62, 16  ;;  %v1449_v17 = vshrl.u32 %v8417_v62, 16  ;;  %v8434_v50 = vld [vmem:[#allocation2 + $0x1c] sm:$0xf]  ;;  %v7357_v51 = vpop.f32.mrf.mxu0 }
 0x12c   : > { %1312 = vst [vmem:[#allocation2 + $0x78] sm:$0xf] %v1311_v13  ;;  %v1304_v22 = vsel %vm8229_vm7, %v1068_v9, %v1303_v7  ;;  %v1088_v24 = vshrl.u32 %v7096_v11, 16  ;;  %v1091_v25 = vshll.u32 %v7096_v11, 16  ;;  %v1071_v26 = vshrl.u32 %v7094_v12, 16 }
 0x12d   : > { %1305 = vst [vmem:[#allocation2 + $0x6c] sm:$0xf] %v1304_v22  ;;  %v1074_v29 = vshll.u32 %v7094_v12, 16  ;;  %v1442_v30 = vor.u32 %v1441_v15, %v1438_v63  ;;  %v1447_v31 = vrot.slane %v1445_v16, 5  ;;  %v1451_v33 = vrot.slane %v1449_v17, 4 }
 0x12e   : > { %v1090_v35 = vrot.slane %v1088_v24, 7  ;;  %v1073_v36 = vrot.slane %v1071_v26, 7  ;;  %v1455_v37 = vshll.u32 %v8426_v14, 16  ;;  %v627_v38 = vadd.f32 %v7356_v1, %v8317_v60  ;;  %v8438_v56 = vld [vmem:[#allocation2 + $0x20] sm:$0x1] }
 0x12f   : > { %v1443_v40 = vrot.slane %v1442_v30, 4  ;;  %v1452_v41 = vor.u32 %v1451_v33, %v1447_v31  ;;  %v1460_v42 = vshrl.u32 %v1363_v27, 16  ;;  %v1463_v43 = vshll.u32 %v1363_v27, 16  ;;  %v1365_v16 = vld [vmem:[#allocation2 + $0x24] sm:$0xf] }
 0x130   : > { %v1093_v45 = vor.u32 %v1091_v25, %v1090_v35  ;;  %v1095_v46 = vrot.slane %v1090_v35, 4  ;;  %v1076_v47 = vor.u32 %v1074_v29, %v1073_v36  ;;  %v1078_v49 = vrot.slane %v1073_v36, 4  ;;  %v6822_v17 = vld [vmem:[%s10993_s4 + $0x10] sm:$0xf] }
 0x131   : > { %v1448_v52 = vsel %vm8268_vm11, %v1443_v40, %v1447_v31  ;;  %v1453_v53 = vrot.slane %v1452_v41, 4  ;;  %v1457_v54 = vrot.slane %v1455_v37, 5  ;;  %v687_v55 = vmax.f32 %v627_v38, 0.0  ;;  %v9451_v18 = vld [vmem:[#allocation2 + $0x5c] sm:$0x1] }
 0x132   : > { %v1094_v57 = vsel %vm8350_vm1, %v1086_v6, %v1093_v45  ;;  %v1315_v58 = vsel %vm8194_vm3, %v1095_v46, %v1314_v34  ;;  %v1077_v59 = vsel %vm8350_vm1, %v1069_v10, %v1076_v47  ;;  %v1308_v63 = vsel %vm8194_vm3, %v1078_v49, %v1307_v39  ;;  %v621_v10 = vpop.f32.mrf.mxu0  ;;  %v8466_v45 = vld [vmem:[#allocation2 + $0x28] sm:$0xf]  ;;  %11065 = vst [vmem:[#allocation33_spill] sm:$0xff] %v9451_v18 }
 0x133   : > { %1313 = vst.msk [vmem:[#allocation2 + $0x7c] sm:$0xf] %vm810_vm6, %v1094_v57  ;;  %1316 = vst [vmem:[#allocation2 + $0x80] sm:$0x1] %v1315_v58  ;;  %v1458_v0 = vsel %vm8268_vm11, %v1453_v53, %v1457_v54  ;;  %v7099_v1 = vpack.c.bf16 %v687_v55, %v687_v55  ;;  %v1462_v2 = vrot.slane %v1460_v42, 4  ;;  %v1465_v3 = vrot.slane %v1463_v43, 5 }
 0x134   : > { %1306 = vst.msk [vmem:[#allocation2 + $0x70] sm:$0xf] %vm810_vm6, %v1077_v59  ;;  %1309 = vst [vmem:[#allocation2 + $0x74] sm:$0x1] %v1308_v63  ;;  %v6677_v5 = vcombine.low %v1448_v52, %v1458_v0  ;;  %v1469_v6 = vshll.u32 %v8434_v50, 16  ;;  %v1473_v7 = vshrl.u32 %v8434_v50, 16  ;;  %v619_v15 = vadd.f32 %v8317_v60, %v618_v28 }
 0x135   : > { %v1479_v9 = vshll.u32 %v8438_v56, 16  ;;  %v1114_v11 = vshrl.u32 %v7099_v1, 16  ;;  %v1117_v12 = vshll.u32 %v7099_v1, 16  ;;  %v1466_v13 = vor.u32 %v1465_v3, %v1462_v2  ;;  %v1324_v28 = vld [vmem:[#allocation2 + $0x90] sm:$0xf] }
 0x136   : > { %7369 = vmatmul.mubr.msk.bf16.vlgmr.msra.gmra.mxu0 %vm1845_vm12, %v6677_v5  ;;  %v1471_v22 = vrot.slane %v1469_v6, 5  ;;  %v1475_v24 = vrot.slane %v1473_v7, 4  ;;  %v630_v26 = vadd.f32 %v7357_v51, %v8317_v60  ;;  %v685_v30 = vmax.f32 %v619_v15, 0.0  ;;  %v1317_v63 = vld [vmem:[#allocation2 + $0x84] sm:$0xf] }
 0x137   : > { %v1481_v25 = vrot.slane %v1479_v9, 5  ;;  %v1116_v27 = vrot.slane %v1114_v11, 7  ;;  %v1467_v29 = vrot.slane %v1466_v13, 4  ;;  %v622_v31 = vadd.f32 %v8317_v60, %v621_v10  ;;  %7435 = vmatpush3.bf16.msra.mxu0 %v8337_v19  ;;  %v7360_v19 = vpop.f32.mrf.mxu0  ;;  %v1328_v0 = vld [vmem:[#allocation2 + $0x98] sm:$0x1] }
 0x138   : > { %v1476_v33 = vor.u32 %v1475_v24, %v1471_v22  ;;  %v688_v35 = vmax.f32 %v630_v26, 0.0  ;;  %v1484_v34 = vshrl.u32 %v1365_v16, 16  ;;  %v1487_v36 = vshll.u32 %v1365_v16, 16  ;;  %7713 = vmatprep.subr.msk.bf16.mxu0 %vm1894_vm8, %v6822_v17  ;;  %v8473_v7 = vld [vmem:[#allocation2 + $0x2c] sm:$0x1] }
 0x139   : > { %v1119_v37 = vor.u32 %v1117_v12, %v1116_v27  ;;  %v1120_v38 = vrot.slane %v1116_v27, 4  ;;  %v1472_v39 = vsel %vm8268_vm11, %v1467_v29, %v1471_v22  ;;  %v7097_v40 = vpack.c.bf16 %v685_v30, %v685_v30  ;;  %v634_v10 = vpop.f32.mrf.mxu0  ;;  %v1321_v13 = vld [vmem:[#allocation2 + $0x8c] sm:$0x1]  ;;  %v1367_v17 = vld [vmem:[#allocation2 + $0x30] sm:$0xf] }
 0x13a   : > { %v1477_v41 = vrot.slane %v1476_v33, 4  ;;  %v7100_v42 = vpack.c.bf16 %v688_v35, %v688_v35  ;;  %v686_v43 = vmax.f32 %v622_v31, 0.0  ;;  %v1486_v46 = vrot.slane %v1484_v34, 4  ;;  %v8477_v27 = vld [vmem:[#allocation2 + $0x34] sm:$0xf] }
 0x13b   : > { %v1325_v47 = vsel %vm8229_vm7, %v1119_v37, %v1324_v28  ;;  %v1097_v49 = vshrl.u32 %v7097_v40, 16  ;;  %v1100_v51 = vshll.u32 %v7097_v40, 16  ;;  %v1489_v52 = vrot.slane %v1487_v36, 5  ;;  %v7361_v37 = vpop.f32.mrf.mxu0  ;;  %v8611_v48 = vld [vmem:[#allocation2 + $0x6c] sm:$0xf] }
 0x13c   : > { %1326 = vst [vmem:[#allocation2 + $0x90] sm:$0xf] %v1325_v47  ;;  %v1482_v53 = vsel %vm8268_vm11, %v1477_v41, %v1481_v25  ;;  %v1122_v54 = vshrl.u32 %v7100_v42, 16  ;;  %v1125_v55 = vshll.u32 %v7100_v42, 16  ;;  %v7098_v57 = vpack.c.bf16 %v686_v43, %v686_v43  ;;  %v8490_v42 = vld [vmem:[#allocation2 + $0x38] sm:$0x1] }
 0x13d   : > { %v6678_v58 = vcombine.low %v1472_v39, %v1482_v53  ;;  %v1099_v59 = vrot.slane %v1097_v49, 7  ;;  %v1490_v1 = vor.u32 %v1489_v52, %v1486_v46  ;;  %v1493_v2 = vshll.u32 %v8466_v45, 16 }
 0x13e   : > { %v1124_v3 = vrot.slane %v1122_v54, 7  ;;  %v1105_v5 = vshrl.u32 %v7098_v57, 16  ;;  %v1108_v6 = vshll.u32 %v7098_v57, 16  ;;  %v1497_v9 = vshrl.u32 %v8466_v45, 16 }
 0x13f   : > { %7372 = vmatprep.mubr.msk.bf16.mxu0 %vm1845_vm12, %v6678_v58  ;;  %v1102_v11 = vor.u32 %v1100_v51, %v1099_v59  ;;  %v1103_v12 = vrot.slane %v1099_v59, 4  ;;  %v1491_v15 = vrot.slane %v1490_v1, 4  ;;  %v1495_v16 = vrot.slane %v1493_v2, 5  ;;  %v1371_v59 = vld [vmem:[#allocation2 + $0x48] sm:$0xf] }
 0x140   : > { %v1127_v22 = vor.u32 %v1125_v55, %v1124_v3  ;;  %v1129_v24 = vrot.slane %v1124_v3, 4  ;;  %v1107_v25 = vrot.slane %v1105_v5, 7  ;;  %v1499_v26 = vrot.slane %v1497_v9, 4  ;;  %v8503_v5 = vld [vmem:[#allocation2 + $0x4c] sm:$0xf] }
 0x141   : > { %v1318_v29 = vsel %vm8229_vm7, %v1102_v11, %v1317_v63  ;;  %v1496_v30 = vsel %vm8268_vm11, %v1491_v15, %v1495_v16  ;;  %v1503_v31 = vshll.u32 %v8473_v7, 16  ;;  %v643_v28 = vadd.f32 %v7360_v19, %v8317_v60  ;;  %v637_v63 = vpop.f32.mrf.mxu0 }
 0x142   : > { %1319 = vst [vmem:[#allocation2 + $0x84] sm:$0xf] %v1318_v29  ;;  %v1128_v33 = vsel %vm8350_vm1, %v1120_v38, %v1127_v22  ;;  %v1329_v35 = vsel %vm8194_vm3, %v1129_v24, %v1328_v0  ;;  %v1110_v34 = vor.u32 %v1108_v6, %v1107_v25  ;;  %v1112_v36 = vrot.slane %v1107_v25, 4 }
 0x143   : > { %1327 = vst.msk [vmem:[#allocation2 + $0x94] sm:$0xf] %vm810_vm6, %v1128_v33  ;;  %1330 = vst [vmem:[#allocation2 + $0x98] sm:$0x1] %v1329_v35  ;;  %v1500_v39 = vor.u32 %v1499_v26, %v1495_v16  ;;  %v1505_v40 = vrot.slane %v1503_v31, 5  ;;  %v691_v41 = vmax.f32 %v643_v28, 0.0  ;;  %v635_v58 = vadd.f32 %v8317_v60, %v634_v10  ;;  %v8510_v29 = vpop.f32.mrf.mxu0 }
 0x144   : > { %v1508_v43 = vshrl.u32 %v1367_v17, 16  ;;  %v1111_v46 = vsel %vm8350_vm1, %v1103_v12, %v1110_v34  ;;  %v1322_v38 = vsel %vm8194_vm3, %v1112_v36, %v1321_v13  ;;  %v1511_v19 = vshll.u32 %v1367_v17, 16  ;;  %v1338_v17 = vld [vmem:[#allocation2 + $0xa8] sm:$0xf] }
 0x145   : > { %v1517_v47 = vshll.u32 %v8477_v27, 16  ;;  %1320 = vst.msk [vmem:[#allocation2 + $0x88] sm:$0xf] %vm810_vm6, %v1111_v46  ;;  %1323 = vst [vmem:[#allocation2 + $0x8c] sm:$0x1] %v1322_v38  ;;  %v1501_v49 = vrot.slane %v1500_v39, 4  ;;  %v7103_v51 = vpack.c.bf16 %v691_v41, %v691_v41  ;;  %v646_v16 = vadd.f32 %v7361_v37, %v8317_v60 }
 0x146   : > { %v1510_v52 = vrot.slane %v1508_v43, 4  ;;  %v1521_v53 = vshrl.u32 %v8477_v27, 16  ;;  %v1513_v54 = vrot.slane %v1511_v19, 5  ;;  %v1527_v57 = vshll.u32 %v8490_v42, 16  ;;  %v8516_v37 = vld [vmem:[#allocation2 + $0x50] sm:$0x1] }
 0x147   : > { %v1519_v55 = vrot.slane %v1517_v47, 5  ;;  %v1506_v0 = vsel %vm8268_vm11, %v1501_v49, %v1505_v40  ;;  %v1148_v1 = vshrl.u32 %v7103_v51, 16  ;;  %v1151_v2 = vshll.u32 %v7103_v51, 16  ;;  %v1331_v47 = vld [vmem:[#allocation2 + $0x9c] sm:$0xf] }
 0x148   : > { %v1523_v3 = vrot.slane %v1521_v53, 4  ;;  %v6679_v6 = vcombine.low %v1496_v30, %v1506_v0  ;;  %v1514_v9 = vor.u32 %v1513_v54, %v1510_v52  ;;  %v1529_v11 = vrot.slane %v1527_v57, 5  ;;  %v650_v52 = vpop.f32.mrf.mxu0 }
 0x149   : > { %v689_v12 = vmax.f32 %v635_v58, 0.0  ;;  %v8505_v13 = vrot.slane %v1148_v1, 7  ;;  %v1556_v10 = vshrl.u32 %v1371_v59, 16  ;;  %v1559_v25 = vshll.u32 %v1371_v59, 16  ;;  %v8526_v58 = vld [vmem:[#allocation2 + $0x3c] sm:$0xf] }
 0x14a   : > { %v1524_v15 = vor.u32 %v1523_v3, %v1519_v55  ;;  %7373 = vmatmul.mubr.msk.bf16.gmra.mxu0 %vm1845_vm12, %v6679_v6  ;;  %v1515_v22 = vrot.slane %v1514_v9, 4  ;;  %v1565_v26 = vshll.u32 %v8503_v5, 16  ;;  %v692_v33 = vmax.f32 %v646_v16, 0.0  ;;  %v1342_v1 = vld [vmem:[#allocation2 + $0xb0] sm:$0x1] }
 0x14b   : > { %v7101_v24 = vpack.c.bf16 %v689_v12, %v689_v12  ;;  %v1153_v30 = vor.u32 %v1151_v2, %v8505_v13  ;;  %v1154_v31 = vrot.slane %v8505_v13, 4  ;;  %v1558_v39 = vrot.slane %v1556_v10, 4  ;;  %v8533_v13 = vld [vmem:[#allocation2 + $0x40] sm:$0xf]  ;;  %v8537_v10 = vld [vmem:[#allocation2 + $0x44] sm:$0x1] }
 0x14c   : > { %v1525_v28 = vrot.slane %v1524_v15, 4  ;;  %v1520_v35 = vsel %vm8268_vm11, %v1515_v22, %v1519_v55  ;;  %v7104_v43 = vpack.c.bf16 %v692_v33, %v692_v33  ;;  %v1561_v46 = vrot.slane %v1559_v25, 5 }
 0x14d   : > { %v1131_v34 = vshrl.u32 %v7101_v24, 16  ;;  %v1134_v36 = vshll.u32 %v7101_v24, 16  ;;  %v1339_v40 = vsel %vm8229_vm7, %v1153_v30, %v1338_v17  ;;  %v1567_v49 = vrot.slane %v1565_v26, 5  ;;  %v7365_v24 = vpop.f32.mrf.mxu0 }
 0x14e   : > { %v1530_v41 = vsel %vm8268_vm11, %v1525_v28, %v1529_v11  ;;  %1340 = vst [vmem:[#allocation2 + $0xa8] sm:$0xf] %v1339_v40  ;;  %v1569_v51 = vshrl.u32 %v8503_v5, 16  ;;  %v1156_v53 = vshrl.u32 %v7104_v43, 16  ;;  %v1159_v54 = vshll.u32 %v7104_v43, 16 }
 0x14f   : > { %v6680_v38 = vcombine.low %v1520_v35, %v1530_v41  ;;  %v8522_v19 = vrot.slane %v1131_v34, 7  ;;  %v1562_v55 = vor.u32 %v1561_v46, %v1558_v39  ;;  %v1575_v57 = vshll.u32 %v8516_v37, 16 }
 0x150   : > { %v1571_v2 = vrot.slane %v1569_v51, 4  ;;  %v2449_v3 = vrot.slane %v8516_v37, 5  ;;  %v1158_v6 = vrot.slane %v1156_v53, 7  ;;  %v638_v12 = vadd.f32 %v8317_v60, %v637_v63 }
 0x151   : > { %7376 = vmatprep.mubr.msk.bf16.mxu0 %vm1845_vm12, %v6680_v38  ;;  %v1136_v59 = vor.u32 %v1134_v36, %v8522_v19  ;;  %v1137_v0 = vrot.slane %v8522_v19, 4  ;;  %v1563_v9 = vrot.slane %v1562_v55, 4  ;;  %v1577_v11 = vrot.slane %v1575_v57, 5  ;;  %v1352_v19 = vld [vmem:[#allocation2 + $0xc0] sm:$0xf] }
 0x152   : > { %v1572_v16 = vor.u32 %v1571_v2, %v1567_v49  ;;  %v1532_v17 = vshrl.u32 %v8526_v58, 16  ;;  %v1535_v22 = vshll.u32 %v8526_v58, 16  ;;  %v1161_v25 = vor.u32 %v1159_v54, %v1158_v6 }
 0x153   : > { %v1332_v15 = vsel %vm8229_vm7, %v1136_v59, %v1331_v47  ;;  %v1163_v26 = vrot.slane %v1158_v6, 4  ;;  %v1568_v30 = vsel %vm8268_vm11, %v1563_v9, %v1567_v49  ;;  %v690_v60 = vmax.f32 %v638_v12, 0.0  ;;  %v653_v47 = vpop.f32.mrf.mxu0  ;;  %v8553_v49 = vld [vmem:[#allocation2 + $0x54] sm:$0xf]  ;;  %v7861_v59 = vld [vmem:[%s10992_s3] ss:$0 sm:$0xff] }
 0x154   : > { %1333 = vst [vmem:[#allocation2 + $0x9c] sm:$0xf] %v1332_v15  ;;  %v1573_v63 = vrot.slane %v1572_v16, 4  ;;  %v1534_v28 = vrot.slane %v1532_v17, 4  ;;  %v1537_v33 = vrot.slane %v1535_v22, 5  ;;  %v1541_v35 = vshll.u32 %v8533_v13, 16 }
 0x155   : > { %v1162_v34 = vsel %vm8350_vm1, %v1154_v31, %v1161_v25  ;;  %v1343_v36 = vsel %vm8194_vm3, %v1163_v26, %v1342_v1  ;;  %v7102_v39 = vpack.c.bf16 %v690_v60, %v690_v60  ;;  %v1545_v40 = vshrl.u32 %v8533_v13, 16  ;;  %v1335_v15 = vld [vmem:[#allocation2 + $0xa4] sm:$0x1] }
 0x156   : > { %1341 = vst.msk [vmem:[#allocation2 + $0xac] sm:$0xf] %vm810_vm6, %v1162_v34  ;;  %1344 = vst [vmem:[#allocation2 + $0xb0] sm:$0x1] %v1343_v36  ;;  %v1578_v41 = vsel %vm8268_vm11, %v1573_v63, %v1577_v11  ;;  %v1538_v43 = vor.u32 %v1537_v33, %v1534_v28  ;;  %v1543_v46 = vrot.slane %v1541_v35, 5  ;;  %v1551_v38 = vshll.u32 %v8537_v10, 16 }
 0x157   : > { %v6682_v31 = vcombine.low %v1568_v30, %v1578_v41  ;;  %v1139_v51 = vshrl.u32 %v7102_v39, 16  ;;  %v1142_v53 = vshll.u32 %v7102_v39, 16  ;;  %v1547_v54 = vrot.slane %v1545_v40, 4  ;;  %v8573_v39 = vld [vmem:[#allocation2 + $0x58] sm:$0xf] }
 0x158   : > { %v1539_v55 = vrot.slane %v1538_v43, 4  ;;  %v1553_v57 = vrot.slane %v1551_v38, 5  ;;  %v659_v1 = vadd.f32 %v7861_v59, %v8510_v29  ;;  %v651_v2 = vadd.f32 %v7861_v59, %v650_v52 }
 0x159   : > { %7380 = vmatprep.mubr.msk.bf16.mxu1 %vm1845_vm12, %v6682_v31  ;;  %v1141_v6 = vrot.slane %v1139_v51, 7  ;;  %v1548_v9 = vor.u32 %v1547_v54, %v1543_v46  ;;  %v662_v11 = vadd.f32 %v7861_v59, %v7365_v24  ;;  %v654_v12 = vadd.f32 %v7861_v59, %v653_v47  ;;  %v1345_v47 = vld [vmem:[#allocation2 + $0xb4] sm:$0xf] }
 0x15a   : > { %v1544_v16 = vsel %vm8268_vm11, %v1539_v55, %v1543_v46  ;;  %v695_v17 = vmax.f32 %v659_v1, 0.0  ;;  %v693_v22 = vmax.f32 %v651_v2, 0.0  ;;  %v1580_v25 = vshrl.u32 %v8553_v49, 16  ;;  %v1356_v55 = vld [vmem:[#allocation2 + $0xc8] sm:$0x1] }
 0x15b   : > { %v1144_v26 = vor.u32 %v1142_v53, %v1141_v6  ;;  %v1146_v30 = vrot.slane %v1141_v6, 4  ;;  %v1549_v60 = vrot.slane %v1548_v9, 4  ;;  %v696_v63 = vmax.f32 %v662_v11, 0.0  ;;  %v2352_v11 = vld [vmem:[#allocation2 + $0xc] sm:$0xe] }
 0x15c   : > { %v7107_v29 = vpack.c.bf16 %v695_v17, %v695_v17  ;;  %v7105_v52 = vpack.c.bf16 %v693_v22, %v693_v22  ;;  %v694_v28 = vmax.f32 %v654_v12, 0.0  ;;  %v8563_v33 = vrot.slane %v1580_v25, 4  ;;  %v1349_v22 = vld [vmem:[#allocation2 + $0xbc] sm:$0x1] }
 0x15d   : > { %v1145_v24 = vsel %vm8350_vm1, %v1137_v0, %v1144_v26  ;;  %v1336_v35 = vsel %vm8194_vm3, %v1146_v30, %v1335_v15  ;;  %v1554_v34 = vsel %vm8268_vm11, %v1549_v60, %v1553_v57  ;;  %v7108_v36 = vpack.c.bf16 %v696_v63, %v696_v63  ;;  %v8584_v25 = vld [vmem:[#allocation2 + $0x5c] sm:$0x1] }
 0x15e   : > { %1334 = vst.msk [vmem:[#allocation2 + $0xa0] sm:$0xf] %vm810_vm6, %v1145_v24  ;;  %1337 = vst [vmem:[#allocation2 + $0xa4] sm:$0x1] %v1336_v35  ;;  %v6681_v40 = vcombine.low %v1544_v16, %v1554_v34  ;;  %v1182_v41 = vshrl.u32 %v7107_v29, 16  ;;  %v1185_v43 = vshll.u32 %v7107_v29, 16  ;;  %v7106_v51 = vpack.c.bf16 %v694_v28, %v694_v28 }
 0x15f   : > { %v1165_v46 = vshrl.u32 %v7105_v52, 16  ;;  %v1168_v38 = vshll.u32 %v7105_v52, 16  ;;  %v1190_v0 = vshrl.u32 %v7108_v36, 16  ;;  %v1193_v31 = vshll.u32 %v7108_v36, 16  ;;  %v8594_v34 = vld [vmem:[#allocation2 + $0x60] sm:$0xf] }
 0x160   : > { %7377 = vmatmul.mubr.msk.bf16.gmra.mxu0 %vm1845_vm12, %v6681_v40  ;;  %v1184_v53 = vrot.slane %v1182_v41, 7  ;;  %v1583_v57 = vshll.u32 %v8553_v49, 16  ;;  %v1589_v59 = vshll.u32 %v8573_v39, 16  ;;  %v1173_v2 = vshrl.u32 %v7106_v51, 16 }
 0x161   : > { %v1167_v54 = vrot.slane %v1165_v46, 7  ;;  %v1192_v1 = vrot.slane %v1190_v0, 7  ;;  %v1176_v6 = vshll.u32 %v7106_v51, 16  ;;  %7436 = vmatprep.mubr.msk.bf16.mxu0 %vm1845_vm12, %v6757_v20  ;;  %v1593_v9 = vshrl.u32 %v8573_v39, 16  ;;  %v8599_v46 = vld [vmem:[#allocation2 + $0x64] sm:$0xf] }
 0x162   : > { %v1187_v12 = vor.u32 %v1185_v43, %v1184_v53  ;;  %v1188_v15 = vrot.slane %v1184_v53, 4  ;;  %v1175_v60 = vrot.slane %v1173_v2, 7  ;;  %v1585_v63 = vrot.slane %v1583_v57, 5  ;;  %v2353_v51 = vld [vmem:[#allocation2 + $0x18] sm:$0xe] }
 0x163   : > { %v1170_v16 = vor.u32 %v1168_v38, %v1167_v54  ;;  %v1171_v17 = vrot.slane %v1167_v54, 4  ;;  %v1195_v26 = vor.u32 %v1193_v31, %v1192_v1  ;;  %v1197_v30 = vrot.slane %v1192_v1, 4  ;;  %v8607_v31 = vld [vmem:[#allocation2 + $0x68] sm:$0x1]  ;;  %v8617_v1 = vld [vmem:[#allocation2 + $0x70] sm:$0xf] }
 0x164   : > { %v1353_v29 = vsel %vm8229_vm7, %v1187_v12, %v1352_v19  ;;  %v1591_v4 = vrot.slane %v1589_v59, 5  ;;  %v1595_v20 = vrot.slane %v1593_v9, 4  ;;  %v1178_v24 = vor.u32 %v1176_v6, %v1175_v60 }
 0x165   : > { %v1346_v8 = vsel %vm8229_vm7, %v1170_v16, %v1345_v47  ;;  %1354 = vst [vmem:[#allocation2 + $0xc0] sm:$0xf] %v1353_v29  ;;  %v1196_v52 = vsel %vm8350_vm1, %v1188_v15, %v1195_v26  ;;  %v1357_v28 = vsel %vm8194_vm3, %v1197_v30, %v1356_v55  ;;  %v1180_v35 = vrot.slane %v1175_v60, 4 }
 0x166   : > { %1347 = vst [vmem:[#allocation2 + $0xb4] sm:$0xf] %v1346_v8  ;;  %1355 = vst.msk [vmem:[#allocation2 + $0xc4] sm:$0xf] %vm810_vm6, %v1196_v52  ;;  %v1586_v36 = vor.u32 %v1585_v63, %v8563_v33  ;;  %v1596_v40 = vor.u32 %v1595_v20, %v1591_v4  ;;  %v1599_v41 = vshll.u32 %v8584_v25, 16  ;;  %v6741_v43 = vrot.slane %v2352_v11, 9 }
 0x167   : > { %1358 = vst [vmem:[#allocation2 + $0xc8] sm:$0x1] %v1357_v28  ;;  %v1179_v19 = vsel %vm8350_vm1, %v1171_v17, %v1178_v24  ;;  %v1350_v38 = vsel %vm8194_vm3, %v1180_v35, %v1349_v22  ;;  %v2411_v47 = vrot.slane %v8417_v62, 5  ;;  %v2414_v0 = vrot.slane %v8426_v14, 5  ;;  %v8630_v63 = vld [vmem:[%s10993_s4 + $0xc] sm:$0xf] }
 0x168   : > { %1348 = vst.msk [vmem:[#allocation2 + $0xb8] sm:$0xf] %vm810_vm6, %v1179_v19  ;;  %1351 = vst [vmem:[#allocation2 + $0xbc] sm:$0x1] %v1350_v38  ;;  %v1587_v33 = vrot.slane %v1586_v36, 4  ;;  %v1597_v53 = vrot.slane %v1596_v40, 4 }
 0x169   : > { %v1601_v54 = vrot.slane %v1599_v41, 5  ;;  %v1604_v55 = vshrl.u32 %v8594_v34, 16  ;;  %v2412_v57 = vsel %vm8322_vm15, %v6741_v43, %v2411_v47  ;;  %v2413_v59 = vrot.slane %v2411_v47, 4  ;;  %v2354_v52 = vld [vmem:[#allocation2 + $0x24] sm:$0xe] }
 0x16a   : > { %v1607_v62 = vshll.u32 %v8594_v34, 16  ;;  %v1613_v14 = vshll.u32 %v8599_v46, 16  ;;  %v1592_v2 = vsel %vm8268_vm11, %v1587_v33, %v1591_v4  ;;  %v1617_v11 = vshrl.u32 %v8599_v46, 16  ;;  %v8638_v35 = vld [vmem:[#allocation2 + $0x74] sm:$0x1] }
 0x16b   : > { %v1602_v6 = vsel %vm8268_vm11, %v1597_v53, %v1601_v54  ;;  %v1606_v9 = vrot.slane %v1604_v55, 4  ;;  %v2415_v15 = vsel %vm8322_vm15, %v2413_v59, %v2414_v0  ;;  %v1623_v30 = vshll.u32 %v8607_v31, 16  ;;  %v8652_v54 = vld [vmem:[#allocation2 + $0x78] sm:$0xf] }
 0x16c   : > { %v6683_v12 = vcombine.low %v1592_v2, %v1602_v6  ;;  %v1609_v16 = vrot.slane %v1607_v62, 5  ;;  %v1615_v17 = vrot.slane %v1613_v14, 5  ;;  %v6758_v22 = vcombine.low %v2412_v57, %v2415_v15  ;;  %v8656_v14 = vld [vmem:[#allocation2 + $0x7c] sm:$0xf]  ;;  %v2355_v15 = vld [vmem:[#allocation2 + $0x30] sm:$0xe] }
 0x16d   : > { %v1619_v26 = vrot.slane %v1617_v11, 4  ;;  %v6742_v60 = vrot.slane %v2353_v51, 9  ;;  %v2418_v8 = vrot.slane %v8434_v50, 5  ;;  %v2421_v4 = vrot.slane %v8438_v56, 5 }
 0x16e   : > { %7381 = vmatmul.mubr.msk.bf16.vlgmr.msra.gmra.mxu1 %vm1845_vm12, %v6683_v12  ;;  %v1610_v29 = vor.u32 %v1609_v16, %v1606_v9  ;;  %v1628_v20 = vshrl.u32 %v8611_v48, 16  ;;  %7437 = vmatmul.mubr.msk.bf16.vlgmr.msra.gmra.mxu0 %vm1845_vm12, %v6758_v22  ;;  %v1625_v24 = vrot.slane %v1623_v30, 5  ;;  %v1631_v36 = vshll.u32 %v8611_v48, 16  ;;  %v8660_v12 = vld [vmem:[#allocation2 + $0x80] sm:$0x1] }
 0x16f   : > { %7401 = vmatpush3.bf16.msra.mxu1 %v8343_v32  ;;  %v1620_v28 = vor.u32 %v1619_v26, %v1615_v17  ;;  %v1637_v40 = vshll.u32 %v8617_v1, 16  ;;  %v2419_v50 = vsel %vm8322_vm15, %v6742_v60, %v2418_v8  ;;  %v2420_v56 = vrot.slane %v2418_v8, 4 }
 0x170   : > { %v1611_v41 = vrot.slane %v1610_v29, 4  ;;  %v1630_v43 = vrot.slane %v1628_v20, 4  ;;  %7712 = vmatprep.subr.msk.bf16.mxu1 %vm1894_vm8, %v8630_v63  ;;  %v1633_v19 = vrot.slane %v1631_v36, 5  ;;  %v1641_v47 = vshrl.u32 %v8617_v1, 16  ;;  %v8670_v29 = vld [vmem:[#allocation2 + $0x84] sm:$0xf] }
 0x171   : > { %v1621_v32 = vrot.slane %v1620_v28, 4  ;;  %v1639_v38 = vrot.slane %v1637_v40, 5  ;;  %v2422_v51 = vsel %vm8322_vm15, %v2420_v56, %v2421_v4  ;;  %v1647_v33 = vshll.u32 %v8638_v35, 16  ;;  %v8674_v28 = vld [vmem:[#allocation2 + $0x88] sm:$0xf] }
 0x172   : > { %v1616_v0 = vsel %vm8268_vm11, %v1611_v41, %v1615_v17  ;;  %v6743_v53 = vrot.slane %v2354_v52, 9  ;;  %v6759_v57 = vcombine.low %v2419_v50, %v2422_v51  ;;  %v1634_v59 = vor.u32 %v1633_v19, %v1630_v43  ;;  %v8681_v19 = vld [vmem:[#allocation2 + $0x8c] sm:$0x1] }
 0x173   : > { %v1626_v55 = vsel %vm8268_vm11, %v1621_v32, %v1625_v24  ;;  %v1643_v62 = vrot.slane %v1641_v47, 4  ;;  %v1649_v6 = vrot.slane %v1647_v33, 5  ;;  %v2425_v9 = vrot.slane %v8466_v45, 5 }
 0x174   : > { %v6684_v2 = vcombine.low %v1616_v0, %v1626_v55  ;;  %v2428_v11 = vrot.slane %v8473_v7, 5  ;;  %7440 = vmatprep.mubr.msk.bf16.mxu0 %vm1845_vm12, %v6759_v57  ;;  %v1635_v16 = vrot.slane %v1634_v59, 4  ;;  %v1652_v22 = vshrl.u32 %v8652_v54, 16  ;;  %v2356_v59 = vld [vmem:[#allocation2 + $0x3c] sm:$0xe] }
 0x175   : > { %v1644_v17 = vor.u32 %v1643_v62, %v1639_v38  ;;  %v1655_v26 = vshll.u32 %v8652_v54, 16  ;;  %v2426_v30 = vsel %vm8322_vm15, %v6743_v53, %v2425_v9  ;;  %v2427_v60 = vrot.slane %v2425_v9, 4 }
 0x176   : > { %7384 = vmatprep.mubr.msk.bf16.mxu1 %vm1845_vm12, %v6684_v2  ;;  %v1661_v45 = vshll.u32 %v8656_v14, 16  ;;  %v1665_v7 = vshrl.u32 %v8656_v14, 16  ;;  %v1640_v8 = vsel %vm8268_vm11, %v1635_v16, %v1639_v38  ;;  %v1654_v20 = vrot.slane %v1652_v22, 4 }
 0x177   : > { %v1645_v4 = vrot.slane %v1644_v17, 4  ;;  %v1657_v52 = vrot.slane %v1655_v26, 5  ;;  %v2429_v24 = vsel %vm8322_vm15, %v2427_v60, %v2428_v11  ;;  %v1671_v41 = vshll.u32 %v8660_v12, 16  ;;  %v8697_v17 = vld [vmem:[#allocation2 + $0x94] sm:$0xf] }
 0x178   : > { %v1663_v36 = vrot.slane %v1661_v45, 5  ;;  %v1667_v40 = vrot.slane %v1665_v7, 4  ;;  %v6760_v56 = vcombine.low %v2426_v30, %v2429_v24  ;;  %v6744_v32 = vrot.slane %v2355_v15, 9 }
 0x179   : > { %v1650_v50 = vsel %vm8268_vm11, %v1645_v4, %v1649_v6  ;;  %v1658_v43 = vor.u32 %v1657_v52, %v1654_v20  ;;  %v1673_v0 = vrot.slane %v1671_v41, 5  ;;  %v2432_v51 = vrot.slane %v8477_v27, 5  ;;  %v8692_v27 = vld [vmem:[#allocation2 + $0x90] sm:$0xf]  ;;  %v8704_v20 = vld [vmem:[#allocation2 + $0x98] sm:$0x1] }
 0x17a   : > { %v6685_v38 = vcombine.low %v1640_v8, %v1650_v50  ;;  %v1668_v47 = vor.u32 %v1667_v40, %v1663_v36  ;;  %7441 = vmatmul.mubr.msk.bf16.gmra.mxu0 %vm1845_vm12, %v6760_v56  ;;  %v2435_v53 = vrot.slane %v8490_v42, 5  ;;  %v1676_v55 = vshrl.u32 %v8670_v29, 16  ;;  %v2357_v41 = vld [vmem:[#allocation2 + $0x48] sm:$0xe] }
 0x17b   : > { %v1659_v33 = vrot.slane %v1658_v43, 4  ;;  %v1679_v57 = vshll.u32 %v8670_v29, 16  ;;  %v2433_v2 = vsel %vm8322_vm15, %v6744_v32, %v2432_v51  ;;  %v2434_v6 = vrot.slane %v2432_v51, 4 }
 0x17c   : > { %7385 = vmatmul.mubr.msk.bf16.gmra.mxu1 %vm1845_vm12, %v6685_v38  ;;  %v1669_v62 = vrot.slane %v1668_v47, 4  ;;  %v1685_v9 = vshll.u32 %v8674_v28, 16  ;;  %v1678_v42 = vrot.slane %v1676_v55, 4  ;;  %v1689_v16 = vshrl.u32 %v8674_v28, 16 }
 0x17d   : > { %v1664_v11 = vsel %vm8268_vm11, %v1659_v33, %v1663_v36  ;;  %v1681_v15 = vrot.slane %v1679_v57, 5  ;;  %v2436_v26 = vsel %vm8322_vm15, %v2434_v6, %v2435_v53  ;;  %v1695_v60 = vshll.u32 %v8681_v19, 16  ;;  %v8718_v33 = vld [vmem:[#allocation2 + $0xa0] sm:$0xf] }
 0x17e   : > { %v1674_v22 = vsel %vm8268_vm11, %v1669_v62, %v1673_v0  ;;  %v1687_v30 = vrot.slane %v1685_v9, 5  ;;  %v6761_v7 = vcombine.low %v2433_v2, %v2436_v26  ;;  %v1691_v4 = vrot.slane %v1689_v16, 4 }
 0x17f   : > { %v6686_v45 = vcombine.low %v1664_v11, %v1674_v22  ;;  %v1682_v8 = vor.u32 %v1681_v15, %v1678_v42  ;;  %v1697_v52 = vrot.slane %v1695_v60, 5  ;;  %v6745_v24 = vrot.slane %v2356_v59, 9 }
 0x180   : > { %v2439_v36 = vrot.slane %v8533_v13, 5  ;;  %v2442_v40 = vrot.slane %v8537_v10, 5  ;;  %7444 = vmatprep.mubr.msk.bf16.mxu0 %vm1845_vm12, %v6761_v7  ;;  %v1692_v56 = vor.u32 %v1691_v4, %v1687_v30  ;;  %v1700_v43 = vshrl.u32 %v8692_v27, 16  ;;  %v8716_v10 = vld [vmem:[#allocation2 + $0x9c] sm:$0xf] }
 0x181   : > { %7388 = vmatprep.mubr.msk.bf16.mxu1 %vm1845_vm12, %v6686_v45  ;;  %v1683_v50 = vrot.slane %v1682_v8, 4  ;;  %v1703_v32 = vshll.u32 %v8692_v27, 16  ;;  %v1709_v0 = vshll.u32 %v8697_v17, 16  ;;  %v1713_v51 = vshrl.u32 %v8697_v17, 16  ;;  %v8728_v45 = vld [vmem:[#allocation2 + $0xa4] sm:$0x1] }
 0x182   : > { %v2440_v38 = vsel %vm8322_vm15, %v6745_v24, %v2439_v36  ;;  %v2441_v47 = vrot.slane %v2439_v36, 4  ;;  %v1693_v55 = vrot.slane %v1692_v56, 4  ;;  %v1702_v57 = vrot.slane %v1700_v43, 4  ;;  %v2358_v7 = vld [vmem:[#allocation2 + $0x54] sm:$0xe] }
 0x183   : > { %v1688_v53 = vsel %vm8268_vm11, %v1683_v50, %v1687_v30  ;;  %v1705_v59 = vrot.slane %v1703_v32, 5  ;;  %v1711_v2 = vrot.slane %v1709_v0, 5  ;;  %v1715_v6 = vrot.slane %v1713_v51, 4  ;;  %v8738_v50 = vld [vmem:[#allocation2 + $0xa8] sm:$0xf] }
 0x184   : > { %v2443_v62 = vsel %vm8322_vm15, %v2441_v47, %v2442_v40  ;;  %v1719_v9 = vshll.u32 %v8704_v20, 16  ;;  %v1698_v11 = vsel %vm8268_vm11, %v1693_v55, %v1697_v52  ;;  %v6746_v16 = vrot.slane %v2357_v41, 9  ;;  %v8742_v47 = vld [vmem:[#allocation2 + $0xac] sm:$0xf] }
 0x185   : > { %v6762_v42 = vcombine.low %v2440_v38, %v2443_v62  ;;  %v1706_v15 = vor.u32 %v1705_v59, %v1702_v57  ;;  %v6687_v22 = vcombine.low %v1688_v53, %v1698_v11  ;;  %v1716_v26 = vor.u32 %v1715_v6, %v1711_v2 }
 0x186   : > { %v1721_v60 = vrot.slane %v1719_v9, 5  ;;  %v2446_v30 = vrot.slane %v8503_v5, 5  ;;  %v1724_v4 = vshrl.u32 %v8716_v10, 16  ;;  %v1727_v24 = vshll.u32 %v8716_v10, 16 }
 0x187   : > { %7445 = vmatmul.mubr.msk.bf16.gmra.mxu0 %vm1845_vm12, %v6762_v42  ;;  %v1707_v8 = vrot.slane %v1706_v15, 4  ;;  %v1733_v52 = vshll.u32 %v8718_v33, 16  ;;  %7389 = vmatmul.mubr.msk.bf16.gmra.mxu1 %vm1845_vm12, %v6687_v22  ;;  %v1717_v36 = vrot.slane %v1716_v26, 4  ;;  %v1737_v5 = vshrl.u32 %v8718_v33, 16  ;;  %v8755_v15 = vld [vmem:[#allocation2 + $0xb0] sm:$0x1] }
 0x188   : > { %v2447_v40 = vsel %vm8322_vm15, %v6746_v16, %v2446_v30  ;;  %v2448_v41 = vrot.slane %v2446_v30, 4  ;;  %v1726_v43 = vrot.slane %v1724_v4, 4  ;;  %v1729_v32 = vrot.slane %v1727_v24, 5 }
 0x189   : > { %v1712_v56 = vsel %vm8268_vm11, %v1707_v8, %v1711_v2  ;;  %v1735_v38 = vrot.slane %v1733_v52, 5  ;;  %v1722_v0 = vsel %vm8268_vm11, %v1717_v36, %v1721_v60  ;;  %v1739_v53 = vrot.slane %v1737_v5, 4 }
 0x18a   : > { %v2450_v51 = vsel %vm8322_vm15, %v2448_v41, %v2449_v3  ;;  %v1743_v55 = vshll.u32 %v8728_v45, 16  ;;  %v6688_v57 = vcombine.low %v1712_v56, %v1722_v0  ;;  %v1730_v62 = vor.u32 %v1729_v32, %v1726_v43  ;;  %v8770_v56 = vld [vmem:[#allocation2 + $0xb4] sm:$0xf]  ;;  %v8772_v43 = vld [vmem:[#allocation2 + $0xb8] sm:$0xf] }
 0x18b   : > { %v6763_v59 = vcombine.low %v2447_v40, %v2450_v51  ;;  %v6747_v2 = vrot.slane %v2358_v7, 9  ;;  %v1740_v6 = vor.u32 %v1739_v53, %v1735_v38  ;;  %v2453_v11 = vrot.slane %v8573_v39, 5  ;;  %v2359_v7 = vld [vmem:[#allocation2 + $0x60] sm:$0xe] }
 0x18c   : > { %v1745_v9 = vrot.slane %v1743_v55, 5  ;;  %v2456_v42 = vrot.slane %v8584_v25, 5  ;;  %7392 = vmatprep.mubr.msk.bf16.mxu1 %vm1845_vm12, %v6688_v57  ;;  %v1731_v37 = vrot.slane %v1730_v62, 4  ;;  %v1748_v3 = vshrl.u32 %v8738_v50, 16 }
 0x18d   : > { %7448 = vmatprep.mubr.msk.bf16.mxu0 %vm1845_vm12, %v6763_v59  ;;  %v1751_v16 = vshll.u32 %v8738_v50, 16  ;;  %v1757_v22 = vshll.u32 %v8742_v47, 16  ;;  %v1741_v26 = vrot.slane %v1740_v6, 4  ;;  %v2454_v60 = vsel %vm8322_vm15, %v6747_v2, %v2453_v11  ;;  %v8778_v2 = vld [vmem:[#allocation2 + $0xbc] sm:$0x1] }
 0x18e   : > { %v2455_v30 = vrot.slane %v2453_v11, 4  ;;  %v1761_v25 = vshrl.u32 %v8742_v47, 16  ;;  %v1736_v8 = vsel %vm8268_vm11, %v1731_v37, %v1735_v38  ;;  %v1750_v4 = vrot.slane %v1748_v3, 4 }
 0x18f   : > { %v1753_v24 = vrot.slane %v1751_v16, 5  ;;  %v1759_v52 = vrot.slane %v1757_v22, 5  ;;  %v1746_v36 = vsel %vm8268_vm11, %v1741_v26, %v1745_v9  ;;  %v1767_v5 = vshll.u32 %v8755_v15, 16 }
 0x190   : > { %v2457_v40 = vsel %vm8322_vm15, %v2455_v30, %v2456_v42  ;;  %v1763_v41 = vrot.slane %v1761_v25, 4  ;;  %v6689_v32 = vcombine.low %v1736_v8, %v1746_v36  ;;  %v6748_v38 = vrot.slane %v2359_v7, 9  ;;  %v2360_v30 = vld [vmem:[#allocation2 + $0x6c] sm:$0xe] }
 0x191   : > { %v6764_v0 = vcombine.low %v2454_v60, %v2457_v40  ;;  %v1754_v51 = vor.u32 %v1753_v24, %v1750_v4  ;;  %v1769_v55 = vrot.slane %v1767_v5, 5  ;;  %v2460_v57 = vrot.slane %v8599_v46, 5  ;;  %v2361_v24 = vld [vmem:[#allocation2 + $0x78] sm:$0xe] }
 0x192   : > { %v1764_v53 = vor.u32 %v1763_v41, %v1759_v52  ;;  %v2463_v59 = vrot.slane %v8607_v31, 5  ;;  %7393 = vmatmul.mubr.msk.bf16.gmra.mxu1 %vm1845_vm12, %v6689_v32  ;;  %v1772_v6 = vshrl.u32 %v8770_v56, 16  ;;  %v1775_v9 = vshll.u32 %v8770_v56, 16 }
 0x193   : > { %7449 = vmatmul.mubr.msk.bf16.gmra.mxu0 %vm1845_vm12, %v6764_v0  ;;  %v1755_v62 = vrot.slane %v1754_v51, 4  ;;  %v1781_v11 = vshll.u32 %v8772_v43, 16  ;;  %v2461_v37 = vsel %vm8322_vm15, %v6748_v38, %v2460_v57  ;;  %v2462_v3 = vrot.slane %v2460_v57, 4  ;;  %v2362_v57 = vld [vmem:[#allocation2 + $0x84] sm:$0xe] }
 0x194   : > { %v1765_v42 = vrot.slane %v1764_v53, 4  ;;  %v1785_v31 = vshrl.u32 %v8772_v43, 16  ;;  %v1774_v22 = vrot.slane %v1772_v6, 4  ;;  %v1777_v26 = vrot.slane %v1775_v9, 5 }
 0x195   : > { %v1760_v16 = vsel %vm8268_vm11, %v1755_v62, %v1759_v52  ;;  %v1783_v60 = vrot.slane %v1781_v11, 5  ;;  %v2464_v7 = vsel %vm8322_vm15, %v2462_v3, %v2463_v59  ;;  %v1791_v4 = vshll.u32 %v8778_v2, 16  ;;  %v7862_v3 = vld [vmem:[#allocation2] sm:$0xf] }
 0x196   : > { %v1770_v25 = vsel %vm8268_vm11, %v1765_v42, %v1769_v55  ;;  %v1787_v8 = vrot.slane %v1785_v31, 4  ;;  %v6765_v40 = vcombine.low %v2461_v37, %v2464_v7  ;;  %v1778_v41 = vor.u32 %v1777_v26, %v1774_v22 }
 0x197   : > { %v6690_v36 = vcombine.low %v1760_v16, %v1770_v25  ;;  %v1793_v32 = vrot.slane %v1791_v4, 5  ;;  %v6749_v52 = vrot.slane %v2360_v30, 9  ;;  %v2467_v0 = vrot.slane %v8617_v1, 5  ;;  %v7865_v4 = vld [vmem:[#allocation2 + $0x10] sm:$0xf] }
 0x198   : > { %v1788_v5 = vor.u32 %v1787_v8, %v1783_v60  ;;  %7452 = vmatprep.mubr.msk.bf16.mxu0 %vm1845_vm12, %v6765_v40  ;;  %v1779_v51 = vrot.slane %v1778_v41, 4  ;;  %v2470_v38 = vrot.slane %v8638_v35, 5  ;;  %v6750_v53 = vrot.slane %v2361_v24, 9  ;;  %v7863_v35 = vld [vmem:[#allocation2 + $0x4] sm:$0xf] }
 0x199   : > { %7396 = vmatprep.mubr.msk.bf16.mxu1 %vm1845_vm12, %v6690_v36  ;;  %v2474_v55 = vrot.slane %v8656_v14, 5  ;;  %v2468_v62 = vsel %vm8322_vm15, %v6749_v52, %v2467_v0  ;;  %v2469_v6 = vrot.slane %v2467_v0, 4  ;;  %v2477_v9 = vrot.slane %v8660_v12, 5  ;;  %v2363_v12 = vld [vmem:[#allocation2 + $0x90] sm:$0xe] }
 0x19a   : > { %v1789_v59 = vrot.slane %v1788_v5, 4  ;;  %v1784_v11 = vsel %vm8268_vm11, %v1779_v51, %v1783_v60  ;;  %v6708_v31 = vcombine.low %v7862_v3, %v7863_v35  ;;  %v6751_v26 = vrot.slane %v2362_v57, 9  ;;  %v7864_v8 = vld [vmem:[#allocation2 + $0xc] sm:$0xf]  ;;  %v2365_v52 = vld [vmem:[#allocation2 + $0xa8] sm:$0xe] }
 0x19b   : > { %v2475_v42 = vsel %vm8322_vm15, %v6750_v53, %v2474_v55  ;;  %v2476_v37 = vrot.slane %v2474_v55, 4  ;;  %v2471_v22 = vsel %vm8322_vm15, %v2469_v6, %v2470_v38  ;;  %v2481_v30 = vrot.slane %v8674_v28, 5  ;;  %v7866_v51 = vld [vmem:[#allocation2 + $0x18] sm:$0xf]  ;;  %v7867_v38 = vld [vmem:[#allocation2 + $0x1c] sm:$0xf] }
 0x19c   : > { %v1794_v16 = vsel %vm8268_vm11, %v1789_v59, %v1793_v32  ;;  %v6766_v7 = vcombine.low %v2468_v62, %v2471_v22  ;;  %v6709_v24 = vcombine.low %v7864_v8, %v7865_v4  ;;  %v2484_v5 = vrot.slane %v8681_v19, 5  ;;  %v2364_v32 = vld [vmem:[#allocation2 + $0x9c] sm:$0xe]  ;;  %v8823_v59 = vld [vmem:[%s10993_s4 + $0x18] sm:$0xf] }
 0x19d   : > { %v6691_v25 = vcombine.low %v1784_v11, %v1794_v16  ;;  %v2478_v60 = vsel %vm8322_vm15, %v2476_v37, %v2477_v9  ;;  %v2482_v40 = vsel %vm8322_vm15, %v6751_v26, %v2481_v30  ;;  %v2483_v41 = vrot.slane %v2481_v30, 4  ;;  %v7868_v62 = vld [vmem:[%s10993_s4 + $0x10] sm:$0xf]  ;;  %v8834_v9 = vld [vmem:[#allocation2 + $0x24] sm:$0xf] }
 0x19e   : > { %v6767_v36 = vcombine.low %v2475_v42, %v2478_v60  ;;  %7453 = vmatmul.mubr.msk.bf16.gmra.mxu0 %vm1845_vm12, %v6766_v7  ;;  %v2971_v0 = vsel %vm1894_vm8, %v8630_v63, 0  ;;  %v6710_v53 = vcombine.low %v7866_v51, %v7867_v38  ;;  %v6752_v55 = vrot.slane %v2363_v12, 9  ;;  %v8836_v11 = vld [vmem:[#allocation2 + $0x28] sm:$0xf]  ;;  %v2366_v30 = vld [vmem:[#allocation2 + $0xb4] sm:$0xe] }
 0x19f   : > { %7397 = vmatmul.mubr.msk.bf16.gmra.mxu1 %vm1845_vm12, %v6691_v25  ;;  %v2488_v57 = vrot.slane %v8697_v17, 5  ;;  %v2485_v19 = vsel %vm8322_vm15, %v2483_v41, %v2484_v5  ;;  %v2491_v63 = vrot.slane %v8704_v20, 5  ;;  %v3697_v6 = vsel %vm1894_vm8, %v7868_v62, 0  ;;  %v8853_v60 = vld [vmem:[#allocation2 + $0x30] sm:$0xf] }
 0x1a0   : > { %7456 = vmatprep.mubr.msk.bf16.mxu0 %vm1845_vm12, %v6767_v36  ;;  %7402 = vmatprep.mubr.msk.bf16.mxu1 %vm1845_vm12, %v6708_v31  ;;  %v6768_v37 = vcombine.low %v2482_v40, %v2485_v19  ;;  %v6753_v35 = vrot.slane %v2364_v32, 9  ;;  %v2495_v31 = vrot.slane %v8718_v33, 5  ;;  %v2498_v16 = vrot.slane %v8728_v45, 5  ;;  %v8855_v8 = vld [vmem:[#allocation2 + $0x34] sm:$0xf] }
 0x1a1   : > { %v2490_v3 = vrot.slane %v2488_v57, 4  ;;  %7503 = vmatpush3.bf16.msra.mxu0 %v3697_v6  ;;  %v2489_v20 = vsel %vm8322_vm15, %v6752_v55, %v2488_v57  ;;  %v6754_v22 = vrot.slane %v2365_v52, 9  ;;  %v2502_v26 = vrot.slane %v8742_v47, 5  ;;  %v3166_v4 = vld [vmem:[#allocation2 + $0xc] sm:$0xf] }
 0x1a2   : > { %7715 = vmatprep.subr.msk.bf16.mxu0 %vm1894_vm8, %v8823_v59  ;;  %v8851_v25 = vsel %vm8322_vm15, %v6753_v35, %v2495_v31  ;;  %v2497_v7 = vrot.slane %v2495_v31, 4  ;;  %v2505_v5 = vrot.slane %v8755_v15, 5  ;;  %v6755_v51 = vrot.slane %v2366_v30, 9  ;;  %v3167_v55 = vld [vmem:[#allocation2 + $0x10] sm:$0xf] }
 0x1a3   : > { %v2492_v12 = vsel %vm8322_vm15, %v2490_v3, %v2491_v63  ;;  %v8861_v40 = vsel %vm8322_vm15, %v6754_v22, %v2502_v26  ;;  %v2504_v41 = vrot.slane %v2502_v26, 4  ;;  %v2509_v38 = vrot.slane %v8772_v43, 5  ;;  %v3168_v57 = vld [vmem:[#allocation2 + $0x14] sm:$0x1]  ;;  %v3169_v15 = vld [vmem:[#allocation2 + $0x18] sm:$0xf] }
 0x1a4   : > { %v6769_v36 = vcombine.low %v2489_v20, %v2492_v12  ;;  %v2499_v32 = vsel %vm8322_vm15, %v2497_v7, %v2498_v16  ;;  %v2512_v62 = vrot.slane %v8778_v2, 5  ;;  %v3215_v6 = vshrl.u32 %v3166_v4, 16  ;;  %v8876_v3 = vld [vmem:[%s10993_s4 + $0x14] sm:$0xf]  ;;  %v8881_v20 = vld [vmem:[#allocation2 + $0x48] sm:$0xf] }
 0x1a5   : > { %v6770_v19 = vcombine.low %v8851_v25, %v2499_v32  ;;  %v2506_v63 = vsel %vm8322_vm15, %v2504_v41, %v2505_v5  ;;  %v2511_v31 = vrot.slane %v2509_v38, 4  ;;  %v8883_v16 = vld [vmem:[#allocation2 + $0x4c] sm:$0xf]  ;;  %v3218_v22 = vshll.u32 %v3166_v4, 16  ;;  %v3170_v25 = vld [vmem:[#allocation2 + $0x1c] sm:$0xf] }
 0x1a6   : > { %7457 = vmatmul.mubr.msk.bf16.gmra.mxu0 %vm1845_vm12, %v6768_v37  ;;  %v6771_v35 = vcombine.low %v8861_v40, %v2506_v63  ;;  %v3217_v26 = vrot.slane %v3215_v6, 4  ;;  %v3224_v30 = vshll.u32 %v3167_v55, 16  ;;  %v3228_v12 = vshrl.u32 %v3167_v55, 16  ;;  %v3171_v4 = vld [vmem:[#allocation2 + $0x20] sm:$0x1] }
 0x1a7   : > { %7403 = vmatmul.mubr.msk.bf16.vlgmr.msra.gmra.mxu1 %vm1845_vm12, %v6709_v24  ;;  %v3234_v24 = vshll.u32 %v3168_v57, 16  ;;  %7460 = vmatprep.mubr.msk.bf16.mxu0 %vm1845_vm12, %v6769_v36  ;;  %v8891_v37 = vsel %vm8322_vm15, %v6755_v51, %v2509_v38  ;;  %v8895_v7 = vsel %vm8322_vm15, %v2511_v31, %v2512_v62  ;;  %v3220_v40 = vrot.slane %v3218_v22, 5  ;;  %v3172_v32 = vld [vmem:[#allocation2 + $0x24] sm:$0xf]  ;;  %v3173_v22 = vld [vmem:[#allocation2 + $0x28] sm:$0xf] }
 0x1a8   : > { %7469 = vmatpush3.bf16.msra.mxu1 %v2971_v0  ;;  %7406 = vmatprep.mubr.msk.bf16.mxu1 %vm1845_vm12, %v6710_v53  ;;  %v3239_v0 = vshrl.u32 %v3169_v15, 16  ;;  %v3226_v41 = vrot.slane %v3224_v30, 5  ;;  %v3230_v5 = vrot.slane %v3228_v12, 4  ;;  %v3242_v55 = vshll.u32 %v3169_v15, 16  ;;  %v3174_v36 = vld [vmem:[#allocation2 + $0x2c] sm:$0x1] }
 0x1a9   : > { %7714 = vmatprep.subr.msk.bf16.mxu1 %vm1894_vm8, %v8876_v3  ;;  %v3221_v51 = vor.u32 %v3220_v40, %v3217_v26  ;;  %v3248_v57 = vshll.u32 %v3170_v25, 16  ;;  %v3236_v62 = vrot.slane %v3234_v24, 5  ;;  %v3252_v6 = vshrl.u32 %v3170_v25, 16 }
 0x1aa   : > { %v3241_v38 = vrot.slane %v3239_v0, 4  ;;  %v3231_v63 = vor.u32 %v3230_v5, %v3226_v41  ;;  %v3258_v31 = vshll.u32 %v3171_v4, 16  ;;  %v3244_v52 = vrot.slane %v3242_v55, 5 }
 0x1ab   : > { %v3222_v2 = vrot.slane %v3221_v51, 4  ;;  %v3250_v45 = vrot.slane %v3248_v57, 5  ;;  %v3263_v42 = vshrl.u32 %v3172_v32, 16  ;;  %v3254_v30 = vrot.slane %v3252_v6, 4 }
 0x1ac   : > { %v3232_v53 = vrot.slane %v3231_v63, 4  ;;  %v6716_v12 = vcombine.low %v8594_v34, %v8599_v46  ;;  %v3266_v23 = vshll.u32 %v3172_v32, 16  ;;  %v11040_v15 = vcombine.low %v8834_v9, %v8836_v11  ;;  %v3175_v32 = vld [vmem:[#allocation2 + $0x30] sm:$0xf] }
 0x1ad   : > { %v3245_v26 = vor.u32 %v3244_v52, %v3241_v38  ;;  %v3260_v24 = vrot.slane %v3258_v31, 5  ;;  %v3265_v25 = vrot.slane %v3263_v42, 4  ;;  %v3272_v40 = vshll.u32 %v3173_v22, 16  ;;  %v8919_v38 = vld [vmem:[#allocation2 + $0x34] sm:$0xf] }
 0x1ae   : > { %7461 = vmatmul.mubr.msk.bf16.gmra.mxu0 %vm1845_vm12, %v6770_v19  ;;  %v11041_v4 = vcombine.low %v8853_v60, %v8855_v8  ;;  %v3237_v0 = vsel %vm8268_vm11, %v3232_v53, %v3236_v62  ;;  %v3255_v5 = vor.u32 %v3254_v30, %v3250_v45  ;;  %v3268_v9 = vrot.slane %v3266_v23, 5  ;;  %v8925_v53 = vld [vmem:[#allocation2 + $0x38] sm:$0x1]  ;;  %v3178_v31 = vld [vmem:[#allocation2 + $0x3c] sm:$0xf] }
 0x1af   : > { %7407 = vmatmul.mubr.msk.bf16.gmra.mxu1 %vm1845_vm12, %v11040_v15  ;;  %7464 = vmatprep.mubr.msk.bf16.mxu0 %vm1845_vm12, %v6771_v35  ;;  %v3276_v11 = vshrl.u32 %v3173_v22, 16  ;;  %v3227_v52 = vsel %vm8268_vm11, %v3222_v2, %v3226_v41  ;;  %v3246_v19 = vrot.slane %v3245_v26, 4  ;;  %v3274_v42 = vrot.slane %v3272_v40, 5  ;;  %v8931_v26 = vld [vmem:[#allocation2 + $0x40] sm:$0xf] }
 0x1b0   : > { %7410 = vmatprep.mubr.msk.bf16.mxu1 %vm1845_vm12, %v11041_v4  ;;  %v3282_v51 = vshll.u32 %v3174_v36, 16  ;;  %v6823_v60 = vcombine.low %v3227_v52, %v3237_v0  ;;  %v3256_v8 = vrot.slane %v3255_v5, 4  ;;  %v3269_v55 = vor.u32 %v3268_v9, %v3265_v25  ;;  %v8944_v52 = vld [vmem:[#allocation2 + $0x44] sm:$0x1] }
 0x1b1   : > { %v3278_v57 = vrot.slane %v3276_v11, 4  ;;  %v3251_v35 = vsel %vm8268_vm11, %v3246_v19, %v3250_v45  ;;  %v6717_v23 = vcombine.low %v8611_v48, %v8617_v1  ;;  %v3287_v63 = vshrl.u32 %v3175_v32, 16 }
 0x1b2   : > { %v3290_v62 = vshll.u32 %v3175_v32, 16  ;;  %v3261_v2 = vsel %vm8268_vm11, %v3256_v8, %v3260_v24  ;;  %v3270_v41 = vrot.slane %v3269_v55, 4  ;;  %v3296_v6 = vshll.u32 %v8919_v38, 16 }
 0x1b3   : > { %v3279_v36 = vor.u32 %v3278_v57, %v3274_v42  ;;  %v3284_v22 = vrot.slane %v3282_v51, 5  ;;  %v3289_v30 = vrot.slane %v3287_v63, 4  ;;  %v3300_v45 = vshrl.u32 %v8919_v38, 16 }
 0x1b4   : > { %v3292_v15 = vrot.slane %v3290_v62, 5  ;;  %v6824_v25 = vcombine.low %v3251_v35, %v3261_v2  ;;  %v3298_v4 = vrot.slane %v3296_v6, 5  ;;  %v3306_v0 = vshll.u32 %v8925_v53, 16  ;;  %v8958_v62 = vld [vmem:[#allocation2 + $0x4c] sm:$0xf] }
 0x1b5   : > { %v3280_v40 = vrot.slane %v3279_v36, 4  ;;  %v11042_v24 = vcombine.low %v8526_v58, %v8533_v13  ;;  %v11043_v5 = vcombine.low %v8891_v37, %v8895_v7  ;;  %v3275_v9 = vsel %vm8268_vm11, %v3270_v41, %v3274_v42  ;;  %v3181_v42 = vld [vmem:[#allocation2 + $0x48] sm:$0xf] }
 0x1b6   : > { %v3293_v11 = vor.u32 %v3292_v15, %v3289_v30  ;;  %v3302_v32 = vrot.slane %v3300_v45, 4  ;;  %v3311_v19 = vshrl.u32 %v3178_v31, 16  ;;  %v11044_v51 = vcombine.low %v8881_v20, %v8883_v16  ;;  %v8964_v15 = vld [vmem:[#allocation2 + $0x50] sm:$0x1] }
 0x1b7   : > { %7411 = vmatmul.mubr.msk.bf16.gmra.mxu1 %vm1845_vm12, %v11042_v24  ;;  %7465 = vmatmul.mubr.msk.bf16.gmra.mxu0 %vm1845_vm12, %v11043_v5  ;;  %v3285_v58 = vsel %vm8268_vm11, %v3280_v40, %v3284_v22  ;;  %v6718_v13 = vcombine.low %v8652_v54, %v8656_v14  ;;  %v3314_v37 = vshll.u32 %v3178_v31, 16  ;;  %v3320_v7 = vshll.u32 %v8931_v26, 16 }
 0x1b8   : > { %7414 = vmatprep.mubr.msk.bf16.mxu1 %vm1845_vm12, %v11044_v51  ;;  %7504 = vmatprep.mubr.msk.bf16.mxu0 %vm1845_vm12, %v6823_v60  ;;  %v3294_v8 = vrot.slane %v3293_v11, 4  ;;  %v3303_v55 = vor.u32 %v3302_v32, %v3298_v4  ;;  %v3308_v57 = vrot.slane %v3306_v0, 5  ;;  %v3313_v35 = vrot.slane %v3311_v19, 4 }
 0x1b9   : > { %v3316_v63 = vrot.slane %v3314_v37, 5  ;;  %v3322_v20 = vrot.slane %v3320_v7, 5  ;;  %v3324_v16 = vshrl.u32 %v8931_v26, 16  ;;  %v3330_v60 = vshll.u32 %v8944_v52, 16 }
 0x1ba   : > { %v6825_v2 = vcombine.low %v3275_v9, %v3285_v58  ;;  %v3304_v41 = vrot.slane %v3303_v55, 4  ;;  %v6719_v36 = vcombine.low %v8670_v29, %v8674_v28  ;;  %v3335_v6 = vshrl.u32 %v3181_v42, 16  ;;  %v3184_v9 = vld [vmem:[#allocation2 + $0x54] sm:$0xf]  ;;  %v8970_v58 = vld [vmem:[#allocation2 + $0x58] sm:$0xf] }
 0x1bb   : > { %v3299_v31 = vsel %vm8268_vm11, %v3294_v8, %v3298_v4  ;;  %v3317_v22 = vor.u32 %v3316_v63, %v3313_v35  ;;  %v3326_v30 = vrot.slane %v3324_v16, 4  ;;  %v3338_v45 = vshll.u32 %v3181_v42, 16  ;;  %v8987_v63 = vld [vmem:[#allocation2 + $0x5c] sm:$0x1] }
 0x1bc   : > { %v3309_v40 = vsel %vm8268_vm11, %v3304_v41, %v3308_v57  ;;  %v3337_v0 = vrot.slane %v3335_v6, 4  ;;  %v3344_v24 = vshll.u32 %v8958_v62, 16  ;;  %v3348_v5 = vshrl.u32 %v8958_v62, 16  ;;  %v3187_v41 = vld [vmem:[#allocation2 + $0x60] sm:$0xf] }
 0x1bd   : > { %v3318_v11 = vrot.slane %v3317_v22, 4  ;;  %v3327_v32 = vor.u32 %v3326_v30, %v3322_v20  ;;  %v3332_v19 = vrot.slane %v3330_v60, 5  ;;  %v3340_v51 = vrot.slane %v3338_v45, 5  ;;  %v8993_v45 = vld [vmem:[#allocation2 + $0x64] sm:$0xf] }
 0x1be   : > { %v11045_v4 = vcombine.low %v8553_v49, %v8573_v39  ;;  %v3346_v37 = vrot.slane %v3344_v24, 5  ;;  %v3350_v7 = vrot.slane %v3348_v5, 4  ;;  %v3354_v42 = vshll.u32 %v8964_v15, 16 }
 0x1bf   : > { %7505 = vmatmul.mubr.msk.bf16.vlgmr.msra.gmra.mxu0 %vm1845_vm12, %v6824_v25  ;;  %v6720_v8 = vcombine.low %v8692_v27, %v8697_v17  ;;  %v6826_v55 = vcombine.low %v3299_v31, %v3309_v40  ;;  %v3328_v49 = vrot.slane %v3327_v32, 4  ;;  %v3341_v39 = vor.u32 %v3340_v51, %v3337_v0 }
 0x1c0   : > { %7415 = vmatmul.mubr.msk.bf16.gmra.mxu1 %vm1845_vm12, %v11045_v4  ;;  %7508 = vmatprep.mubr.msk.bf16.mxu0 %vm1845_vm12, %v6825_v2  ;;  %v3359_v57 = vshrl.u32 %v3184_v9, 16  ;;  %v3323_v25 = vsel %vm8268_vm11, %v3318_v11, %v3322_v20  ;;  %v3351_v35 = vor.u32 %v3350_v7, %v3346_v37  ;;  %v3362_v16 = vshll.u32 %v3184_v9, 16  ;;  %v9000_v11 = vld [vmem:[#allocation2 + $0x68] sm:$0x1] }
 0x1c1   : > { %7418 = vmatprep.mubr.msk.bf16.mxu1 %vm1845_vm12, %v6716_v12  ;;  %v3368_v60 = vshll.u32 %v8970_v58, 16  ;;  %v3333_v34 = vsel %vm8268_vm11, %v3328_v49, %v3332_v19  ;;  %v3342_v46 = vrot.slane %v3341_v39, 4  ;;  %v3372_v2 = vshrl.u32 %v8970_v58, 16  ;;  %v3190_v49 = vld [vmem:[#allocation2 + $0x6c] sm:$0xf] }
 0x1c2   : > { %v3361_v12 = vrot.slane %v3359_v57, 4  ;;  %v3352_v6 = vrot.slane %v3351_v35, 4  ;;  %v3356_v31 = vrot.slane %v3354_v42, 5  ;;  %v3364_v22 = vrot.slane %v3362_v16, 5  ;;  %v9011_v35 = vld [vmem:[#allocation2 + $0x70] sm:$0xf] }
 0x1c3   : > { %v3370_v30 = vrot.slane %v3368_v60, 5  ;;  %v6827_v20 = vcombine.low %v3323_v25, %v3333_v34  ;;  %v3374_v40 = vrot.slane %v3372_v2, 4  ;;  %v3378_v0 = vshll.u32 %v8987_v63, 16 }
 0x1c4   : > { %v6721_v24 = vcombine.low %v8716_v10, %v8718_v33  ;;  %v3347_v5 = vsel %vm8268_vm11, %v3342_v46, %v3346_v37  ;;  %v3365_v9 = vor.u32 %v3364_v22, %v3361_v12  ;;  %v3383_v32 = vshrl.u32 %v3187_v41, 16  ;;  %v9021_v46 = vld [vmem:[#allocation2 + $0x74] sm:$0x1] }
 0x1c5   : > { %v3386_v19 = vshll.u32 %v3187_v41, 16  ;;  %v3357_v51 = vsel %vm8268_vm11, %v3352_v6, %v3356_v31  ;;  %v3375_v4 = vor.u32 %v3374_v40, %v3370_v30  ;;  %v3380_v7 = vrot.slane %v3378_v0, 5  ;;  %v3193_v41 = vld [vmem:[#allocation2 + $0x78] sm:$0xf] }
 0x1c6   : > { %v3392_v42 = vshll.u32 %v8993_v45, 16  ;;  %v3366_v37 = vrot.slane %v3365_v9, 4  ;;  %v3385_v39 = vrot.slane %v3383_v32, 4  ;;  %v3396_v25 = vshrl.u32 %v8993_v45, 16  ;;  %v9030_v32 = vld [vmem:[#allocation2 + $0x7c] sm:$0xf] }
 0x1c7   : > { %7509 = vmatmul.mubr.msk.bf16.gmra.mxu0 %vm1845_vm12, %v6826_v55  ;;  %v3388_v57 = vrot.slane %v3386_v19, 5  ;;  %v3376_v16 = vrot.slane %v3375_v4, 4  ;;  %v3402_v1 = vshll.u32 %v9000_v11, 16  ;;  %v6828_v55 = vcombine.low %v3347_v5, %v3357_v51 }
 0x1c8   : > { %7419 = vmatmul.mubr.msk.bf16.gmra.mxu1 %vm1845_vm12, %v6717_v23  ;;  %7512 = vmatprep.mubr.msk.bf16.mxu0 %vm1845_vm12, %v6827_v20  ;;  %v3394_v48 = vrot.slane %v3392_v42, 5  ;;  %v6722_v23 = vcombine.low %v8738_v50, %v8742_v47  ;;  %v3398_v34 = vrot.slane %v3396_v25, 4  ;;  %v3407_v12 = vshrl.u32 %v3190_v49, 16 }
 0x1c9   : > { %7422 = vmatprep.mubr.msk.bf16.mxu1 %vm1845_vm12, %v6718_v13  ;;  %v3389_v60 = vor.u32 %v3388_v57, %v3385_v39  ;;  %v3371_v54 = vsel %vm8268_vm11, %v3366_v37, %v3370_v30  ;;  %v3381_v14 = vsel %vm8268_vm11, %v3376_v16, %v3380_v7  ;;  %v3410_v13 = vshll.u32 %v3190_v49, 16  ;;  %v9036_v37 = vld [vmem:[#allocation2 + $0x80] sm:$0x1]  ;;  %v3196_v57 = vld [vmem:[#allocation2 + $0x84] sm:$0xf] }
 0x1ca   : > { %v3416_v2 = vshll.u32 %v9011_v35, 16  ;;  %v3399_v31 = vor.u32 %v3398_v34, %v3394_v48  ;;  %v3404_v22 = vrot.slane %v3402_v1, 5  ;;  %v3409_v20 = vrot.slane %v3407_v12, 4 }
 0x1cb   : > { %v3390_v6 = vrot.slane %v3389_v60, 4  ;;  %v3412_v40 = vrot.slane %v3410_v13, 5  ;;  %v3420_v5 = vshrl.u32 %v9011_v35, 16  ;;  %v3426_v9 = vshll.u32 %v9021_v46, 16 }
 0x1cc   : > { %v3418_v0 = vrot.slane %v3416_v2, 5  ;;  %v6829_v30 = vcombine.low %v3371_v54, %v3381_v14  ;;  %v3400_v19 = vrot.slane %v3399_v31, 4  ;;  %v6723_v51 = vcombine.low %v8770_v56, %v8772_v43 }
 0x1cd   : > { %v3431_v4 = vshrl.u32 %v3193_v41, 16  ;;  %v3395_v7 = vsel %vm8268_vm11, %v3390_v6, %v3394_v48  ;;  %v3413_v42 = vor.u32 %v3412_v40, %v3409_v20  ;;  %v3422_v49 = vrot.slane %v3420_v5, 4  ;;  %v9055_v6 = vld [vmem:[#allocation2 + $0x8c] sm:$0x1]  ;;  %v3199_v20 = vld [vmem:[#allocation2 + $0x90] sm:$0xf] }
 0x1ce   : > { %v3434_v39 = vshll.u32 %v3193_v41, 16  ;;  %v3405_v25 = vsel %vm8268_vm11, %v3400_v19, %v3404_v22  ;;  %v3440_v1 = vshll.u32 %v9030_v32, 16  ;;  %v3444_v48 = vshrl.u32 %v9030_v32, 16  ;;  %v9063_v19 = vld [vmem:[#allocation2 + $0x94] sm:$0xf] }
 0x1cf   : > { %7513 = vmatmul.mubr.msk.bf16.gmra.mxu0 %vm1845_vm12, %v6828_v55  ;;  %v3433_v16 = vrot.slane %v3431_v4, 4  ;;  %v3414_v29 = vrot.slane %v3413_v42, 4  ;;  %v3423_v28 = vor.u32 %v3422_v49, %v3418_v0  ;;  %v9052_v55 = vld [vmem:[#allocation2 + $0x88] sm:$0xf]  ;;  %v3450_v54 = vshll.u32 %v9036_v37, 16 }
 0x1d0   : > { %7423 = vmatmul.mubr.msk.bf16.gmra.mxu1 %vm1845_vm12, %v6719_v36  ;;  %7516 = vmatprep.mubr.msk.bf16.mxu0 %vm1845_vm12, %v6829_v30  ;;  %v3428_v36 = vrot.slane %v3426_v9, 5  ;;  %v3436_v60 = vrot.slane %v3434_v39, 5  ;;  %v3442_v34 = vrot.slane %v3440_v1, 5  ;;  %v3446_v12 = vrot.slane %v3444_v48, 4  ;;  %v9075_v48 = vld [vmem:[#allocation2 + $0x98] sm:$0x1] }
 0x1d1   : > { %7426 = vmatprep.mubr.msk.bf16.mxu1 %vm1845_vm12, %v6720_v8  ;;  %v3455_v14 = vshrl.u32 %v3196_v57, 16  ;;  %v6830_v13 = vcombine.low %v3395_v7, %v3405_v25  ;;  %v3424_v2 = vrot.slane %v3423_v28, 4  ;;  %v3458_v27 = vshll.u32 %v3196_v57, 16 }
 0x1d2   : > { %v3437_v41 = vor.u32 %v3436_v60, %v3433_v16  ;;  %v3419_v17 = vsel %vm8268_vm11, %v3414_v29, %v3418_v0  ;;  %v3447_v8 = vor.u32 %v3446_v12, %v3442_v34  ;;  %v3464_v22 = vshll.u32 %v9052_v55, 16 }
 0x1d3   : > { %v3457_v31 = vrot.slane %v3455_v14, 4  ;;  %v3429_v40 = vsel %vm8268_vm11, %v3424_v2, %v3428_v36  ;;  %v3460_v9 = vrot.slane %v3458_v27, 5  ;;  %v3468_v30 = vshrl.u32 %v9052_v55, 16  ;;  %v3202_v36 = vld [vmem:[#allocation2 + $0x9c] sm:$0xf] }
 0x1d4   : > { %v3438_v5 = vrot.slane %v3437_v41, 4  ;;  %v3448_v4 = vrot.slane %v3447_v8, 4  ;;  %v3452_v7 = vrot.slane %v3450_v54, 5  ;;  %v3466_v42 = vrot.slane %v3464_v22, 5  ;;  %v9095_v8 = vld [vmem:[#allocation2 + $0xa4] sm:$0x1] }
 0x1d5   : > { %v3474_v49 = vshll.u32 %v9055_v6, 16  ;;  %v6831_v0 = vcombine.low %v3419_v17, %v3429_v40  ;;  %v3461_v39 = vor.u32 %v3460_v9, %v3457_v31  ;;  %v3470_v57 = vrot.slane %v3468_v30, 4  ;;  %v3205_v9 = vld [vmem:[#allocation2 + $0xa8] sm:$0xf] }
 0x1d6   : > { %v3479_v25 = vshrl.u32 %v3199_v20, 16  ;;  %v3443_v16 = vsel %vm8268_vm11, %v3438_v5, %v3442_v34  ;;  %v3453_v1 = vsel %vm8268_vm11, %v3448_v4, %v3452_v7  ;;  %v3482_v29 = vshll.u32 %v3199_v20, 16 }
 0x1d7   : > { %7517 = vmatmul.mubr.msk.bf16.gmra.mxu0 %vm1845_vm12, %v6830_v13  ;;  %v3488_v28 = vshll.u32 %v9063_v19, 16  ;;  %v3462_v10 = vrot.slane %v3461_v39, 4  ;;  %v3471_v33 = vor.u32 %v3470_v57, %v3466_v42  ;;  %v6832_v34 = vcombine.low %v3443_v16, %v3453_v1  ;;  %v9086_v13 = vld [vmem:[#allocation2 + $0xa0] sm:$0xf] }
 0x1d8   : > { %7427 = vmatmul.mubr.msk.bf16.gmra.mxu1 %vm1845_vm12, %v6721_v24  ;;  %7520 = vmatprep.mubr.msk.bf16.mxu0 %vm1845_vm12, %v6831_v0  ;;  %v3476_v24 = vrot.slane %v3474_v49, 5  ;;  %v3481_v60 = vrot.slane %v3479_v25, 4  ;;  %v3484_v12 = vrot.slane %v3482_v29, 5  ;;  %v3492_v14 = vshrl.u32 %v9063_v19, 16  ;;  %v9102_v49 = vld [vmem:[#allocation2 + $0xac] sm:$0xf] }
 0x1d9   : > { %7430 = vmatprep.mubr.msk.bf16.mxu1 %vm1845_vm12, %v6722_v23  ;;  %v9083_v54 = vrot.slane %v3488_v28, 5  ;;  %v3467_v2 = vsel %vm8268_vm11, %v3462_v10, %v3466_v42  ;;  %v3472_v50 = vrot.slane %v3471_v33, 4  ;;  %v3498_v47 = vshll.u32 %v9075_v48, 16  ;;  %v3208_v33 = vld [vmem:[#allocation2 + $0xb4] sm:$0xf] }
 0x1da   : > { %v3503_v23 = vshrl.u32 %v3202_v36, 16  ;;  %v3485_v41 = vor.u32 %v3484_v12, %v3481_v60  ;;  %v3494_v27 = vrot.slane %v3492_v14, 4  ;;  %v9093_v17 = vsel %vm1894_vm8, %v8876_v3, 0  ;;  %v7813_v3 = vld [vmem:[#allocation2 + $0xc] sm:$0xff]   ;;  %v9126_v14 = vld [vmem:[#allocation2 + $0xb8] sm:$0xf] }
 0x1db   : > { %v3506_v31 = vshll.u32 %v3202_v36, 16  ;;  %v3477_v22 = vsel %vm8268_vm11, %v3472_v50, %v3476_v24  ;;  %v3512_v40 = vshll.u32 %v9086_v13, 16  ;;  %v3516_v5 = vshrl.u32 %v9086_v13, 16  ;;  %v9115_v36 = vld [vmem:[%s10993_s4 + $0x20] sm:$0xf] }
 0x1dc   : > { %v3505_v20 = vrot.slane %v3503_v23, 4  ;;  %v6833_v30 = vcombine.low %v3467_v2, %v3477_v22  ;;  %v3486_v4 = vrot.slane %v3485_v41, 4  ;;  %v3495_v7 = vor.u32 %v3494_v27, %v9083_v54  ;;  %v7814_v22 = vld [vmem:[#allocation2 + $0x18] sm:$0xff]  }
 0x1dd   : > { %v3508_v42 = vrot.slane %v3506_v31, 5  ;;  %v3514_v0 = vrot.slane %v3512_v40, 5  ;;  %v3518_v39 = vrot.slane %v3516_v5, 4  ;;  %v3522_v57 = vshll.u32 %v9095_v8, 16 }
 0x1de   : > { %v4526_v25 = vsel %vm1894_vm8, %v8823_v59, 0  ;;  %v3496_v16 = vrot.slane %v3495_v7, 4  ;;  %v3500_v1 = vrot.slane %v3498_v47, 5  ;;  %v3527_v28 = vshrl.u32 %v3205_v9, 16  ;;  %v9122_v59 = vld [vmem:[#allocation2 + $0xb0] sm:$0x1] }
 0x1df   : > { %7521 = vmatmul.mubr.msk.bf16.gmra.mxu0 %vm1845_vm12, %v6832_v34  ;;  %v3509_v29 = vor.u32 %v3508_v42, %v3505_v20  ;;  %v3491_v56 = vsel %vm8268_vm11, %v3486_v4, %v9083_v54  ;;  %v3519_v43 = vor.u32 %v3518_v39, %v3514_v0  ;;  %v3536_v10 = vshll.u32 %v9102_v49, 16  ;;  %v7815_v7 = vld [vmem:[#allocation2 + $0x24] sm:$0xff]   ;;  %v9138_v39 = vld [vmem:[#allocation2 + $0xbc] sm:$0x1] }
 0x1e0   : > { %7431 = vmatmul.mubr.msk.bf16.gmra.mxu1 %vm1845_vm12, %v6723_v51  ;;  %7524 = vmatprep.mubr.msk.bf16.mxu0 %vm1845_vm12, %v6833_v30  ;;  %v3530_v51 = vshll.u32 %v3205_v9, 16  ;;  %v3524_v60 = vrot.slane %v3522_v57, 5  ;;  %v3529_v34 = vrot.slane %v3527_v28, 4  ;;  %v3540_v12 = vshrl.u32 %v9102_v49, 16  ;;  %v3211_v30 = vld [vmem:[#allocation2 + $0xc0] sm:$0xf] }
 0x1e1   : > { %7470 = vmatprep.mubr.msk.bf16.mxu1 %vm1845_vm12, %v7813_v3  ;;  %v3510_v24 = vrot.slane %v3509_v29, 4  ;;  %7571 = vmatpush3.bf16.msra.mxu0 %v4526_v25  ;;  %v3501_v2 = vsel %vm8268_vm11, %v3496_v16, %v3500_v1  ;;  %v3520_v50 = vrot.slane %v3519_v43, 4  ;;  %v3538_v47 = vrot.slane %v3536_v10, 5  ;;  %v9140_v57 = vld [vmem:[#allocation2 + $0xc4] sm:$0xf] }
 0x1e2   : > { %v3532_v54 = vrot.slane %v3530_v51, 5  ;;  %7717 = vmatprep.subr.msk.bf16.mxu0 %vm1894_vm8, %v9115_v36  ;;  %v3542_v41 = vrot.slane %v3540_v12, 4  ;;  %v3546_v27 = vshll.u32 %v9122_v59, 16  ;;  %v3551_v31 = vshrl.u32 %v3208_v33, 16  ;;  %v9146_v28 = vld [vmem:[%s10993_s4 + $0x1c] sm:$0xf] }
 0x1e3   : > { %v3515_v23 = vsel %vm8268_vm11, %v3510_v24, %v3514_v0  ;;  %v3525_v20 = vsel %vm8268_vm11, %v3520_v50, %v3524_v60  ;;  %v3554_v5 = vshll.u32 %v3208_v33, 16  ;;  %v3560_v9 = vshll.u32 %v9126_v14, 16 }
 0x1e4   : > { %v3533_v40 = vor.u32 %v3532_v54, %v3529_v34  ;;  %v6834_v4 = vcombine.low %v3491_v56, %v3501_v2  ;;  %v6835_v42 = vcombine.low %v3515_v23, %v3525_v20  ;;  %v3543_v3 = vor.u32 %v3542_v41, %v3538_v47  ;;  %v9159_v23 = vld [vmem:[#allocation2 + $0xc8] sm:$0x1] }
 0x1e5   : > { %v3553_v0 = vrot.slane %v3551_v31, 4  ;;  %v3548_v25 = vrot.slane %v3546_v27, 5  ;;  %v3556_v16 = vrot.slane %v3554_v5, 5  ;;  %v3562_v1 = vrot.slane %v3560_v9, 5  ;;  %v7816_v5 = vld [vmem:[#allocation2 + $0x30] sm:$0xff]  }
 0x1e6   : > { %v3564_v29 = vshrl.u32 %v9126_v14, 16  ;;  %v3534_v56 = vrot.slane %v3533_v40, 4  ;;  %v3544_v43 = vrot.slane %v3543_v3, 4  ;;  %v3575_v51 = vshrl.u32 %v3211_v30, 16 }
 0x1e7   : > { %7525 = vmatmul.mubr.msk.bf16.gmra.mxu0 %vm1845_vm12, %v6834_v4  ;;  %v3578_v10 = vshll.u32 %v3211_v30, 16  ;;  %v3557_v33 = vor.u32 %v3556_v16, %v3553_v0  ;;  %v3570_v60 = vshll.u32 %v9138_v39, 16  ;;  %v3584_v34 = vshll.u32 %v9140_v57, 16 }
 0x1e8   : > { %7471 = vmatmul.mubr.msk.bf16.vlgmr.msra.gmra.mxu1 %vm1845_vm12, %v7814_v22  ;;  %v3566_v24 = vrot.slane %v3564_v29, 4  ;;  %7528 = vmatprep.mubr.msk.bf16.mxu0 %vm1845_vm12, %v6835_v42  ;;  %v3577_v12 = vrot.slane %v3575_v51, 4  ;;  %v3549_v50 = vsel %vm8268_vm11, %v3544_v43, %v3548_v25  ;;  %v3588_v27 = vshrl.u32 %v9140_v57, 16 }
 0x1e9   : > { %7537 = vmatpush3.bf16.msra.mxu1 %v9093_v17  ;;  %7474 = vmatprep.mubr.msk.bf16.mxu1 %vm1845_vm12, %v7815_v7  ;;  %v3580_v2 = vrot.slane %v3578_v10, 5  ;;  %v3558_v54 = vrot.slane %v3557_v33, 4  ;;  %v3586_v41 = vrot.slane %v3584_v34, 5  ;;  %v3539_v31 = vsel %vm8268_vm11, %v3534_v56, %v3538_v47  ;;  %v7817_v7 = vld [vmem:[#allocation2 + $0x3c] sm:$0xff]   ;;  %v3895_v56 = vld [vmem:[#allocation2 + $0x30] sm:$0xe] }
 0x1ea   : > { %7716 = vmatprep.subr.msk.bf16.mxu1 %vm1894_vm8, %v9146_v28  ;;  %v3567_v17 = vor.u32 %v3566_v24, %v3562_v1  ;;  %v3572_v20 = vrot.slane %v3570_v60, 5  ;;  %v6836_v9 = vcombine.low %v3539_v31, %v3549_v50  ;;  %v3590_v30 = vrot.slane %v3588_v27, 4  ;;  %v3896_v33 = vld [vmem:[#allocation2 + $0x3c] sm:$0xe]  ;;  %v7818_v24 = vld [vmem:[#allocation2 + $0x48] sm:$0xff]  }
 0x1eb   : > { %v3581_v40 = vor.u32 %v3580_v2, %v3577_v12  ;;  %v3594_v4 = vshll.u32 %v9159_v23, 16  ;;  %v3563_v42 = vsel %vm8268_vm11, %v3558_v54, %v3562_v1  ;;  %v3979_v43 = vrot.slane %v8919_v38, 5  ;;  %v3897_v50 = vld [vmem:[#allocation2 + $0x48] sm:$0xe]  ;;  %v7819_v54 = vld [vmem:[#allocation2 + $0x54] sm:$0xff]  }
 0x1ec   : > { %v3568_v22 = vrot.slane %v3567_v17, 4  ;;  %v3591_v0 = vor.u32 %v3590_v30, %v3586_v41  ;;  %v6858_v10 = vrot.slane %v3895_v56, 9  ;;  %v3982_v12 = vrot.slane %v8925_v53, 5  ;;  %v7820_v17 = vld [vmem:[#allocation2 + $0x18] sm:$0xff]   ;;  %v751_v31 = vld [vmem:[#allocation2 + $0xcc] sm:$0x1] }
 0x1ed   : > { %v3582_v25 = vrot.slane %v3581_v40, 4  ;;  %v3596_v29 = vrot.slane %v3594_v4, 5  ;;  %v3981_v34 = vrot.slane %v3979_v43, 4  ;;  %v3986_v2 = vrot.slane %v8931_v26, 5  ;;  %v7821_v56 = vld [vmem:[#allocation2 + $0x60] sm:$0xff]  }
 0x1ee   : > { %v3573_v3 = vsel %vm8268_vm11, %v3568_v22, %v3572_v20  ;;  %v3592_v16 = vrot.slane %v3591_v0, 4  ;;  %v9182_v27 = vsel %vm8322_vm15, %v6858_v10, %v3979_v43  ;;  %v3993_v38 = vrot.slane %v8958_v62, 5  ;;  %v7824_v43 = vld [vmem:[#allocation2 + $0x30] sm:$0xff]  }
 0x1ef   : > { %7529 = vmatmul.mubr.msk.bf16.gmra.mxu0 %vm1845_vm12, %v6836_v9  ;;  %v6837_v47 = vcombine.low %v3563_v42, %v3573_v3  ;;  %v3587_v51 = vsel %vm8268_vm11, %v3582_v25, %v3586_v41  ;;  %v9189_v41 = vsel %vm8322_vm15, %v3981_v34, %v3982_v12  ;;  %v6859_v53 = vrot.slane %v3896_v33, 9  ;;  %v3898_v9 = vld [vmem:[#allocation2 + $0x54] sm:$0xe]  ;;  %v3900_v12 = vld [vmem:[#allocation2 + $0x6c] sm:$0xe] }
 0x1f0   : > { %7475 = vmatmul.mubr.msk.bf16.gmra.mxu1 %vm1845_vm12, %v7816_v5  ;;  %v3597_v1 = vsel %vm8268_vm11, %v3592_v16, %v3596_v29  ;;  %v3988_v26 = vrot.slane %v3986_v2, 4  ;;  %v3989_v22 = vrot.slane %v8944_v52, 5  ;;  %v6860_v20 = vrot.slane %v3897_v50, 9  ;;  %v5449_v62 = vld [vmem:[#allocation2 + $0x30] sm:$0xe] }
 0x1f1   : > { %7478 = vmatprep.mubr.msk.bf16.mxu1 %vm1845_vm12, %v7817_v7  ;;  %7532 = vmatprep.mubr.msk.bf16.mxu0 %vm1845_vm12, %v6837_v47  ;;  %v6838_v60 = vcombine.low %v3587_v51, %v3597_v1  ;;  %v3995_v40 = vrot.slane %v3993_v38, 4  ;;  %v3996_v5 = vrot.slane %v8964_v15, 5  ;;  %v9199_v30 = vsel %vm8322_vm15, %v6859_v53, %v3986_v2  ;;  %v7822_v1 = vld [vmem:[#allocation2 + $0x24] sm:$0xff]  }
 0x1f2   : > { %v9203_v4 = vsel %vm8322_vm15, %v3988_v26, %v3989_v22  ;;  %v752_v52 = vsel %vm8194_vm3, 0, %v751_v31  ;;  %v4000_v7 = vrot.slane %v8970_v58, 5  ;;  %v9212_v15 = vsel %vm8322_vm15, %v6860_v20, %v3993_v38  ;;  %v3899_v58 = vld [vmem:[#allocation2 + $0x60] sm:$0xe]  ;;  %v3901_v20 = vld [vmem:[#allocation2 + $0x78] sm:$0xe] }
 0x1f3   : > { %v9216_v3 = vsel %vm8322_vm15, %v3995_v40, %v3996_v5  ;;  %753 = vst [vmem:[#allocation2 + $0xcc] sm:$0x1] %v752_v52  ;;  %v6861_v0 = vrot.slane %v3898_v9, 9  ;;  %v4003_v16 = vrot.slane %v8987_v63, 5  ;;  %v4007_v29 = vrot.slane %v8993_v45, 5  ;;  %v7825_v9 = vld [vmem:[#allocation2 + $0x78] sm:$0xff]  }
 0x1f4   : > { %v4002_v25 = vrot.slane %v4000_v7, 4  ;;  %v5722_v51 = vsel %vm1894_vm8, %v9115_v36, 0  ;;  %v4010_v34 = vrot.slane %v9000_v11, 5  ;;  %v4014_v36 = vrot.slane %v9011_v35, 5  ;;  %v7828_v52 = vld [vmem:[#allocation2 + $0x48] sm:$0xff]  }
 0x1f5   : > { %v9226_v10 = vsel %vm8322_vm15, %v6861_v0, %v4000_v7  ;;  %v4009_v45 = vrot.slane %v4007_v29, 4  ;;  %v6863_v35 = vrot.slane %v3900_v12, 9  ;;  %v4017_v31 = vrot.slane %v9021_v46, 5  ;;  %v7826_v46 = vld [vmem:[#allocation2 + $0x3c] sm:$0xff]   ;;  %v7827_v7 = vld [vmem:[#allocation2 + $0x84] sm:$0xff]   ;;  %v7830_v12 = vld [vmem:[#allocation2 + $0x54] sm:$0xff]  }
 0x1f6   : > { %v9230_v33 = vsel %vm8322_vm15, %v4002_v25, %v4003_v16  ;;  %v9248_v11 = vpop.f32.mrf.mxu0  ;;  %v4016_v38 = vrot.slane %v4014_v36, 4  ;;  %v4021_v5 = vrot.slane %v9030_v32, 5  ;;  %v6864_v0 = vrot.slane %v3901_v20, 9  ;;  %v7831_v20 = vld [vmem:[#allocation2 + $0x9c] sm:$0xff]   ;;  %v9409_v63 = vld [vmem:[#allocation2 + $0x2c] sm:$0x1] }
 0x1f7   : > { %7533 = vmatmul.mubr.msk.bf16.gmra.mxu0 %vm1845_vm12, %v6838_v60  ;;  %v6862_v60 = vrot.slane %v3899_v58, 9  ;;  %v9246_v50 = vsel %vm8322_vm15, %v4009_v45, %v4010_v34  ;;  %11046 = vst [vmem:[#allocation14_spill] sm:$0xff] %v9248_v11  ;;  %v9257_v26 = vsel %vm8322_vm15, %v6863_v35, %v4014_v36  ;;  %v4024_v16 = vrot.slane %v9036_v37, 5  ;;  %v3902_v58 = vld [vmem:[#allocation2 + $0x84] sm:$0xe] }
 0x1f8   : > { %7479 = vmatmul.mubr.msk.bf16.gmra.mxu1 %vm1845_vm12, %v7818_v24  ;;  %7572 = vmatprep.mubr.msk.bf16.mxu0 %vm1845_vm12, %v7820_v17  ;;  %v7823_v24 = vld [vmem:[#allocation2 + $0x6c] sm:$0xff]   ;;  %v9261_v22 = vsel %vm8322_vm15, %v4016_v38, %v4017_v31  ;;  %v9266_v44 = vpop.f32.mrf.mxu0  ;;  %v4023_v25 = vrot.slane %v4021_v5, 4  ;;  %v9276_v32 = vsel %vm8322_vm15, %v6864_v0, %v4021_v5  ;;  %v4035_v34 = vrot.slane %v9063_v19, 5  ;;  %v7832_v5 = vld [vmem:[#allocation2 + $0x60] sm:$0xff]   ;;  %v5447_v17 = vld [vmem:[#allocation2 + $0x18] sm:$0xe] }
 0x1f9   : > { %7482 = vmatprep.mubr.msk.bf16.mxu1 %vm1845_vm12, %v7819_v54  ;;  %v9242_v2 = vsel %vm8322_vm15, %v6862_v60, %v4007_v29  ;;  %11047 = vst [vmem:[#allocation15_spill] sm:$0xff] %v9266_v44  ;;  %v4028_v29 = vrot.slane %v9052_v55, 5  ;;  %v4031_v55 = vrot.slane %v9055_v6, 5  ;;  %v4038_v31 = vrot.slane %v9075_v48, 5  ;;  %v7837_v48 = vld [vmem:[#allocation2 + $0xc0] sm:$0xff]  }
 0x1fa   : > { %v821_v54 = vld [vmem:[#allocation2 + $0xcc] sm:$0xf]  ;;  %v9282_v37 = vpop.f32.mrf.mxu0  ;;  %v4037_v6 = vrot.slane %v4035_v34, 4  ;;  %v9426_v47 = vld [vmem:[#allocation2 + $0x64] sm:$0xf]  ;;  %v6970_v42 = vrot.slane %v5447_v17, 9 }
 0x1fb   : > { %v822_v53 = vsel %vm8229_vm7, 0, %v821_v54  ;;  %11048 = vst [vmem:[#allocation16_spill] sm:$0xff] %v9282_v37  ;;  %v7829_v54 = vld [vmem:[#allocation2 + $0x90] sm:$0xff]  }
 0x1fc   : > { %823 = vst [vmem:[#allocation2 + $0xcc] sm:$0xf] %v822_v53  ;;  %v9298_v35 = vpop.f32.mrf.mxu0  ;;  %v3904_v53 = vld [vmem:[#allocation2 + $0x9c] sm:$0xe]  ;;  %v9453_v44 = vld [vmem:[#allocation2 + $0x70] sm:$0xf] }
 0x1fd   : > { %11049 = vst [vmem:[#allocation17_spill] sm:$0xff] %v9298_v35  ;;  %v5451_v35 = vld [vmem:[#allocation2 + $0x48] sm:$0xe]  ;;  %11066 = vst [vmem:[#allocation34_spill] sm:$0xff] %v9453_v44 }
 0x1ff   : > { %7573 = vmatmul.mubr.msk.bf16.vlgmr.msra.gmra.mxu0 %vm1845_vm12, %v7822_v1  ;;  %v9399_v1 = vld [vmem:[#allocation2 + $0x34] sm:$0xf] }
 0x200   : > { %7483 = vmatmul.mubr.msk.bf16.gmra.mxu1 %vm1845_vm12, %v7821_v56  ;;  %7576 = vmatprep.mubr.msk.bf16.mxu0 %vm1845_vm12, %v7824_v43  ;;  %v9280_v56 = vsel %vm8322_vm15, %v4023_v25, %v4024_v16  ;;  %v6865_v43 = vrot.slane %v3902_v58, 9  ;;  %v3905_v25 = vld [vmem:[#allocation2 + $0xa8] sm:$0xe]  ;;  %v7875_v16 = vld [vmem:[#allocation2 + $0x10] sm:$0xf] }
 0x201   : > { %7486 = vmatprep.mubr.msk.bf16.mxu1 %vm1845_vm12, %v7823_v24  ;;  %7639 = vmatpush3.bf16.msra.mxu0 %v5722_v51  ;;  %v4030_v51 = vrot.slane %v4028_v29, 4  ;;  %v3903_v24 = vld [vmem:[#allocation2 + $0x90] sm:$0xe]  ;;  %v3958_v58 = vrot.slane %v7875_v16, 5  ;;  %v7876_v16 = vld [vmem:[#allocation2 + $0x14] sm:$0x1] }
 0x202   : > { %v9289_v60 = vsel %vm8322_vm15, %v6865_v43, %v4028_v29  ;;  %v6866_v38 = vrot.slane %v3903_v24, 9  ;;  %v6868_v24 = vrot.slane %v3905_v25, 9  ;;  %v3907_v25 = vld [vmem:[#allocation2 + $0xc0] sm:$0xe] }
 0x203   : > { %v9293_v45 = vsel %vm8322_vm15, %v4030_v51, %v4031_v55  ;;  %v4049_v51 = vrot.slane %v9102_v49, 5 }
 0x204   : > { %v9306_v19 = vsel %vm8322_vm15, %v6866_v38, %v4035_v34  ;;  %v4052_v34 = vrot.slane %v9122_v59, 5  ;;  %v7834_v38 = vld [vmem:[#allocation2 + $0x6c] sm:$0xff]  }
 0x205   : > { %v9336_v49 = vsel %vm8322_vm15, %v6868_v24, %v4049_v51  ;;  %v3892_v59 = vld [vmem:[#allocation2 + $0xc] sm:$0xe] }
 0x206   : > { %11052 = vst [vmem:[#allocation20_spill] sm:$0xff] %v9336_v49  ;;  %v5456_v49 = vld [vmem:[#allocation2 + $0x84] sm:$0xe] }
 0x207   : > { %7577 = vmatmul.mubr.msk.bf16.gmra.mxu0 %vm1845_vm12, %v7826_v46  ;;  %v9310_v46 = vsel %vm8322_vm15, %v4037_v6, %v4038_v31  ;;  %v4056_v31 = vrot.slane %v9126_v14, 5 }
 0x208   : > { %7487 = vmatmul.mubr.msk.bf16.gmra.mxu1 %vm1845_vm12, %v7825_v9  ;;  %7580 = vmatprep.mubr.msk.bf16.mxu0 %vm1845_vm12, %v7828_v52  ;;  %v4042_v9 = vrot.slane %v9086_v13, 5  ;;  %v6867_v13 = vrot.slane %v3904_v53, 9  ;;  %v7835_v53 = vld [vmem:[#allocation2 + $0xb4] sm:$0xff]  }
 0x209   : > { %7490 = vmatprep.mubr.msk.bf16.mxu1 %vm1845_vm12, %v7827_v7  ;;  %v4045_v7 = vrot.slane %v9095_v8, 5  ;;  %v4051_v8 = vrot.slane %v4049_v51, 4  ;;  %v3961_v51 = vrot.slane %v7876_v16, 5 }
 0x20a   : > { %v4044_v52 = vrot.slane %v4042_v9, 4  ;;  %v9317_v0 = vpop.f32.mrf.mxu0  ;;  %v9321_v29 = vsel %vm8322_vm15, %v6867_v13, %v4042_v9  ;;  %v7878_v13 = vld [vmem:[#allocation2 + $0x28] sm:$0xf] }
 0x20b   : > { %11050 = vst [vmem:[#allocation18_spill] sm:$0xff] %v9317_v0  ;;  %v9340_v9 = vsel %vm8322_vm15, %v4051_v8, %v4052_v34  ;;  %v9442_v0 = vld [vmem:[#allocation2 + $0x50] sm:$0x1] }
 0x20c   : > { %v9325_v43 = vsel %vm8322_vm15, %v4044_v52, %v4045_v7  ;;  %v9331_v6 = vpop.f32.mrf.mxu0  ;;  %11053 = vst [vmem:[#allocation21_spill] sm:$0xff] %v9340_v9  ;;  %v4058_v52 = vrot.slane %v4056_v31, 4  ;;  %v4059_v7 = vrot.slane %v9138_v39, 5  ;;  %v4066_v39 = vrot.slane %v9159_v23, 5  ;;  %11064 = vst [vmem:[#allocation32_spill] sm:$0xff] %v9442_v0 }
 0x20d   : > { %11051 = vst [vmem:[#allocation19_spill] sm:$0xff] %v9331_v6  ;;  %v9540_v9 = vld [vmem:[#allocation2 + $0x80] sm:$0x1] }
 0x20e   : > { %v9349_v24 = vpop.f32.mrf.mxu0  ;;  %v9357_v34 = vsel %vm8322_vm15, %v4058_v52, %v4059_v7  ;;  %v7838_v52 = vld [vmem:[#allocation2 + $0x84] sm:$0xff]   ;;  %11079 = vst [vmem:[#allocation44_spill] sm:$0xff] %v9540_v9 }
 0x20f   : > { %7581 = vmatmul.mubr.msk.bf16.gmra.mxu0 %vm1845_vm12, %v7830_v12  ;;  %v3906_v12 = vld [vmem:[#allocation2 + $0xb4] sm:$0xe]  ;;  %11054 = vst [vmem:[#allocation22_spill] sm:$0xff] %v9349_v24  ;;  %11056 = vst [vmem:[#allocation24_spill] sm:$0xff] %v9357_v34 }
 0x210   : > { %7491 = vmatmul.mubr.msk.bf16.gmra.mxu1 %vm1845_vm12, %v7829_v54  ;;  %7584 = vmatprep.mubr.msk.bf16.mxu0 %vm1845_vm12, %v7832_v5  ;;  %v7833_v54 = vld [vmem:[#allocation2 + $0xa8] sm:$0xff]   ;;  %v3960_v5 = vrot.slane %v3958_v58, 4  ;;  %v6869_v14 = vrot.slane %v3906_v12, 9  ;;  %v4063_v12 = vrot.slane %v9140_v57, 5  ;;  %v9367_v7 = vpop.f32.mrf.mxu0 }
 0x211   : > { %7494 = vmatprep.mubr.msk.bf16.mxu1 %vm1845_vm12, %v7831_v20  ;;  %v7836_v20 = vld [vmem:[#allocation2 + $0x78] sm:$0xff]   ;;  %11057 = vst [vmem:[#allocation25_spill] sm:$0xff] %v9367_v7 }
 0x212   : > { %v9353_v8 = vsel %vm8322_vm15, %v6869_v14, %v4056_v31  ;;  %v3962_v16 = vsel %vm8322_vm15, %v3960_v5, %v3961_v51  ;;  %v3972_v31 = vrot.slane %v7878_v13, 5  ;;  %v6870_v14 = vrot.slane %v3907_v25, 9  ;;  %v7839_v51 = vld [vmem:[#allocation2 + $0x90] sm:$0xff]   ;;  %v9387_v25 = vld [vmem:[#allocation2 + $0x28] sm:$0xf] }
 0x213   : > { %11055 = vst [vmem:[#allocation23_spill] sm:$0xff] %v9353_v8  ;;  %v4065_v55 = vrot.slane %v4063_v12, 4  ;;  %v5450_v7 = vld [vmem:[#allocation2 + $0x3c] sm:$0xe]  ;;  %v5453_v8 = vld [vmem:[#allocation2 + $0x60] sm:$0xe] }
 0x214   : > { %v9371_v23 = vsel %vm8322_vm15, %v6870_v14, %v4063_v12  ;;  %v7879_v12 = vld [vmem:[#allocation2 + $0x20] sm:$0x1] }
 0x215   : > { %11058 = vst [vmem:[#allocation26_spill] sm:$0xff] %v9371_v23  ;;  %v11068_v23 = vcombine.low %v9182_v27, %v9189_v41  ;;  %v11071_v27 = vcombine.low %v9199_v30, %v9203_v4 }
 0x217   : > { %7585 = vmatmul.mubr.msk.bf16.gmra.mxu0 %vm1845_vm12, %v7834_v38  ;;  %v7877_v38 = vld [vmem:[#allocation2 + $0x1c] sm:$0xf] }
 0x218   : > { %7495 = vmatmul.mubr.msk.bf16.gmra.mxu1 %vm1845_vm12, %v7833_v54  ;;  %7588 = vmatprep.mubr.msk.bf16.mxu0 %vm1845_vm12, %v7836_v20  ;;  %v6855_v54 = vrot.slane %v3892_v59, 9  ;;  %v9375_v59 = vsel %vm8322_vm15, %v4065_v55, %v4066_v39  ;;  %v3894_v55 = vld [vmem:[#allocation2 + $0x24] sm:$0xe]  ;;  %v9383_v39 = vld [vmem:[#allocation2 + $0x1c] sm:$0xf] }
 0x219   : > { %7498 = vmatprep.mubr.msk.bf16.mxu1 %vm1845_vm12, %v7835_v53  ;;  %v3965_v53 = vrot.slane %v7877_v38, 5  ;;  %11059 = vst [vmem:[#allocation27_spill] sm:$0xff] %v9375_v59  ;;  %v3968_v38 = vrot.slane %v7879_v12, 5  ;;  %v6857_v20 = vrot.slane %v3894_v55, 9  ;;  %v6972_v59 = vrot.slane %v5449_v62, 9 }
 0x21a   : > { %v3959_v57 = vsel %vm8322_vm15, %v6855_v54, %v3958_v58  ;;  %v3893_v58 = vld [vmem:[#allocation2 + $0x18] sm:$0xe]  ;;  %v3974_v54 = vrot.slane %v3972_v31, 4  ;;  %v6973_v62 = vrot.slane %v5450_v7, 9  ;;  %v11073_v7 = vrot.slane %v9426_v47, 5 }
 0x21b   : > { %v6872_v5 = vcombine.low %v3959_v57, %v3962_v16  ;;  %v3967_v13 = vrot.slane %v3965_v53, 4  ;;  %v7880_v16 = vld [vmem:[#allocation2 + $0x2c] sm:$0x1] }
 0x21c   : > { %v3975_v14 = vrot.slane %v7880_v16, 5  ;;  %v5520_v16 = vrot.slane %v9387_v25, 5 }
 0x21f   : > { %7589 = vmatmul.mubr.msk.bf16.gmra.mxu0 %vm1845_vm12, %v7838_v52  ;;  %v3969_v52 = vsel %vm8322_vm15, %v3967_v13, %v3968_v38  ;;  %v5252_v13 = vsel %vm1894_vm8, %v9146_v28, 0  ;;  %v3973_v38 = vsel %vm8322_vm15, %v6857_v20, %v3972_v31  ;;  %v5448_v28 = vld [vmem:[#allocation2 + $0x24] sm:$0xe]  ;;  %v5522_v20 = vrot.slane %v5520_v16, 4  ;;  %v9417_v31 = vld [vmem:[#allocation2 + $0x38] sm:$0x1] }
 0x220   : > { %7499 = vmatmul.mubr.msk.bf16.gmra.mxu1 %vm1845_vm12, %v7837_v48  ;;  %7592 = vmatprep.mubr.msk.bf16.mxu0 %vm1845_vm12, %v7839_v51  ;;  %v9385_v57 = vpop.f32.mrf.mxu0  ;;  %v6856_v48 = vrot.slane %v3893_v58, 9  ;;  %v5513_v51 = vrot.slane %v9383_v39, 5  ;;  %v7840_v58 = vld [vmem:[#allocation2 + $0x9c] sm:$0xff]  }
 0x221   : > { %7538 = vmatprep.mubr.msk.bf16.mxu1 %vm1845_vm12, %v6872_v5  ;;  %11060 = vst [vmem:[#allocation28_spill] sm:$0xff] %v9385_v57  ;;  %v3976_v5 = vsel %vm8322_vm15, %v3974_v54, %v3975_v14  ;;  %v9405_v54 = vld [vmem:[#allocation2 + $0x40] sm:$0xf]  ;;  %v6971_v57 = vrot.slane %v5448_v28, 9 }
 0x222   : > { %v9394_v12 = vpop.f32.mrf.mxu0  ;;  %v3966_v36 = vsel %vm8322_vm15, %v6856_v48, %v3965_v53  ;;  %v6874_v55 = vcombine.low %v3973_v38, %v3976_v5  ;;  %v9407_v14 = vld [vmem:[#allocation2 + $0x20] sm:$0x1]  ;;  %v5515_v53 = vrot.slane %v5513_v51, 4  ;;  %v5534_v5 = vrot.slane %v9405_v54, 5  ;;  %v9420_v38 = vld [vmem:[#allocation2 + $0x4c] sm:$0xf] }
 0x223   : > { %11061 = vst [vmem:[#allocation29_spill] sm:$0xff] %v9394_v12  ;;  %v6873_v40 = vcombine.low %v3966_v36, %v3969_v52  ;;  %v7841_v36 = vld [vmem:[#allocation2 + $0xa8] sm:$0xff]   ;;  %v5527_v52 = vrot.slane %v9399_v1, 5  ;;  %v5541_v24 = vrot.slane %v9420_v38, 5  ;;  %v9448_v28 = vsel %vm8322_vm15, %v6970_v42, %v5513_v51  ;;  %v5452_v51 = vld [vmem:[#allocation2 + $0x54] sm:$0xe] }
 0x224   : > { %v9413_v48 = vpop.f32.mrf.mxu0  ;;  %v5536_v17 = vrot.slane %v5534_v5, 4 }
 0x225   : > { %11062 = vst [vmem:[#allocation30_spill] sm:$0xff] %v9413_v48  ;;  %v9495_v30 = vsel %vm8322_vm15, %v6972_v59, %v5527_v52 }
 0x226   : > { %v9435_v12 = vpop.f32.mrf.mxu0 }
 0x227   : > { %7593 = vmatmul.mubr.msk.bf16.gmra.mxu0 %vm1845_vm12, %v7840_v58  ;;  %v9424_v58 = vld [vmem:[#allocation2 + $0x58] sm:$0xf]  ;;  %11063 = vst [vmem:[#allocation31_spill] sm:$0xff] %v9435_v12  ;;  %v5530_v12 = vrot.slane %v9417_v31, 5 }
 0x228   : > { %7539 = vmatmul.mubr.msk.bf16.vlgmr.msra.gmra.mxu1 %vm1845_vm12, %v6873_v40  ;;  %7596 = vmatprep.mubr.msk.bf16.mxu0 %vm1845_vm12, %v7841_v36  ;;  %v5516_v40 = vrot.slane %v9407_v14, 5  ;;  %v5529_v36 = vrot.slane %v5527_v52, 4  ;;  %v5548_v37 = vrot.slane %v9424_v58, 5  ;;  %v9510_v52 = vld [vmem:[#allocation2 + $0x74] sm:$0x1] }
 0x229   : > { %7605 = vmatpush3.bf16.msra.mxu1 %v5252_v13  ;;  %7542 = vmatprep.mubr.msk.bf16.mxu1 %vm1845_vm12, %v6874_v55  ;;  %v5523_v13 = vrot.slane %v9409_v63, 5  ;;  %v9429_v55 = vld [vmem:[#allocation2 + $0x44] sm:$0x1]  ;;  %11075 = vst [vmem:[#allocation40_spill] sm:$0xff] %v9510_v52 }
 0x22a   : > { %v9433_v48 = vsel %vm8322_vm15, %v5515_v53, %v5516_v40  ;;  %v7842_v40 = vld [vmem:[#allocation2 + $0xb4] sm:$0xff]   ;;  %v9461_v53 = vsel %vm8322_vm15, %v6971_v57, %v5520_v16  ;;  %v5537_v42 = vrot.slane %v9429_v55, 5  ;;  %v9475_v57 = vsel %vm8322_vm15, %v5529_v36, %v5530_v12 }
 0x22b   : > { %v9440_v6 = vsel %vm8322_vm15, %v5522_v20, %v5523_v13  ;;  %v7843_v20 = vld [vmem:[#allocation2 + $0xc0] sm:$0xff]   ;;  %v5543_v16 = vrot.slane %v5541_v24, 4  ;;  %v5550_v12 = vrot.slane %v5548_v37, 4  ;;  %v5557_v36 = vrot.slane %v11073_v7, 4 }
 0x22c   : > { %v5562_v13 = vrot.slane %v9453_v44, 5  ;;  %v5551_v7 = vrot.slane %v9451_v18, 5 }
 0x22e   : > { %v9457_v11 = vpop.f32.mrf.mxu1  ;;  %v9469_v34 = vpop.f32.mrf.mxu0 }
 0x22f   : > { %11067 = vst [vmem:[#allocation35_spill] sm:$0xff] %v9457_v11  ;;  %7597 = vmatmul.mubr.msk.bf16.gmra.mxu0 %vm1845_vm12, %v7842_v40  ;;  %11069 = vst [vmem:[#allocation36_spill] sm:$0xff] %v9469_v34  ;;  %v9477_v11 = vld [vmem:[#allocation2 + $0x68] sm:$0x1]  ;;  %v5454_v40 = vld [vmem:[#allocation2 + $0x6c] sm:$0xe] }
 0x230   : > { %7543 = vmatmul.mubr.msk.bf16.gmra.mxu1 %vm1845_vm12, %v11068_v23  ;;  %11070 = vst [vmem:[#allocation37_spill] sm:$0xff] %v9477_v11  ;;  %7600 = vmatprep.mubr.msk.bf16.mxu0 %vm1845_vm12, %v7843_v20  ;;  %v9484_v41 = vpop.f32.mrf.mxu1  ;;  %v9488_v23 = vsel %vm8322_vm15, %v5536_v17, %v5537_v42  ;;  %v9497_v4 = vpop.f32.mrf.mxu0  ;;  %v6974_v20 = vrot.slane %v5451_v35, 9  ;;  %v9500_v34 = vld [vmem:[#allocation2 + $0x7c] sm:$0xf]  ;;  %v9506_v42 = vsel %vm8322_vm15, %v6973_v62, %v5534_v5  ;;  %v5558_v59 = vrot.slane %v9477_v11, 5  ;;  %v7844_v35 = vld [vmem:[#allocation2 + $0xcc] sm:$0xff]  }
 0x231   : > { %7546 = vmatprep.mubr.msk.bf16.mxu1 %vm1845_vm12, %v11071_v27  ;;  %11072 = vst [vmem:[#allocation38_spill] sm:$0xff] %v9484_v41  ;;  %11074 = vst [vmem:[#allocation39_spill] sm:$0xff] %v9497_v4  ;;  %v5544_v27 = vrot.slane %v9442_v0, 5  ;;  %v6975_v41 = vrot.slane %v5452_v51, 9  ;;  %v9512_v4 = vld [vmem:[#allocation2 + $0x88] sm:$0xf] }
 0x232   : > { %11076 = vst [vmem:[#allocation41_spill] sm:$0xff] %v9512_v4  ;;  %v9514_v44 = vpop.f32.mrf.mxu0  ;;  %v9520_v17 = vsel %vm8322_vm15, %v6974_v20, %v5541_v24  ;;  %v4721_v11 = vld [vmem:[#allocation2 + $0x18] sm:$0xf]  ;;  %v9530_v18 = vpop.f32.mrf.mxu1  ;;  %v6976_v51 = vrot.slane %v5453_v8, 9  ;;  %v9538_v24 = vsel %vm8322_vm15, %v5557_v36, %v5558_v59  ;;  %v5564_v20 = vrot.slane %v5562_v13, 4 }
 0x233   : > { %11077 = vst [vmem:[#allocation42_spill] sm:$0xff] %v9514_v44  ;;  %v9524_v5 = vsel %vm8322_vm15, %v5543_v16, %v5544_v27  ;;  %v9528_v62 = vsel %vm8322_vm15, %v6975_v41, %v5548_v37  ;;  %11078 = vst [vmem:[#allocation43_spill] sm:$0xff] %v9530_v18  ;;  %v9534_v44 = vsel %vm8322_vm15, %v5550_v12, %v5551_v7  ;;  %v6977_v16 = vrot.slane %v5454_v40, 9  ;;  %v5455_v37 = vld [vmem:[#allocation2 + $0x78] sm:$0xe] }
 0x234   : > { %v5565_v27 = vrot.slane %v9510_v52, 5  ;;  %v5569_v41 = vrot.slane %v9500_v34, 5  ;;  %v5576_v18 = vrot.slane %v9512_v4, 5  ;;  %v4770_v0 = vshrl.u32 %v4721_v11, 16  ;;  %v9552_v40 = vpop.f32.mrf.mxu0 }
 0x235   : > { %v4773_v12 = vshll.u32 %v4721_v11, 16  ;;  %v4779_v8 = vshll.u32 %v9383_v39, 16  ;;  %v4783_v7 = vshrl.u32 %v9383_v39, 16  ;;  %v11080_v36 = vcombine.low %v9212_v15, %v9216_v3  ;;  %11081 = vst [vmem:[#allocation45_spill] sm:$0xff] %v9552_v40 }
 0x236   : > { %v11082_v11 = vrot.slane %v9426_v47, 5  ;;  %v11083_v15 = vcombine.low %v9226_v10, %v9230_v33  ;;  %v11084_v3 = vcombine.low %v9448_v28, %v9433_v48  ;;  %v9578_v4 = vsel %vm8322_vm15, %v6977_v16, %v5562_v13  ;;  %v4724_v33 = vld [vmem:[#allocation2 + $0x24] sm:$0xf]  ;;  %v9585_v28 = vld [vmem:[#allocation2 + $0x8c] sm:$0x1] }
 0x237   : > { %7601 = vmatmul.mubr.msk.bf16.gmra.mxu0 %vm1845_vm12, %v7844_v35  ;;  %v9572_v35 = vpop.f32.mrf.mxu1  ;;  %v6978_v10 = vrot.slane %v5455_v37, 9  ;;  %v5572_v48 = vrot.slane %v9540_v9, 5  ;;  %11086 = vst [vmem:[#allocation47_spill] sm:$0xff] %v9585_v28  ;;  %v4772_v59 = vrot.slane %v4770_v0, 4  ;;  %v4785_v40 = vrot.slane %v4783_v7, 4 }
 0x238   : > { %7547 = vmatmul.mubr.msk.bf16.gmra.mxu1 %vm1845_vm12, %v11080_v36  ;;  %v9562_v39 = vsel %vm8322_vm15, %v6976_v51, %v11082_v11  ;;  %7640 = vmatprep.mubr.msk.bf16.mxu0 %vm1845_vm12, %v11084_v3  ;;  %11085 = vst [vmem:[#allocation46_spill] sm:$0xff] %v9572_v35  ;;  %v9582_v51 = vsel %vm8322_vm15, %v5564_v20, %v5565_v27  ;;  %v5571_v11 = vrot.slane %v5569_v41, 4  ;;  %v5578_v3 = vrot.slane %v5576_v18, 4  ;;  %v9591_v16 = vld [vmem:[#allocation2 + $0x94] sm:$0xf] }
 0x239   : > { %7550 = vmatprep.mubr.msk.bf16.mxu1 %vm1845_vm12, %v11083_v15  ;;  %v6979_v15 = vrot.slane %v5456_v49, 9  ;;  %v4775_v35 = vrot.slane %v4773_v12, 5  ;;  %v9587_v36 = vrot.slane %v4779_v8, 5  ;;  %v4794_v20 = vshrl.u32 %v4724_v33, 16 }
 0x23a   : > { %v9589_v13 = vpop.f32.mrf.mxu0  ;;  %v4797_v27 = vshll.u32 %v4724_v33, 16  ;;  %v4803_v37 = vshll.u32 %v9387_v25, 16  ;;  %v4807_v52 = vshrl.u32 %v9387_v25, 16  ;;  %v5579_v0 = vrot.slane %v9585_v28, 5 }
 0x23b   : > { %11087 = vst [vmem:[#allocation48_spill] sm:$0xff] %v9589_v13  ;;  %v4827_v12 = vshll.u32 %v9399_v1, 16  ;;  %v4831_v8 = vshrl.u32 %v9399_v1, 16  ;;  %v9606_v33 = vsel %vm8322_vm15, %v6978_v10, %v5569_v41  ;;  %v9610_v25 = vsel %vm8322_vm15, %v5571_v11, %v5572_v48  ;;  %v4727_v13 = vld [vmem:[#allocation2 + $0x30] sm:$0xf] }
 0x23c   : > { %v9595_v9 = vpop.f32.mrf.mxu1  ;;  %v9602_v7 = vpop.f32.mrf.mxu0  ;;  %v4789_v49 = vshll.u32 %v9407_v14, 16  ;;  %v9621_v1 = vsel %vm8322_vm15, %v5578_v3, %v5579_v0  ;;  %v4786_v41 = vor.u32 %v4785_v40, %v9587_v36  ;;  %v5457_v10 = vld [vmem:[#allocation2 + $0x90] sm:$0xe]  ;;  %v5583_v11 = vrot.slane %v9591_v16, 5 }
 0x23d   : > { %11088 = vst [vmem:[#allocation49_spill] sm:$0xff] %v9595_v9  ;;  %11089 = vst [vmem:[#allocation50_spill] sm:$0xff] %v9602_v7  ;;  %v9614_v9 = vsel %vm8322_vm15, %v6979_v15, %v5576_v18  ;;  %v4776_v7 = vor.u32 %v4775_v35, %v4772_v59  ;;  %v11091_v48 = vcombine.low %v9242_v2, %v9246_v50  ;;  %v9635_v15 = vld [vmem:[#allocation2 + $0x98] sm:$0x1]  ;;  %v4796_v59 = vrot.slane %v4794_v20, 4 }
 0x23e   : > { %v9617_v28 = vpop.f32.mrf.mxu1  ;;  %v11092_v18 = vcombine.low %v9461_v53, %v9440_v6  ;;  %v9633_v14 = vpop.f32.mrf.mxu0  ;;  %11094 = vst [vmem:[#allocation53_spill] sm:$0xff] %v9635_v15  ;;  %v4799_v35 = vrot.slane %v4797_v27, 5  ;;  %v9637_v40 = vrot.slane %v4803_v37, 5  ;;  %v4809_v3 = vrot.slane %v4807_v52, 4  ;;  %v9655_v37 = vld [vmem:[#allocation2 + $0xa0] sm:$0xf] }
 0x23f   : > { %11090 = vst [vmem:[#allocation51_spill] sm:$0xff] %v9617_v28  ;;  %11093 = vst [vmem:[#allocation52_spill] sm:$0xff] %v9633_v14  ;;  %v11095_v0 = vcombine.low %v9257_v26, %v9261_v22  ;;  %v11096_v2 = vcombine.low %v9495_v30, %v9475_v57  ;;  %v4818_v6 = vshrl.u32 %v4727_v13, 16  ;;  %v4821_v53 = vshll.u32 %v4727_v13, 16  ;;  %v9670_v14 = vld [vmem:[#allocation2 + $0xac] sm:$0xf] }
 0x240   : > { %7551 = vmatmul.mubr.msk.bf16.gmra.mxu1 %vm1845_vm12, %v11091_v48  ;;  %7641 = vmatmul.mubr.msk.bf16.vlgmr.msra.gmra.mxu0 %vm1845_vm12, %v11092_v18  ;;  %v9647_v50 = vpop.f32.mrf.mxu1  ;;  %v9649_v48 = vrot.slane %v4827_v12, 5  ;;  %v4833_v20 = vrot.slane %v4831_v8, 4  ;;  %v4791_v22 = vrot.slane %v4789_v49, 5  ;;  %v6980_v27 = vrot.slane %v5457_v10, 9  ;;  %v9658_v13 = vpop.f32.mrf.mxu0  ;;  %v5458_v10 = vld [vmem:[#allocation2 + $0x9c] sm:$0xe] }
 0x241   : > { %7554 = vmatprep.mubr.msk.bf16.mxu1 %vm1845_vm12, %v11095_v0  ;;  %7644 = vmatprep.mubr.msk.bf16.mxu0 %vm1845_vm12, %v11096_v2  ;;  %11097 = vst [vmem:[#allocation54_spill] sm:$0xff] %v9647_v50  ;;  %v4777_v57 = vrot.slane %v4776_v7, 4  ;;  %v4787_v30 = vrot.slane %v4786_v41, 4  ;;  %v5585_v18 = vrot.slane %v5583_v11, 4  ;;  %v5586_v0 = vrot.slane %v9635_v15, 5  ;;  %11098 = vst [vmem:[#allocation55_spill] sm:$0xff] %v9658_v13 }
 0x242   : > { %v4730_v2 = vld [vmem:[#allocation2 + $0x3c] sm:$0xf]  ;;  %v9662_v12 = vsel %vm8322_vm15, %v6980_v27, %v5583_v11  ;;  %v4800_v8 = vor.u32 %v4799_v35, %v4796_v59  ;;  %v4810_v52 = vor.u32 %v4809_v3, %v9637_v40  ;;  %v4813_v49 = vshll.u32 %v9409_v63, 16  ;;  %v9666_v26 = vpop.f32.mrf.mxu1 }
 0x243   : > { %11099 = vst [vmem:[#allocation56_spill] sm:$0xff] %v9666_v26  ;;  %v5590_v7 = vrot.slane %v9655_v37, 5  ;;  %v4820_v41 = vrot.slane %v4818_v6, 4  ;;  %v4823_v50 = vrot.slane %v4821_v53, 5  ;;  %v4834_v28 = vor.u32 %v4833_v20, %v9649_v48  ;;  %v9745_v26 = vld [vmem:[#allocation2 + $0xbc] sm:$0x1] }
 0x244   : > { %v4842_v13 = vshrl.u32 %v4730_v2, 16  ;;  %v4845_v15 = vshll.u32 %v4730_v2, 16  ;;  %v4851_v11 = vshll.u32 %v9405_v54, 16  ;;  %v4855_v59 = vshrl.u32 %v9405_v54, 16  ;;  %v9707_v2 = vld [vmem:[#allocation2 + $0xb8] sm:$0xf] }
 0x245   : > { %v4782_v63 = vsel %vm8268_vm11, %v4777_v57, %v9587_v36  ;;  %v4792_v35 = vsel %vm8268_vm11, %v4787_v30, %v4791_v22  ;;  %v9681_v3 = vsel %vm8322_vm15, %v5585_v18, %v5586_v0  ;;  %v6981_v6 = vrot.slane %v5458_v10, 9  ;;  %v9693_v57 = vld [vmem:[#allocation2 + $0xa4] sm:$0x1]  ;;  %11107 = vst [vmem:[#allocation60_spill] sm:$0xff] %v9745_v26 }
 0x246   : > { %v11100_v53 = vcombine.low %v9276_v32, %v9280_v56  ;;  %v11101_v54 = vcombine.low %v9506_v42, %v9488_v23  ;;  %v4801_v36 = vrot.slane %v4800_v8, 4  ;;  %v4811_v27 = vrot.slane %v4810_v52, 4  ;;  %v5459_v8 = vld [vmem:[#allocation2 + $0xa8] sm:$0xe] }
 0x247   : > { %v9691_v20 = vpop.f32.mrf.mxu0  ;;  %v4815_v22 = vrot.slane %v4813_v49, 5  ;;  %v4837_v30 = vshll.u32 %v9417_v31, 16  ;;  %v11102_v18 = vcombine.low %v9289_v60, %v9293_v45  ;;  %v11103_v32 = vcombine.low %v9520_v17, %v9524_v5  ;;  %v9704_v56 = vpop.f32.mrf.mxu1 }
 0x248   : > { %7555 = vmatmul.mubr.msk.bf16.gmra.mxu1 %vm1845_vm12, %v11100_v53  ;;  %7645 = vmatmul.mubr.msk.bf16.gmra.mxu0 %vm1845_vm12, %v11101_v54  ;;  %11104 = vst [vmem:[#allocation57_spill] sm:$0xff] %v9704_v56  ;;  %v5592_v23 = vrot.slane %v5590_v7, 4  ;;  %v4824_v42 = vor.u32 %v4823_v50, %v4820_v41  ;;  %v4835_v52 = vrot.slane %v4834_v28, 4  ;;  %v5597_v0 = vrot.slane %v9670_v14, 5  ;;  %v9724_v53 = vld [vmem:[#allocation2 + $0xb0] sm:$0x1] }
 0x249   : > { %7558 = vmatprep.mubr.msk.bf16.mxu1 %vm1845_vm12, %v11102_v18  ;;  %7648 = vmatprep.mubr.msk.bf16.mxu0 %vm1845_vm12, %v11103_v32  ;;  %v9709_v31 = vpop.f32.mrf.mxu0  ;;  %v4844_v60 = vrot.slane %v4842_v13, 4  ;;  %v4847_v45 = vrot.slane %v4845_v15, 5  ;;  %v9711_v49 = vrot.slane %v4851_v11, 5  ;;  %v4857_v10 = vrot.slane %v4855_v59, 4  ;;  %v9713_v17 = vpop.f32.mrf.mxu1 }
 0x24a   : > { %11105 = vst [vmem:[#allocation58_spill] sm:$0xff] %v9713_v17  ;;  %v9715_v5 = vcombine.low %v4782_v63, %v4792_v35  ;;  %v9721_v28 = vsel %vm8322_vm15, %v6981_v6, %v5590_v7  ;;  %v5593_v41 = vrot.slane %v9693_v57, 5  ;;  %v4806_v15 = vsel %vm8268_vm11, %v4801_v36, %v9637_v40  ;;  %v4733_v35 = vld [vmem:[#allocation2 + $0x48] sm:$0xf] }
 0x24b   : > { %v9726_v13 = vpop.f32.mrf.mxu0  ;;  %v4816_v11 = vsel %vm8268_vm11, %v4811_v27, %v4815_v22  ;;  %v4839_v59 = vrot.slane %v4837_v30, 5  ;;  %v5604_v63 = vrot.slane %v9707_v2, 5  ;;  %v9734_v54 = vpop.f32.mrf.mxu1  ;;  %v4825_v6 = vrot.slane %v4824_v42, 4  ;;  %v5460_v22 = vld [vmem:[#allocation2 + $0xb4] sm:$0xe] }
 0x24c   : > { %11106 = vst [vmem:[#allocation59_spill] sm:$0xff] %v9734_v54  ;;  %v9738_v7 = vsel %vm8322_vm15, %v5592_v23, %v5593_v41  ;;  %v6982_v18 = vrot.slane %v5459_v8, 9  ;;  %v5599_v32 = vrot.slane %v5597_v0, 4  ;;  %v5600_v40 = vrot.slane %v9724_v53, 5 }
 0x24d   : > { %v4840_v50 = vsel %vm8268_vm11, %v4835_v52, %v4839_v59  ;;  %v4848_v36 = vor.u32 %v4847_v45, %v4844_v60  ;;  %v4858_v27 = vor.u32 %v4857_v10, %v9711_v49  ;;  %v4861_v30 = vshll.u32 %v9429_v55, 16  ;;  %v9756_v8 = vpop.f32.mrf.mxu1  ;;  %v9758_v60 = vpop.f32.mrf.mxu0  ;;  %v11116_v45 = vld [vmem:[#allocation20_spill] sm:$0xff] }
 0x24e   : > { %v4866_v54 = vshrl.u32 %v4733_v35, 16  ;;  %v4869_v17 = vshll.u32 %v4733_v35, 16  ;;  %v4875_v23 = vshll.u32 %v9420_v38, 16  ;;  %v11108_v42 = vcombine.low %v9306_v19, %v9310_v46  ;;  %11110 = vst [vmem:[#allocation61_spill] sm:$0xff] %v9756_v8  ;;  %v11117_v8 = vld [vmem:[#allocation21_spill] sm:$0xff] }
 0x24f   : > { %v11109_v52 = vcombine.low %v9528_v62, %v9534_v44  ;;  %v9760_v55 = vcombine.low %v4806_v15, %v4816_v11  ;;  %v5606_v10 = vrot.slane %v5604_v63, 4  ;;  %v4879_v41 = vshrl.u32 %v9420_v38, 16 }
 0x250   : > { %7559 = vmatmul.mubr.msk.bf16.gmra.mxu1 %vm1845_vm12, %v11108_v42  ;;  %v11111_v19 = vcombine.low %v9321_v29, %v9325_v43  ;;  %v11112_v44 = vcombine.low %v9562_v39, %v9538_v24  ;;  %v4830_v46 = vsel %vm8268_vm11, %v4825_v6, %v9649_v48  ;;  %v9778_v62 = vsel %vm8322_vm15, %v6982_v18, %v5597_v0  ;;  %v4736_v43 = vld [vmem:[#allocation2 + $0x54] sm:$0xf]  ;;  %v5461_v6 = vld [vmem:[#allocation2 + $0xc0] sm:$0xe] }
 0x251   : > { %7649 = vmatmul.mubr.msk.bf16.gmra.mxu0 %vm1845_vm12, %v11109_v52  ;;  %v9782_v38 = vsel %vm8322_vm15, %v5599_v32, %v5600_v40  ;;  %v6983_v29 = vrot.slane %v5460_v22, 9  ;;  %v9784_v15 = vcombine.low %v4830_v46, %v4840_v50  ;;  %v4849_v11 = vrot.slane %v4848_v36, 4  ;;  %v4739_v46 = vld [vmem:[#allocation2 + $0x60] sm:$0xf] }
 0x252   : > { %7562 = vmatprep.mubr.msk.bf16.mxu1 %vm1845_vm12, %v11111_v19  ;;  %7652 = vmatprep.mubr.msk.bf16.mxu0 %vm1845_vm12, %v11112_v44  ;;  %v4859_v24 = vrot.slane %v4858_v27, 4  ;;  %v5607_v39 = vrot.slane %v9745_v26, 5  ;;  %v4863_v59 = vrot.slane %v4861_v30, 5  ;;  %v4868_v35 = vrot.slane %v4866_v54, 4  ;;  %v9789_v0 = vpop.f32.mrf.mxu1  ;;  %v9803_v54 = vld [vmem:[#allocation2 + $0xc4] sm:$0xf] }
 0x253   : > { %v4871_v42 = vrot.slane %v4869_v17, 5  ;;  %v9787_v48 = vrot.slane %v4875_v23, 5  ;;  %11113 = vst [vmem:[#allocation62_spill] sm:$0xff] %v9789_v0  ;;  %v9791_v18 = vpop.f32.mrf.mxu0  ;;  %v4881_v50 = vrot.slane %v4879_v41, 4  ;;  %v4890_v40 = vshrl.u32 %v4736_v43, 16  ;;  %v11115_v19 = vld [vmem:[#allocation32_spill] sm:$0xff] }
 0x254   : > { %v9795_v32 = vsel %vm8322_vm15, %v5606_v10, %v5607_v39  ;;  %v4893_v36 = vshll.u32 %v4736_v43, 16  ;;  %v9801_v17 = vsel %vm8322_vm15, %v6983_v29, %v5604_v63  ;;  %v4899_v22 = vshll.u32 %v9424_v58, 16  ;;  %v9807_v23 = vpop.f32.mrf.mxu1  ;;  %v4742_v27 = vld [vmem:[#allocation2 + $0x6c] sm:$0xf] }
 0x255   : > { %v4903_v30 = vshrl.u32 %v9424_v58, 16  ;;  %11114 = vst [vmem:[#allocation63_spill] sm:$0xff] %v9807_v23  ;;  %v9809_v52 = vpop.f32.mrf.mxu0  ;;  %v4854_v10 = vsel %vm8268_vm11, %v4849_v11, %v9711_v49  ;;  %v4864_v41 = vsel %vm8268_vm11, %v4859_v24, %v4863_v59  ;;  %v4885_v63 = vshll.u32 %v11115_v19, 16 }
 0x256   : > { %v6984_v44 = vrot.slane %v5461_v6, 9  ;;  %v4872_v43 = vor.u32 %v4871_v42, %v4868_v35  ;;  %v4923_v58 = vshll.u32 %v9426_v47, 16  ;;  %v4927_v39 = vshrl.u32 %v9426_v47, 16  ;;  %v9829_v11 = vpop.f32.mrf.mxu1  ;;  %v9834_v35 = vld [vmem:[#allocation2 + $0xc8] sm:$0x1] }
 0x257   : > { %v11118_v23 = vcombine.low %v11116_v45, %v11117_v8  ;;  %v11119_v49 = vcombine.low %v9578_v4, %v9582_v51  ;;  %11120 = vst [vmem:[#allocation32_spill] sm:$0xff] %v9829_v11  ;;  %v9831_v24 = vpop.f32.mrf.mxu0  ;;  %v4882_v59 = vor.u32 %v4881_v50, %v9787_v48  ;;  %11121 = vst [vmem:[#allocation20_spill] sm:$0xff] %v9834_v35  ;;  %v5611_v47 = vrot.slane %v9803_v54, 5  ;;  %v11122_v8 = vld [vmem:[#allocation23_spill] sm:$0xff]  ;;  %v11123_v45 = vld [vmem:[#allocation24_spill] sm:$0xff] }
 0x258   : > { %v4892_v42 = vrot.slane %v4890_v40, 4  ;;  %v4895_v6 = vrot.slane %v4893_v36, 5  ;;  %v11125_v4 = vcombine.low %v9606_v33, %v9610_v25  ;;  %v9845_v51 = vrot.slane %v4899_v22, 5  ;;  %v9852_v56 = vpop.f32.mrf.mxu1 }
 0x259   : > { %7563 = vmatmul.mubr.msk.bf16.gmra.mxu1 %vm1845_vm12, %v11118_v23  ;;  %7653 = vmatmul.mubr.msk.bf16.gmra.mxu0 %vm1845_vm12, %v11119_v49  ;;  %v11124_v23 = vcombine.low %v11122_v8, %v11123_v45  ;;  %v4905_v19 = vrot.slane %v4903_v30, 4  ;;  %v4914_v50 = vshrl.u32 %v4739_v46, 16  ;;  %v4917_v49 = vshll.u32 %v4739_v46, 16  ;;  %11126 = vst [vmem:[#allocation21_spill] sm:$0xff] %v9852_v56  ;;  %v9854_v33 = vpop.f32.mrf.mxu0 }
 0x25a   : > { %7656 = vmatprep.mubr.msk.bf16.mxu0 %vm1845_vm12, %v11125_v4  ;;  %v9847_v29 = vcombine.low %v4854_v10, %v4864_v41  ;;  %v4887_v11 = vrot.slane %v4885_v63, 5  ;;  %v4938_v40 = vshrl.u32 %v4742_v27, 16  ;;  %v4941_v36 = vshll.u32 %v4742_v27, 16  ;;  %11127 = vst [vmem:[#allocation23_spill] sm:$0xff] %v9854_v33  ;;  %v11128_v4 = vld [vmem:[#allocation33_spill] sm:$0xff]  ;;  %v11132_v33 = vld [vmem:[#allocation27_spill] sm:$0xff] }
 0x25b   : > { %7566 = vmatprep.mubr.msk.bf16.mxu1 %vm1845_vm12, %v11124_v23  ;;  %v4873_v0 = vrot.slane %v4872_v43, 4  ;;  %v5614_v8 = vrot.slane %v9834_v35, 5  ;;  %v9850_v45 = vrot.slane %v4923_v58, 5  ;;  %v4929_v23 = vrot.slane %v4927_v39, 4  ;;  %v4745_v10 = vld [vmem:[#allocation2 + $0x78] sm:$0xf] }
 0x25c   : > { %v4883_v25 = vrot.slane %v4882_v59, 4  ;;  %v5613_v22 = vrot.slane %v5611_v47, 4  ;;  %v4896_v30 = vor.u32 %v4895_v6, %v4892_v42  ;;  %v4909_v46 = vshll.u32 %v11128_v4, 16  ;;  %v11129_v43 = vld [vmem:[#allocation34_spill] sm:$0xff] }
 0x25d   : > { %v4906_v41 = vor.u32 %v4905_v19, %v9845_v51  ;;  %v4916_v63 = vrot.slane %v4914_v50, 4  ;;  %v4919_v27 = vrot.slane %v4917_v49, 5  ;;  %v4947_v26 = vshll.u32 %v11129_v43, 16  ;;  %v11131_v4 = vld [vmem:[#allocation26_spill] sm:$0xff] }
 0x25e   : > { %v9861_v58 = vsel %vm8322_vm15, %v6984_v44, %v5611_v47  ;;  %v4940_v39 = vrot.slane %v4938_v40, 4  ;;  %v4943_v56 = vrot.slane %v4941_v36, 5  ;;  %v4951_v35 = vshrl.u32 %v11129_v43, 16  ;;  %v9870_v49 = vpop.f32.mrf.mxu0  ;;  %v11135_v36 = vld [vmem:[#allocation37_spill] sm:$0xff] }
 0x25f   : > { %v4878_v59 = vsel %vm8268_vm11, %v4873_v0, %v9787_v48  ;;  %v4930_v42 = vor.u32 %v4929_v23, %v9850_v45  ;;  %v4962_v6 = vshrl.u32 %v4745_v10, 16  ;;  %v4965_v19 = vshll.u32 %v4745_v10, 16  ;;  %v9868_v50 = vpop.f32.mrf.mxu1  ;;  %v807_v10 = vld [vmem:[#allocation2 + $0xd4] sm:$0x1] }
 0x260   : > { %11130 = vst [vmem:[#allocation24_spill] sm:$0xff] %v9868_v50  ;;  %v11133_v44 = vcombine.low %v11131_v4, %v11132_v33  ;;  %v11134_v47 = vcombine.low %v9614_v9, %v9621_v1  ;;  %v4888_v48 = vsel %vm8268_vm11, %v4883_v25, %v4887_v11  ;;  %v9884_v0 = vsel %vm8322_vm15, %v5613_v22, %v5614_v8  ;;  %v4748_v25 = vld [vmem:[#allocation2 + $0x84] sm:$0xf]  ;;  %v9897_v22 = vpop.f32.mrf.mxu0 }
 0x261   : > { %v4911_v40 = vrot.slane %v4909_v46, 5  ;;  %v4933_v23 = vshll.u32 %v11135_v36, 16  ;;  %v11136_v33 = vcombine.low %v9662_v12, %v9681_v3  ;;  %v4897_v9 = vrot.slane %v4896_v30, 4  ;;  %v9895_v8 = vpop.f32.mrf.mxu1 }
 0x262   : > { %7567 = vmatmul.mubr.msk.bf16.gmra.mxu1 %vm1845_vm12, %v11133_v44  ;;  %7657 = vmatmul.mubr.msk.bf16.gmra.mxu0 %vm1845_vm12, %v11134_v47  ;;  %v4907_v1 = vrot.slane %v4906_v41, 4  ;;  %v4920_v43 = vor.u32 %v4919_v27, %v4916_v63  ;;  %v9893_v11 = vrot.slane %v4947_v26, 5  ;;  %11137 = vst [vmem:[#allocation33_spill] sm:$0xff] %v9895_v8  ;;  %v4944_v46 = vor.u32 %v4943_v56, %v4940_v39  ;;  %v9905_v26 = vpop.f32.mrf.mxu0 }
 0x263   : > { %7606 = vmatprep.mubr.msk.bf16.mxu1 %vm1845_vm12, %v9715_v5  ;;  %7660 = vmatprep.mubr.msk.bf16.mxu0 %vm1845_vm12, %v11136_v33  ;;  %v4953_v4 = vrot.slane %v4951_v35, 4  ;;  %v4971_v44 = vshll.u32 %v9500_v34, 16  ;;  %v4975_v5 = vshrl.u32 %v9500_v34, 16  ;;  %v4931_v47 = vrot.slane %v4930_v42, 4  ;;  %v9903_v41 = vpop.f32.mrf.mxu1 }
 0x264   : > { %v4964_v12 = vrot.slane %v4962_v6, 4  ;;  %v4967_v3 = vrot.slane %v4965_v19, 5  ;;  %v808_v30 = vsel %vm8203_vm5, 0, %v807_v10  ;;  %11139 = vst [vmem:[#allocation34_spill] sm:$0xff] %v9903_v41  ;;  %v9907_v63 = vcombine.low %v4878_v59, %v4888_v48  ;;  %v11140_v6 = vld [vmem:[#allocation40_spill] sm:$0xff]  ;;  %v9916_v33 = vpop.f32.mrf.mxu0 }
 0x265   : > { %v4986_v35 = vshrl.u32 %v4748_v25, 16  ;;  %v4989_v27 = vshll.u32 %v4748_v25, 16  ;;  %809 = vst [vmem:[#allocation2 + $0xd4] sm:$0x1] %v808_v30  ;;  %v4912_v34 = vsel %vm8268_vm11, %v4907_v1, %v4911_v40  ;;  %v4921_v39 = vrot.slane %v4920_v43, 4  ;;  %v9914_v10 = vpop.f32.mrf.mxu1  ;;  %11142 = vst [vmem:[#allocation27_spill] sm:$0xff] %v9916_v33 }
 0x266   : > { %v4935_v42 = vrot.slane %v4933_v23, 5  ;;  %v4957_v19 = vshll.u32 %v11140_v6, 16  ;;  %11141 = vst [vmem:[#allocation26_spill] sm:$0xff] %v9914_v10  ;;  %v9918_v36 = vrot.slane %v4944_v46, 4  ;;  %v4954_v59 = vor.u32 %v4953_v4, %v9893_v11  ;;  %v11143_v1 = vld [vmem:[#allocation41_spill] sm:$0xff]  ;;  %v9929_v6 = vpop.f32.mrf.mxu0 }
 0x267   : > { %v9921_v48 = vrot.slane %v4971_v44, 5  ;;  %v4977_v56 = vrot.slane %v4975_v5, 4  ;;  %v4902_v25 = vsel %vm8268_vm11, %v4897_v9, %v9845_v51  ;;  %v4968_v23 = vor.u32 %v4967_v3, %v4964_v12  ;;  %v7404_v30 = vpop.f32.mrf.mxu1  ;;  %v11145_v5 = vld [vmem:[#allocation14_spill] sm:$0xff]  ;;  %v9977_v33 = vld [vmem:[#allocation2 + $0xd0] sm:$0xf] }
 0x268   : > { %v4936_v40 = vsel %vm8268_vm11, %v4931_v47, %v4935_v42  ;;  %v4995_v43 = vshll.u32 %v11143_v1, 16  ;;  %v11144_v46 = vcombine.low %v9721_v28, %v9738_v7  ;;  %v9937_v4 = vcombine.low %v4902_v25, %v4912_v34  ;;  %v4751_v42 = vld [vmem:[#allocation2 + $0x90] sm:$0xf] }
 0x269   : > { %v4988_v51 = vrot.slane %v4986_v35, 4  ;;  %v4991_v9 = vrot.slane %v4989_v27, 5  ;;  %v4999_v44 = vshrl.u32 %v11143_v1, 16  ;;  %v2233_v47 = vadd.f32 %v7404_v30, %v11145_v5  ;;  %v2224_v35 = vpop.f32.mrf.mxu1  ;;  %v9953_v27 = vpop.f32.mrf.mxu0  ;;  %v11149_v30 = vld [vmem:[#allocation36_spill] sm:$0xff] }
 0x26a   : > { %7607 = vmatmul.mubr.msk.bf16.vlgmr.msra.gmra.mxu1 %vm1845_vm12, %v9760_v55  ;;  %7661 = vmatmul.mubr.msk.bf16.gmra.mxu0 %vm1845_vm12, %v11144_v46  ;;  %v11146_v12 = vcombine.low %v9778_v62, %v9782_v38  ;;  %v4926_v28 = vsel %vm8268_vm11, %v4921_v39, %v9850_v45  ;;  %v9950_v7 = vrot.slane %v4957_v19, 5  ;;  %v11147_v55 = vld [vmem:[#allocation44_spill] sm:$0xff]  ;;  %v9961_v38 = vrot.slane %v4954_v59, 4  ;;  %v11148_v45 = vld [vmem:[#allocation15_spill] sm:$0xff] }
 0x26b   : > { %7610 = vmatprep.mubr.msk.bf16.mxu1 %vm1845_vm12, %v9784_v15  ;;  %v4981_v3 = vshll.u32 %v11147_v55, 16  ;;  %v9955_v34 = vcombine.low %v4926_v28, %v4936_v40  ;;  %v4978_v15 = vor.u32 %v4977_v56, %v9921_v48  ;;  %v2225_v39 = vadd.f32 %v2224_v35, %v11148_v45  ;;  %v7405_v46 = vpop.f32.mrf.mxu1  ;;  %v9972_v5 = vpop.f32.mrf.mxu0  ;;  %v11151_v59 = vld [vmem:[#allocation47_spill] sm:$0xff] }
 0x26c   : > { %7664 = vmatprep.mubr.msk.bf16.mxu0 %vm1845_vm12, %v11146_v12  ;;  %v9965_v19 = vrot.slane %v4968_v23, 4  ;;  %v9967_v25 = vrot.slane %v4995_v43, 5  ;;  %v825_v1 = vld [vmem:[#allocation2 + $0xd4] sm:$0x1]  ;;  %v9970_v40 = vadd.f32 %v11149_v30, %v2233_v47  ;;  %v4992_v12 = vor.u32 %v4991_v9, %v4988_v51  ;;  %v11153_v23 = vld [vmem:[#allocation16_spill] sm:$0xff] }
 0x26d   : > { %v5001_v28 = vrot.slane %v4999_v44, 4  ;;  %v5005_v55 = vshll.u32 %v11151_v59, 16  ;;  %v826_v56 = vsel %vm8194_vm3, 0, %v825_v1  ;;  %v2236_v35 = vadd.f32 %v7405_v46, %v11153_v23  ;;  %v11154_v47 = vld [vmem:[#allocation39_spill] sm:$0xff]  ;;  %v9985_v10 = vpop.f32.mrf.mxu0  ;;  %v5462_v1 = vld [vmem:[#allocation2 + $0xcc] sm:$0xe] }
 0x26e   : > { %11150 = vst [vmem:[#allocation37_spill] sm:$0xff] %v9970_v40  ;;  %v9980_v43 = vrot.slane %v4981_v3, 5  ;;  %v5010_v45 = vshrl.u32 %v4751_v42, 16  ;;  %827 = vst [vmem:[#allocation2 + $0xd4] sm:$0x1] %v826_v56  ;;  %v9983_v30 = vadd.f32 %v11154_v47, %v2225_v39  ;;  %v2227_v40 = vpop.f32.mrf.mxu1  ;;  %v9987_v51 = vrot.slane %v4978_v15, 4 }
 0x26f   : > { %11156 = vst [vmem:[#allocation40_spill] sm:$0xff] %v9985_v10  ;;  %v5013_v9 = vshll.u32 %v4751_v42, 16  ;;  %v5019_v44 = vshll.u32 %v9591_v16, 16  ;;  %v5023_v62 = vshrl.u32 %v9591_v16, 16  ;;  %v11157_v59 = vld [vmem:[#allocation17_spill] sm:$0xff]  ;;  %v5618_v39 = vrot.slane %v9977_v33, 5  ;;  %v10000_v47 = vpop.f32.mrf.mxu0 }
 0x270   : > { %11155 = vst [vmem:[#allocation13_spill] sm:$0xff] %v9983_v30  ;;  %v2228_v46 = vadd.f32 %v2227_v40, %v11157_v59  ;;  %v11158_v56 = vld [vmem:[#allocation42_spill] sm:$0xff]  ;;  %v7408_v15 = vpop.f32.mrf.mxu1  ;;  %11160 = vst [vmem:[#allocation14_spill] sm:$0xff] %v10000_v47  ;;  %v11161_v16 = vcombine.low %v9801_v17, %v9795_v32  ;;  %v10012_v40 = vrot.slane %v4992_v12, 4  ;;  %v10015_v59 = vrot.slane %v5005_v55, 5 }
 0x271   : > { %v9998_v23 = vadd.f32 %v11158_v56, %v2236_v35  ;;  %v5002_v35 = vor.u32 %v5001_v28, %v9967_v25  ;;  %v4754_v56 = vld [vmem:[#allocation2 + $0x9c] sm:$0xf]  ;;  %v11162_v3 = vld [vmem:[#allocation18_spill] sm:$0xff]  ;;  %v11163_v32 = vcombine.low %v9861_v58, %v9884_v0  ;;  %v5012_v17 = vrot.slane %v5010_v45, 4  ;;  %v10027_v28 = vpop.f32.mrf.mxu0  ;;  %v11167_v58 = vld [vmem:[#allocation19_spill] sm:$0xff] }
 0x272   : > { %7611 = vmatmul.mubr.msk.bf16.gmra.mxu1 %vm1845_vm12, %v9847_v29  ;;  %7665 = vmatmul.mubr.msk.bf16.gmra.mxu0 %vm1845_vm12, %v11161_v16  ;;  %v2249_v10 = vadd.f32 %v7408_v15, %v11162_v3  ;;  %v6985_v29 = vrot.slane %v5462_v1, 9  ;;  %v11164_v16 = vld [vmem:[#allocation45_spill] sm:$0xff]  ;;  %v2240_v42 = vpop.f32.mrf.mxu1  ;;  %11166 = vst [vmem:[#allocation15_spill] sm:$0xff] %v10027_v28  ;;  %v5015_v3 = vrot.slane %v5013_v9, 5  ;;  %v5025_v15 = vrot.slane %v5023_v62, 4  ;;  %v11168_v1 = vld [vmem:[#allocation48_spill] sm:$0xff] }
 0x273   : > { %11159 = vst [vmem:[#allocation41_spill] sm:$0xff] %v9998_v23  ;;  %7614 = vmatprep.mubr.msk.bf16.mxu1 %vm1845_vm12, %v9907_v63  ;;  %7668 = vmatprep.mubr.msk.bf16.mxu0 %vm1845_vm12, %v11163_v32  ;;  %v10025_v12 = vadd.f32 %v11164_v16, %v2228_v46  ;;  %v10033_v63 = vrot.slane %v5019_v44, 5  ;;  %v2241_v0 = vadd.f32 %v2240_v42, %v11167_v58  ;;  %v5034_v32 = vshrl.u32 %v4754_v56, 16  ;;  %v10039_v16 = vpop.f32.mrf.mxu0  ;;  %v11171_v42 = vld [vmem:[#allocation22_spill] sm:$0xff]  ;;  %v11174_v28 = vld [vmem:[#allocation25_spill] sm:$0xff] }
 0x274   : > { %v5620_v45 = vrot.slane %v5618_v39, 4  ;;  %v10037_v23 = vadd.f32 %v11168_v1, %v2249_v10  ;;  %v7409_v46 = vpop.f32.mrf.mxu1  ;;  %11170 = vst [vmem:[#allocation47_spill] sm:$0xff] %v10039_v16  ;;  %v5037_v55 = vshll.u32 %v4754_v56, 16  ;;  %v5043_v9 = vshll.u32 %v9655_v37, 16  ;;  %v4757_v16 = vld [vmem:[#allocation2 + $0xa8] sm:$0xf] }
 0x275   : > { %11165 = vst [vmem:[#allocation44_spill] sm:$0xff] %v10025_v12  ;;  %v4998_v12 = vsel %vm8268_vm11, %v10012_v40, %v9967_v25  ;;  %v5047_v44 = vshrl.u32 %v9655_v37, 16  ;;  %v10047_v62 = vld [vmem:[#allocation2 + $0xd4] sm:$0x1]  ;;  %v2252_v58 = vadd.f32 %v7409_v46, %v11171_v42  ;;  %v5619_v10 = vsel %vm8322_vm15, %v6985_v29, %v5618_v39  ;;  %v10056_v8 = vpop.f32.mrf.mxu0  ;;  %v11173_v37 = vld [vmem:[#allocation53_spill] sm:$0xff]  ;;  %v11175_v29 = vld [vmem:[#allocation52_spill] sm:$0xff] }
 0x276   : > { %11169 = vst [vmem:[#allocation36_spill] sm:$0xff] %v10037_v23  ;;  %v5621_v1 = vrot.slane %v10047_v62, 5  ;;  %v11172_v23 = vld [vmem:[#allocation50_spill] sm:$0xff]  ;;  %v2243_v41 = vpop.f32.mrf.mxu1  ;;  %v5003_v25 = vrot.slane %v5002_v35, 4  ;;  %v5016_v40 = vor.u32 %v5015_v3, %v5012_v17  ;;  %v5026_v56 = vor.u32 %v5025_v15, %v10033_v63 }
 0x277   : > { %v10054_v30 = vadd.f32 %v11172_v23, %v2241_v0  ;;  %v5029_v50 = vshll.u32 %v11173_v37, 16  ;;  %v2244_v46 = vadd.f32 %v2243_v41, %v11174_v28  ;;  %v5036_v42 = vrot.slane %v5034_v32, 4  ;;  %v10066_v0 = vpop.f32.mrf.mxu0  ;;  %v11176_v37 = vld [vmem:[#allocation28_spill] sm:$0xff]  ;;  %v11177_v32 = vld [vmem:[#allocation55_spill] sm:$0xff] }
 0x278   : > { %v5622_v39 = vsel %vm8322_vm15, %v5620_v45, %v5621_v1  ;;  %v10064_v47 = vadd.f32 %v11175_v29, %v2252_v58  ;;  %v7412_v23 = vpop.f32.mrf.mxu1  ;;  %v5039_v35 = vrot.slane %v5037_v55, 5  ;;  %v10070_v17 = vrot.slane %v5043_v9, 5  ;;  %v6004_v58 = vld [vmem:[%s10995_s6] sm:$0xf] }
 0x279   : > { %v5049_v3 = vrot.slane %v5047_v44, 4  ;;  %v7002_v15 = vcombine.low %v5619_v10, %v5622_v39  ;;  %v2265_v41 = vadd.f32 %v7412_v23, %v11176_v37  ;;  %v5058_v61 = vshrl.u32 %v4757_v16, 16  ;;  %v10081_v55 = vpop.f32.mrf.mxu0  ;;  %7718 = vmatprep.subr.msk.bf16.mxu1 %vm1894_vm8, %v6004_v58 }
 0x27a   : > { %7615 = vmatmul.mubr.msk.bf16.gmra.mxu1 %vm1845_vm12, %v9937_v4  ;;  %v5061_v28 = vshll.u32 %v4757_v16, 16  ;;  %v10076_v45 = vadd.f32 %v11177_v32, %v2244_v46  ;;  %v2256_v4 = vpop.f32.mrf.mxu1  ;;  %v5008_v9 = vsel %vm8268_vm11, %v5003_v25, %v10015_v59  ;;  %v5027_v44 = vrot.slane %v5026_v56, 4  ;;  %v11178_v16 = vld [vmem:[#allocation29_spill] sm:$0xff] }
 0x27b   : > { %7618 = vmatprep.mubr.msk.bf16.mxu1 %vm1845_vm12, %v9955_v34  ;;  %v5031_v10 = vrot.slane %v5029_v50, 5  ;;  %v5067_v34 = vshll.u32 %v9670_v14, 16  ;;  %7669 = vmatmul.mubr.msk.bf16.gmra.mxu0 %vm1845_vm12, %v7002_v15  ;;  %v2257_v1 = vadd.f32 %v2256_v4, %v11178_v16  ;;  %v5071_v46 = vshrl.u32 %v9670_v14, 16  ;;  %v10095_v37 = vpop.f32.mrf.mxu0  ;;  %v11179_v15 = vld [vmem:[#allocation30_spill] sm:$0xff] }
 0x27c   : > { %v10092_v39 = vadd.f32 %v9691_v20, %v2265_v41  ;;  %v6061_v29 = vsel %vm1894_vm8, %v6004_v58, 0  ;;  %v7413_v23 = vpop.f32.mrf.mxu1  ;;  %v5017_v59 = vrot.slane %v5016_v40, 4  ;;  %v5040_v50 = vor.u32 %v5039_v35, %v5036_v42 }
 0x27d   : > { %v5050_v25 = vor.u32 %v5049_v3, %v10070_v17  ;;  %v5053_v56 = vshll.u32 %v9693_v57, 16  ;;  %7673 = vmatpush3.bf16.msra.mxu1 %v6061_v29  ;;  %v2268_v32 = vadd.f32 %v7413_v23, %v11179_v15  ;;  %v5060_v4 = vrot.slane %v5058_v61, 4  ;;  %v10103_v41 = vpop.f32.mrf.mxu0 }
 0x27e   : > { %v5063_v16 = vrot.slane %v5061_v28, 5  ;;  %v10101_v14 = vadd.f32 %v9709_v31, %v2257_v1  ;;  %v2259_v20 = vpop.f32.mrf.mxu1  ;;  %v11180_v40 = vsel %vm8268_vm11, %v9961_v38, %v9950_v7  ;;  %v11181_v57 = vsel %vm8268_vm11, %v9918_v36, %v9893_v11  ;;  %v4760_v38 = vld [vmem:[#allocation2 + $0xb4] sm:$0xf] }
 0x27f   : > { %v6945_v42 = vcombine.low %v11181_v57, %v11180_v40  ;;  %v11182_v31 = vsel %vm8268_vm11, %v9987_v51, %v9980_v43  ;;  %v11183_v35 = vsel %vm8268_vm11, %v9965_v19, %v9921_v48  ;;  %v6947_v61 = vcombine.low %v4998_v12, %v5008_v9  ;;  %v11184_v28 = vld [vmem:[#allocation31_spill] sm:$0xff]  ;;  %v10133_v51 = vpop.f32.mrf.mxu0 }
 0x280   : > { %v6946_v3 = vcombine.low %v11183_v35, %v11182_v31  ;;  %v5032_v7 = vsel %vm8268_vm11, %v5027_v44, %v5031_v10  ;;  %v2260_v58 = vadd.f32 %v2259_v20, %v11184_v28  ;;  %v10128_v11 = vrot.slane %v5067_v34, 5  ;;  %v7416_v43 = vpop.f32.mrf.mxu1  ;;  %v11185_v44 = vld [vmem:[#allocation35_spill] sm:$0xff] }
 0x281   : > { %v5073_v36 = vrot.slane %v5071_v46, 4  ;;  %v10131_v1 = vadd.f32 %v9726_v13, %v2268_v32  ;;  %v5022_v48 = vsel %vm8268_vm11, %v5017_v59, %v10033_v63  ;;  %v10139_v19 = vrot.slane %v5040_v50, 4  ;;  %v10150_v23 = vpop.f32.mrf.mxu0  ;;  %v11187_v31 = vld [vmem:[#allocation43_spill] sm:$0xff] }
 0x282   : > { %7619 = vmatmul.mubr.msk.bf16.gmra.mxu1 %vm1845_vm12, %v6945_v42  ;;  %v10141_v12 = vrot.slane %v5050_v25, 4  ;;  %v10143_v9 = vrot.slane %v5053_v56, 5  ;;  %v2281_v10 = vadd.f32 %v7416_v43, %v11185_v44  ;;  %v5064_v13 = vor.u32 %v5063_v16, %v5060_v4  ;;  %v2272_v29 = vpop.f32.mrf.mxu1  ;;  %v11186_v25 = vld [vmem:[#allocation38_spill] sm:$0xff]  ;;  %v4763_v4 = vld [vmem:[#allocation2 + $0xc0] sm:$0xf] }
 0x283   : > { %7622 = vmatprep.mubr.msk.bf16.mxu1 %vm1845_vm12, %v6946_v3  ;;  %v5082_v34 = vshrl.u32 %v4760_v38, 16  ;;  %v10148_v46 = vadd.f32 %v9758_v60, %v2260_v58  ;;  %v6948_v15 = vcombine.low %v5022_v48, %v5032_v7  ;;  %v5077_v63 = vshll.u32 %v9724_v53, 16  ;;  %v10160_v40 = vpop.f32.mrf.mxu0  ;;  %v4766_v7 = vld [vmem:[#allocation2 + $0xcc] sm:$0xf] }
 0x284   : > { %v5085_v59 = vshll.u32 %v4760_v38, 16  ;;  %v5091_v50 = vshll.u32 %v9707_v2, 16  ;;  %v2273_v56 = vadd.f32 %v2272_v29, %v11186_v25  ;;  %v5074_v32 = vor.u32 %v5073_v36, %v10128_v11  ;;  %v7417_v60 = vpop.f32.mrf.mxu1 }
 0x285   : > { %v5095_v20 = vshrl.u32 %v9707_v2, 16  ;;  %v10158_v16 = vadd.f32 %v9791_v18, %v2281_v10  ;;  %v5046_v53 = vsel %vm8268_vm11, %v10139_v19, %v10070_v17  ;;  %v5056_v57 = vsel %vm8268_vm11, %v10141_v12, %v10143_v9  ;;  %v10176_v58 = vpop.f32.mrf.mxu0  ;;  %v11188_v19 = vld [vmem:[#allocation46_spill] sm:$0xff] }
 0x286   : > { %v5115_v42 = vshll.u32 %v9803_v54, 16  ;;  %v5119_v2 = vshrl.u32 %v9803_v54, 16  ;;  %v2284_v18 = vadd.f32 %v7417_v60, %v11187_v31  ;;  %v5065_v35 = vrot.slane %v5064_v13, 4  ;;  %v2275_v28 = vpop.f32.mrf.mxu1 }
 0x287   : > { %v5084_v3 = vrot.slane %v5082_v34, 4  ;;  %v10174_v38 = vadd.f32 %v9809_v52, %v2273_v56  ;;  %v5087_v17 = vrot.slane %v5085_v59, 5  ;;  %v10178_v36 = vrot.slane %v5091_v50, 5  ;;  %v10184_v13 = vpop.f32.mrf.mxu0  ;;  %v11189_v50 = vld [vmem:[#allocation49_spill] sm:$0xff] }
 0x288   : > { %v5106_v43 = vshrl.u32 %v4763_v4, 16  ;;  %v5109_v48 = vshll.u32 %v4763_v4, 16  ;;  %v2276_v12 = vadd.f32 %v2275_v28, %v11188_v19  ;;  %v5075_v9 = vrot.slane %v5074_v32, 4  ;;  %v7420_v10 = vpop.f32.mrf.mxu1 }
 0x289   : > { %v5097_v54 = vrot.slane %v5095_v20, 4  ;;  %v10182_v44 = vadd.f32 %v9831_v24, %v2284_v18  ;;  %v10187_v52 = vrot.slane %v5115_v42, 5  ;;  %v5121_v34 = vrot.slane %v5119_v2, 4  ;;  %v11190_v24 = vld [vmem:[#allocation23_spill] sm:$0xff]  ;;  %v10196_v60 = vpop.f32.mrf.mxu0  ;;  %v11192_v42 = vld [vmem:[#allocation60_spill] sm:$0xff] }
 0x28a   : > { %7623 = vmatmul.mubr.msk.bf16.gmra.mxu1 %vm1845_vm12, %v6947_v61  ;;  %v5130_v29 = vshrl.u32 %v4766_v7, 16  ;;  %v5133_v59 = vshll.u32 %v4766_v7, 16  ;;  %v2297_v25 = vadd.f32 %v7420_v10, %v11189_v50  ;;  %v5139_v56 = vshll.u32 %v9977_v33, 16  ;;  %v2288_v4 = vpop.f32.mrf.mxu1  ;;  %v11193_v7 = vld [vmem:[#allocation51_spill] sm:$0xff] }
 0x28b   : > { %7626 = vmatprep.mubr.msk.bf16.mxu1 %vm1845_vm12, %v6948_v15  ;;  %v5143_v32 = vshrl.u32 %v9977_v33, 16  ;;  %v10194_v20 = vadd.f32 %v11190_v24, %v2276_v12  ;;  %v5079_v61 = vrot.slane %v5077_v63, 5  ;;  %v5101_v31 = vshll.u32 %v11192_v42, 16  ;;  %v10204_v50 = vpop.f32.mrf.mxu0 }
 0x28c   : > { %v5108_v2 = vrot.slane %v5106_v43, 4  ;;  %v5111_v18 = vrot.slane %v5109_v48, 5  ;;  %v2289_v28 = vadd.f32 %v2288_v4, %v11193_v7  ;;  %v5088_v19 = vor.u32 %v5087_v17, %v5084_v3  ;;  %v7421_v33 = vpop.f32.mrf.mxu1  ;;  %v11194_v43 = vld [vmem:[#allocation54_spill] sm:$0xff] }
 0x28d   : > { %11191 = vst [vmem:[#allocation12_spill] sm:$0xff] %v10194_v20  ;;  %v5098_v15 = vor.u32 %v5097_v54, %v10178_v36  ;;  %v10202_v10 = vadd.f32 %v9870_v49, %v2297_v25  ;;  %v5080_v12 = vsel %vm8268_vm11, %v5075_v9, %v5079_v61  ;;  %v5122_v63 = vor.u32 %v5121_v34, %v10187_v52  ;;  %v10215_v49 = vpop.f32.mrf.mxu0  ;;  %v11195_v34 = vld [vmem:[#allocation20_spill] sm:$0xff] }
 0x28e   : > { %v5132_v24 = vrot.slane %v5130_v29, 4  ;;  %v5135_v42 = vrot.slane %v5133_v59, 5  ;;  %v2300_v48 = vadd.f32 %v7421_v33, %v11194_v43  ;;  %v5141_v20 = vrot.slane %v5139_v56, 5  ;;  %v10213_v17 = vpop.f32.mrf.mxu1  ;;  %v11197_v43 = vld [vmem:[#allocation58_spill] sm:$0xff] }
 0x28f   : > { %v5145_v4 = vrot.slane %v5143_v32, 4  ;;  %v10211_v3 = vadd.f32 %v9897_v22, %v2289_v28  ;;  %v6949_v54 = vcombine.low %v5046_v53, %v5056_v57  ;;  %v5070_v9 = vsel %vm8268_vm11, %v5065_v35, %v10128_v11  ;;  %v10224_v22 = vpop.f32.mrf.mxu0  ;;  %v11196_v57 = vld [vmem:[#allocation57_spill] sm:$0xff] }
 0x290   : > { %v5112_v25 = vor.u32 %v5111_v18, %v5108_v2  ;;  %v5125_v29 = vshll.u32 %v11195_v34, 16  ;;  %v6950_v59 = vcombine.low %v5070_v9, %v5080_v12  ;;  %v5099_v61 = vrot.slane %v5098_v15, 4  ;;  %v7424_v32 = vpop.f32.mrf.mxu1 }
 0x291   : > { %v10222_v56 = vadd.f32 %v9905_v26, %v2300_v48  ;;  %v5089_v7 = vrot.slane %v5088_v19, 4  ;;  %v5123_v28 = vrot.slane %v5122_v63, 4  ;;  %v5136_v53 = vor.u32 %v5135_v42, %v5132_v24  ;;  %v10230_v15 = vpop.f32.mrf.mxu0 }
 0x292   : > { %7627 = vmatmul.mubr.msk.bf16.gmra.mxu1 %vm1845_vm12, %v6949_v54  ;;  %v2313_v33 = vadd.f32 %v7424_v32, %v11196_v57  ;;  %v5103_v11 = vrot.slane %v5101_v31, 5  ;;  %v5146_v35 = vor.u32 %v5145_v4, %v5141_v20  ;;  %v5149_v2 = vshll.u32 %v10047_v62, 16  ;;  %v2304_v18 = vpop.f32.mrf.mxu1  ;;  %v11198_v54 = vld [vmem:[#allocation59_spill] sm:$0xff] }
 0x293   : > { %7630 = vmatprep.mubr.msk.bf16.mxu1 %vm1845_vm12, %v6950_v59  ;;  %v5113_v26 = vrot.slane %v5112_v25, 4  ;;  %v5127_v12 = vrot.slane %v5125_v29, 5  ;;  %v2305_v48 = vadd.f32 %v2304_v18, %v11197_v43  ;;  %v10238_v42 = vpop.f32.mrf.mxu0  ;;  %v5094_v62 = vsel %vm8268_vm11, %v5089_v7, %v10178_v36  ;;  %v11201_v18 = vld [vmem:[#allocation14_spill] sm:$0xff] }
 0x294   : > { %v5104_v19 = vsel %vm8268_vm11, %v5099_v61, %v5103_v11  ;;  %v10236_v63 = vadd.f32 %v9929_v6, %v2313_v33  ;;  %v7425_v24 = vpop.f32.mrf.mxu1  ;;  %v5137_v4 = vrot.slane %v5136_v53, 4  ;;  %v5147_v25 = vrot.slane %v5146_v35, 4 }
 0x295   : > { %v5128_v31 = vsel %vm8268_vm11, %v5123_v28, %v5127_v12  ;;  %v2316_v9 = vadd.f32 %v7425_v24, %v11198_v54  ;;  %v5151_v34 = vrot.slane %v5149_v2, 5  ;;  %v10247_v29 = vadd.f32 %v9953_v27, %v2305_v48  ;;  %v10251_v59 = vpop.f32.mrf.mxu0  ;;  %v11199_v27 = vld [vmem:[#allocation62_spill] sm:$0xff] }
 0x296   : > { %v10249_v6 = vpop.f32.mrf.mxu1  ;;  %v6951_v61 = vcombine.low %v5094_v62, %v5104_v19  ;;  %v5118_v36 = vsel %vm8268_vm11, %v5113_v26, %v10187_v52  ;;  %v5142_v33 = vsel %vm8268_vm11, %v5137_v4, %v5141_v20  ;;  %v11202_v19 = vld [vmem:[#allocation32_spill] sm:$0xff]  ;;  %v11203_v62 = vld [vmem:[#allocation15_spill] sm:$0xff]  ;;  %v11204_v4 = vld [vmem:[#allocation21_spill] sm:$0xff] }
 0x297   : > { %v6952_v32 = vcombine.low %v5118_v36, %v5128_v31  ;;  %v10257_v7 = vadd.f32 %v9972_v5, %v2316_v9  ;;  %v10259_v53 = vpop.f32.mrf.mxu0  ;;  %v5152_v11 = vsel %vm8268_vm11, %v5147_v25, %v5151_v34  ;;  %v11200_v5 = vld [vmem:[#allocation63_spill] sm:$0xff]  ;;  %v11206_v36 = vld [vmem:[#allocation24_spill] sm:$0xff] }
 0x298   : > { %v7428_v28 = vpop.f32.mrf.mxu1  ;;  %v6953_v48 = vcombine.low %v5142_v33, %v5152_v11  ;;  %v11205_v9 = vld [vmem:[#allocation47_spill] sm:$0xff]  ;;  %v11207_v33 = vld [vmem:[#allocation33_spill] sm:$0xff] }
 0x299   : > { %v2329_v57 = vadd.f32 %v7428_v28, %v11199_v27  ;;  %v10268_v35 = vpop.f32.mrf.mxu0 }
 0x29a   : > { %7631 = vmatmul.mubr.msk.bf16.gmra.mxu1 %vm1845_vm12, %v6951_v61  ;;  %v2320_v52 = vpop.f32.mrf.mxu1 }
 0x29b   : > { %7634 = vmatprep.mubr.msk.bf16.mxu1 %vm1845_vm12, %v6952_v32  ;;  %v2321_v2 = vadd.f32 %v2320_v52, %v11200_v5  ;;  %v10272_v26 = vadd.f32 %v11201_v18, %v2329_v57  ;;  %v10274_v43 = vpop.f32.mrf.mxu0  ;;  %v11208_v18 = vld [vmem:[#allocation34_spill] sm:$0xff] }
 0x29c   : > { %v7429_v12 = vpop.f32.mrf.mxu1 }
 0x29d   : > { %v2332_v24 = vadd.f32 %v7429_v12, %v11202_v19  ;;  %v10278_v31 = vadd.f32 %v11203_v62, %v2321_v2  ;;  %v10280_v21 = vpop.f32.mrf.mxu0 }
 0x29e   : > { %v2323_v20 = vpop.f32.mrf.mxu1 }
 0x29f   : > { %v2324_v54 = vadd.f32 %v2323_v20, %v11204_v4  ;;  %v10284_v25 = vadd.f32 %v11205_v9, %v2332_v24  ;;  %v10286_v61 = vpop.f32.mrf.mxu0 }
 0x2a0   : > { %v7432_v34 = vpop.f32.mrf.mxu1 }
 0x2a1   : > { %v2345_v32 = vadd.f32 %v7432_v34, %v11206_v36  ;;  %v10291_v28 = vadd.f32 %v10056_v8, %v2324_v54  ;;  %v10293_v57 = vpop.f32.mrf.mxu0  ;;  %v11209_v8 = vld [vmem:[#allocation26_spill] sm:$0xff] }
 0x2a2   : > { %7635 = vmatmul.mubr.msk.bf16.gmra.mxu1 %vm1845_vm12, %v6953_v48  ;;  %v2336_v27 = vpop.f32.mrf.mxu1 }
 0x2a3   : > { %v2337_v11 = vadd.f32 %v2336_v27, %v11207_v33  ;;  %v10297_v52 = vadd.f32 %v10066_v0, %v2345_v32  ;;  %v10299_v2 = vpop.f32.mrf.mxu0  ;;  %v11210_v0 = vld [vmem:[#allocation37_spill] sm:$0xff] }
 0x2a4   : > { %v7433_v5 = vpop.f32.mrf.mxu1 }
 0x2a5   : > { %v2348_v12 = vadd.f32 %v7433_v5, %v11208_v18  ;;  %v10303_v48 = vadd.f32 %v10081_v55, %v2337_v11  ;;  %v10305_v24 = vpop.f32.mrf.mxu0  ;;  %v11211_v55 = vld [vmem:[#allocation13_spill] sm:$0xff] }
 0x2a6   : > { %v2339_v19 = vpop.f32.mrf.mxu1 }
 0x2a7   : > { %v2340_v62 = vadd.f32 %v2339_v19, %v11209_v8  ;;  %v10309_v20 = vadd.f32 %v10095_v37, %v2348_v12  ;;  %v10311_v54 = vpop.f32.mrf.mxu0  ;;  %v11212_v37 = vld [vmem:[#allocation41_spill] sm:$0xff] }
 0x2a8   : > { %v7472_v4 = vpop.f32.mrf.mxu1 }
 0x2a9   : > { %v3136_v9 = vadd.f32 %v7472_v4, %v11210_v0  ;;  %v10315_v34 = vadd.f32 %v10103_v41, %v2340_v62  ;;  %v10317_v32 = vpop.f32.mrf.mxu0  ;;  %v11213_v41 = vld [vmem:[#allocation44_spill] sm:$0xff] }
 0x2aa   : > { %v3007_v36 = vpop.f32.mrf.mxu1 }
 0x2ab   : > { %v3134_v27 = vadd.f32 %v3007_v36, %v11211_v55  ;;  %v10321_v33 = vadd.f32 %v10133_v51, %v3136_v9  ;;  %v10323_v5 = vpop.f32.mrf.mxu0  ;;  %v11214_v51 = vld [vmem:[#allocation36_spill] sm:$0xff] }
 0x2ac   : > { %v7473_v11 = vpop.f32.mrf.mxu1 }
 0x2ad   : > { %v3137_v18 = vadd.f32 %v7473_v11, %v11212_v37  ;;  %v10327_v12 = vadd.f32 %v10150_v23, %v3134_v27  ;;  %v10329_v8 = vpop.f32.mrf.mxu0 }
 0x2ae   : > { %v3010_v19 = vpop.f32.mrf.mxu1 }
 0x2af   : > { %v3135_v62 = vadd.f32 %v3010_v19, %v11213_v41  ;;  %v10333_v4 = vadd.f32 %v10160_v40, %v3137_v18  ;;  %v10335_v36 = vpop.f32.mrf.mxu0 }
 0x2b0   : > { %v7476_v0 = vpop.f32.mrf.mxu1 }
 0x2b1   : > { %v3140_v9 = vadd.f32 %v7476_v0, %v11214_v51  ;;  %v10339_v55 = vadd.f32 %v10176_v58, %v3135_v62  ;;  %v10341_v37 = vpop.f32.mrf.mxu0 }
 0x2b2   : > { %v3023_v11 = vpop.f32.mrf.mxu1 }
 0x2b3   : > { %v3138_v23 = vadd.f32 %v3023_v11, %v10054_v30  ;;  %v10345_v27 = vadd.f32 %v10184_v13, %v3140_v9  ;;  %v10347_v41 = vpop.f32.mrf.mxu0 }
 0x2b4   : > { %v7477_v19 = vpop.f32.mrf.mxu1 }
 0x2b5   : > { %v3141_v40 = vadd.f32 %v7477_v19, %v10064_v47  ;;  %v10351_v18 = vadd.f32 %v10196_v60, %v3138_v23  ;;  %v10353_v51 = vpop.f32.mrf.mxu0 }
 0x2b6   : > { %v3026_v0 = vpop.f32.mrf.mxu1 }
 0x2b7   : > { %v3139_v58 = vadd.f32 %v3026_v0, %v10076_v45  ;;  %v10357_v62 = vadd.f32 %v10204_v50, %v3141_v40  ;;  %v10359_v11 = vpop.f32.mrf.mxu0 }
 0x2b8   : > { %v7480_v30 = vpop.f32.mrf.mxu1 }
 0x2b9   : > { %11215 = vst [vmem:[#allocation16_spill] sm:$0xff] %v10357_v62  ;;  %v3144_v13 = vadd.f32 %v7480_v30, %v10092_v39  ;;  %v10363_v9 = vadd.f32 %v10215_v49, %v3139_v58  ;;  %v10365_v19 = vpop.f32.mrf.mxu0  ;;  %v11220_v62 = vld [vmem:[#allocation27_spill] sm:$0xff] }
 0x2ba   : > { %v3039_v47 = vpop.f32.mrf.mxu1 }
 0x2bb   : > { %11216 = vst [vmem:[#allocation39_spill] sm:$0xff] %v10363_v9  ;;  %v3142_v60 = vadd.f32 %v3039_v47, %v10101_v14  ;;  %v10369_v23 = vadd.f32 %v10224_v22, %v3144_v13  ;;  %v10371_v0 = vpop.f32.mrf.mxu0 }
 0x2bc   : > { %v7481_v45 = vpop.f32.mrf.mxu1 }
 0x2bd   : > { %v3145_v50 = vadd.f32 %v7481_v45, %v10131_v1  ;;  %v10375_v40 = vadd.f32 %v10230_v15, %v3142_v60  ;;  %v10377_v30 = vpop.f32.mrf.mxu0 }
 0x2be   : > { %v3042_v39 = vpop.f32.mrf.mxu1 }
 0x2bf   : > { %v3143_v49 = vadd.f32 %v3042_v39, %v10148_v46  ;;  %v10381_v58 = vadd.f32 %v10238_v42, %v3145_v50  ;;  %v10383_v47 = vpop.f32.mrf.mxu0 }
 0x2c0   : > { %v7484_v14 = vpop.f32.mrf.mxu1 }
 0x2c1   : > { %v3148_v22 = vadd.f32 %v7484_v14, %v10158_v16  ;;  %v10387_v13 = vadd.f32 %v10251_v59, %v3143_v49  ;;  %v10389_v45 = vpop.f32.mrf.mxu0  ;;  %v11218_v59 = vld [vmem:[#allocation12_spill] sm:$0xff] }
 0x2c2   : > { %v3055_v1 = vpop.f32.mrf.mxu1 }
 0x2c3   : > { %11217 = vst [vmem:[#allocation17_spill] sm:$0xff] %v10387_v13  ;;  %v3146_v15 = vadd.f32 %v3055_v1, %v10174_v38  ;;  %v10393_v60 = vadd.f32 %v10259_v53, %v3148_v22  ;;  %v10395_v39 = vpop.f32.mrf.mxu0  ;;  %v11219_v53 = vld [vmem:[#allocation56_spill] sm:$0xff] }
 0x2c4   : > { %v7485_v46 = vpop.f32.mrf.mxu1  ;;  %v2292_v22 = vadd.f32 %v10213_v17, %v11219_v53 }
 0x2c5   : > { %v3149_v42 = vadd.f32 %v7485_v46, %v10182_v44  ;;  %v10399_v50 = vadd.f32 %v10268_v35, %v3146_v15  ;;  %v10401_v14 = vpop.f32.mrf.mxu0 }
 0x2c6   : > { %v3058_v16 = vpop.f32.mrf.mxu1  ;;  %v2793_v17 = vadd.f32 %v11220_v62, %v2292_v22 }
 0x2c7   : > { %v3147_v49 = vadd.f32 %v3058_v16, %v11218_v59  ;;  %v10405_v13 = vadd.f32 %v10274_v43, %v3149_v42  ;;  %v10407_v1 = vpop.f32.mrf.mxu0 }
 0x2c8   : > { %v7488_v38 = vpop.f32.mrf.mxu1 }
 0x2c9   : > { %v3152_v9 = vadd.f32 %v7488_v38, %v10202_v10  ;;  %v10413_v44 = vadd.f32 %v10280_v21, %v3147_v49  ;;  %v10415_v15 = vpop.f32.mrf.mxu0 }
 0x2ca   : > { %v3071_v35 = vpop.f32.mrf.mxu1 }
 0x2cb   : > { %v3150_v46 = vadd.f32 %v3071_v35, %v10211_v3  ;;  %v10419_v16 = vadd.f32 %v10286_v61, %v3152_v9  ;;  %v10421_v42 = vpop.f32.mrf.mxu0  ;;  %v11221_v9 = vld [vmem:[#allocation61_spill] sm:$0xff] }
 0x2cc   : > { %v7489_v43 = vpop.f32.mrf.mxu1  ;;  %v2308_v35 = vadd.f32 %v10249_v6, %v11221_v9 }
 0x2cd   : > { %v3153_v59 = vadd.f32 %v7489_v43, %v10222_v56  ;;  %v10426_v10 = vadd.f32 %v10293_v57, %v3150_v46  ;;  %v10428_v49 = vpop.f32.mrf.mxu0 }
 0x2ce   : > { %v3074_v21 = vpop.f32.mrf.mxu1 }
 0x2cf   : > { %v3151_v38 = vadd.f32 %v3074_v21, %v2793_v17  ;;  %v10431_v53 = vadd.f32 %v10299_v2, %v3153_v59  ;;  %v10433_v61 = vpop.f32.mrf.mxu0  ;;  %v11223_v21 = vld [vmem:[#allocation40_spill] sm:$0xff] }
 0x2d0   : > { %v7492_v3 = vpop.f32.mrf.mxu1  ;;  %v2797_v6 = vadd.f32 %v11223_v21, %v2308_v35 }
 0x2d1   : > { %v3156_v56 = vadd.f32 %v7492_v3, %v10236_v63  ;;  %v10439_v62 = vadd.f32 %v10305_v24, %v3151_v38  ;;  %v10441_v22 = vpop.f32.mrf.mxu0 }
 0x2d2   : > { %v3087_v57 = vpop.f32.mrf.mxu1 }
 0x2d3   : > { %11222 = vst [vmem:[#allocation42_spill] sm:$0xff] %v10439_v62  ;;  %v3154_v46 = vadd.f32 %v3087_v57, %v10247_v29  ;;  %v10445_v43 = vadd.f32 %v10311_v54, %v3156_v56  ;;  %v10447_v59 = vpop.f32.mrf.mxu0 }
 0x2d4   : > { %v7493_v2 = vpop.f32.mrf.mxu1 }
 0x2d5   : > { %v3157_v17 = vadd.f32 %v7493_v2, %v10257_v7  ;;  %v10452_v63 = vadd.f32 %v10317_v32, %v3154_v46  ;;  %v10454_v38 = vpop.f32.mrf.mxu0 }
 0x2d6   : > { %v3090_v24 = vpop.f32.mrf.mxu1 }
 0x2d7   : > { %v3155_v3 = vadd.f32 %v3090_v24, %v2797_v6  ;;  %v10457_v9 = vadd.f32 %v10323_v5, %v3157_v17  ;;  %v10459_v54 = vpop.f32.mrf.mxu0 }
 0x2d8   : > { %v7496_v29 = vpop.f32.mrf.mxu1 }
 0x2d9   : > { %v3160_v56 = vadd.f32 %v7496_v29, %v10272_v26  ;;  %v10463_v57 = vadd.f32 %v10329_v8, %v3155_v3  ;;  %v10465_v35 = vpop.f32.mrf.mxu0 }
 0x2da   : > { %v3103_v7 = vpop.f32.mrf.mxu1 }
 0x2db   : > { %11224 = vst [vmem:[#allocation18_spill] sm:$0xff] %v10463_v57  ;;  %v3158_v32 = vadd.f32 %v3103_v7, %v10278_v31  ;;  %v10469_v46 = vadd.f32 %v10335_v36, %v3160_v56  ;;  %v10471_v21 = vpop.f32.mrf.mxu0 }
 0x2dc   : > { %v7497_v2 = vpop.f32.mrf.mxu1 }
 0x2dd   : > { %v3161_v5 = vadd.f32 %v7497_v2, %v10284_v25  ;;  %v10475_v17 = vadd.f32 %v10341_v37, %v3158_v32  ;;  %v10477_v6 = vpop.f32.mrf.mxu0 }
 0x2de   : > { %v3106_v26 = vpop.f32.mrf.mxu1  ;;  %11225 = vst [vmem:[#allocation45_spill] sm:$0xff] %v10477_v6 }
 0x2df   : > { %v3159_v8 = vadd.f32 %v3106_v26, %v10291_v28  ;;  %v10481_v24 = vadd.f32 %v10347_v41, %v3161_v5  ;;  %v10483_v3 = vpop.f32.mrf.mxu0 }
 0x2e0   : > { %v7500_v31 = vpop.f32.mrf.mxu1 }
 0x2e1   : > { %v3164_v36 = vadd.f32 %v7500_v31, %v10297_v52  ;;  %v10487_v29 = vadd.f32 %v10353_v51, %v3159_v8  ;;  %v10489_v56 = vpop.f32.mrf.mxu0 }
 0x2e2   : > { %v3119_v25 = vpop.f32.mrf.mxu1 }
 0x2e3   : > { %11226 = vst [vmem:[#allocation19_spill] sm:$0xff] %v10487_v29  ;;  %v3162_v37 = vadd.f32 %v3119_v25, %v10303_v48  ;;  %v10493_v7 = vadd.f32 %v10359_v11, %v3164_v36  ;;  %v10495_v32 = vpop.f32.mrf.mxu0 }
 0x2e4   : > { %v7501_v28 = vpop.f32.mrf.mxu1 }
 0x2e5   : > { %v3165_v41 = vadd.f32 %v7501_v28, %v10309_v20  ;;  %v10499_v2 = vadd.f32 %v10365_v19, %v3162_v37  ;;  %v10501_v5 = vpop.f32.mrf.mxu0 }
 0x2e6   : > { %v3122_v52 = vpop.f32.mrf.mxu1  ;;  %11227 = vst [vmem:[#allocation48_spill] sm:$0xff] %v10501_v5 }
 0x2e7   : > { %v3163_v51 = vadd.f32 %v3122_v52, %v10315_v34  ;;  %v10505_v26 = vadd.f32 %v10371_v0, %v3165_v41  ;;  %v10507_v8 = vpop.f32.mrf.mxu0 }
 0x2e8   : > { %v7540_v48 = vpop.f32.mrf.mxu1 }
 0x2e9   : > { %v4332_v11 = vadd.f32 %v7540_v48, %v10321_v33  ;;  %v10511_v31 = vadd.f32 %v10377_v30, %v3163_v51  ;;  %v10513_v36 = vpop.f32.mrf.mxu0 }
 0x2ea   : > { %v4203_v20 = vpop.f32.mrf.mxu1 }
 0x2eb   : > { %11228 = vst [vmem:[#allocation22_spill] sm:$0xff] %v10511_v31  ;;  %v4330_v19 = vadd.f32 %v4203_v20, %v10327_v12  ;;  %v10517_v25 = vadd.f32 %v10383_v47, %v4332_v11  ;;  %v10521_v0 = vpop.f32.mrf.mxu0 }
 0x2ec   : > { %v10519_v34 = vpop.f32.mrf.mxu1 }
 0x2ed   : > { %v10524_v37 = vadd.f32 %v10389_v45, %v4330_v19  ;;  %v10528_v33 = vpop.f32.mrf.mxu0 }
 0x2ee   : > { %v10526_v28 = vpop.f32.mrf.mxu1  ;;  %11229 = vst [vmem:[#allocation50_spill] sm:$0xff] %v10528_v33 }
 0x2ef   : > { %v10530_v41 = vpop.f32.mrf.mxu0 }
 0x2f0   : > { %v7544_v30 = vpop.f32.mrf.mxu1 }
 0x2f1   : > { %v4336_v52 = vadd.f32 %v7544_v30, %v10345_v27  ;;  %v10533_v51 = vpop.f32.mrf.mxu0 }
 0x2f2   : > { %v4219_v12 = vpop.f32.mrf.mxu1 }
 0x2f3   : > { %v4334_v47 = vadd.f32 %v4219_v12, %v10351_v18  ;;  %v10537_v48 = vadd.f32 %v10407_v1, %v4336_v52  ;;  %v10541_v45 = vpop.f32.mrf.mxu0 }
 0x2f4   : > { %v10539_v11 = vpop.f32.mrf.mxu1 }
 0x2f5   : > { %v10544_v20 = vadd.f32 %v10415_v15, %v4334_v47  ;;  %v10548_v31 = vpop.f32.mrf.mxu0 }
 0x2f6   : > { %v10546_v19 = vpop.f32.mrf.mxu1  ;;  %11230 = vst [vmem:[#allocation53_spill] sm:$0xff] %v10548_v31 }
 0x2f7   : > { %v10550_v30 = vpop.f32.mrf.mxu0 }
 0x2f8   : > { %v7548_v27 = vpop.f32.mrf.mxu1 }
 0x2f9   : > { %v4340_v29 = vadd.f32 %v7548_v27, %v10369_v23  ;;  %v10553_v12 = vpop.f32.mrf.mxu0 }
 0x2fa   : > { %v4235_v18 = vpop.f32.mrf.mxu1 }
 0x2fb   : > { %v4338_v1 = vadd.f32 %v4235_v18, %v10375_v40  ;;  %v10557_v52 = vadd.f32 %v10433_v61, %v4340_v29  ;;  %v10559_v15 = vpop.f32.mrf.mxu0 }
 0x2fc   : > { %v7549_v33 = vpop.f32.mrf.mxu1 }
 0x2fd   : > { %v4341_v47 = vadd.f32 %v7549_v33, %v10381_v58  ;;  %v10563_v31 = vadd.f32 %v10441_v22, %v4338_v1  ;;  %v10567_v5 = vpop.f32.mrf.mxu0 }
 0x2fe   : > { %v10565_v57 = vpop.f32.mrf.mxu1  ;;  %11231 = vst [vmem:[#allocation25_spill] sm:$0xff] %v10567_v5 }
 0x2ff   : > { %v10570_v23 = vadd.f32 %v10447_v59, %v4341_v47 }
 0x300   : > { %v7552_v27 = vpop.f32.mrf.mxu1  ;;  %v10572_v40 = vpop.f32.mrf.mxu0 }
 0x301   : > { %v4344_v61 = vadd.f32 %v7552_v27, %v10393_v60 }
 0x302   : > { %v4251_v29 = vpop.f32.mrf.mxu1  ;;  %v10575_v18 = vpop.f32.mrf.mxu0 }
 0x303   : > { %v4342_v58 = vadd.f32 %v4251_v29, %v10399_v50  ;;  %v10579_v22 = vadd.f32 %v10459_v54, %v4344_v61 }
 0x304   : > { %v7553_v33 = vpop.f32.mrf.mxu1  ;;  %v10581_v1 = vpop.f32.mrf.mxu0 }
 0x305   : > { %v4345_v5 = vadd.f32 %v7553_v33, %v10405_v13  ;;  %v10585_v59 = vadd.f32 %v10465_v35, %v4342_v58 }
 0x306   : > { %v10587_v47 = vpop.f32.mrf.mxu1  ;;  %v10589_v62 = vpop.f32.mrf.mxu0 }
 0x307   : > { %v10592_v60 = vadd.f32 %v10471_v21, %v4345_v5 }
 0x308   : > { %v7556_v27 = vpop.f32.mrf.mxu1  ;;  %v10594_v50 = vpop.f32.mrf.mxu0 }
 0x309   : > { %11232 = vst [vmem:[#allocation52_spill] sm:$0xff] %v10592_v60  ;;  %v4348_v54 = vadd.f32 %v7556_v27, %v10419_v16 }
 0x30a   : > { %v4267_v61 = vpop.f32.mrf.mxu1  ;;  %v10597_v29 = vpop.f32.mrf.mxu0 }
 0x30b   : > { %v4346_v13 = vadd.f32 %v4267_v61, %v10426_v10  ;;  %v10601_v35 = vadd.f32 %v10483_v3, %v4348_v54 }
 0x30c   : > { %v7557_v58 = vpop.f32.mrf.mxu1  ;;  %v10603_v33 = vpop.f32.mrf.mxu0 }
 0x30d   : > { %v4349_v6 = vadd.f32 %v7557_v58, %v10431_v53  ;;  %v10607_v21 = vadd.f32 %v10489_v56, %v4346_v13 }
 0x30e   : > { %v10609_v5 = vpop.f32.mrf.mxu1  ;;  %v10611_v60 = vpop.f32.mrf.mxu0 }
 0x30f   : > { %11233 = vst [vmem:[#allocation28_spill] sm:$0xff] %v10607_v21  ;;  %v10614_v16 = vadd.f32 %v10495_v32, %v4349_v6 }
 0x310   : > { %v7560_v27 = vpop.f32.mrf.mxu1 }
 0x311   : > { %11234 = vst [vmem:[#allocation55_spill] sm:$0xff] %v10614_v16  ;;  %v10616_v10 = vpop.f32.mrf.mxu0  ;;  %v4352_v3 = vadd.f32 %v7560_v27, %v10445_v43 }
 0x312   : > { %v4283_v54 = vpop.f32.mrf.mxu1 }
 0x313   : > { %v10619_v61 = vpop.f32.mrf.mxu0  ;;  %v4350_v53 = vadd.f32 %v4283_v54, %v10452_v63  ;;  %v10623_v56 = vadd.f32 %v10507_v8, %v4352_v3 }
 0x314   : > { %v7561_v13 = vpop.f32.mrf.mxu1 }
 0x315   : > { %v4353_v58 = vadd.f32 %v7561_v13, %v10457_v9  ;;  %v10627_v21 = vadd.f32 %v10513_v36, %v4350_v53  ;;  %v10629_v6 = vpop.f32.mrf.mxu0 }
 0x316   : > { %v10631_v32 = vpop.f32.mrf.mxu1 }
 0x317   : > { %v10634_v43 = vadd.f32 %v10521_v0, %v4353_v58  ;;  %v10637_v63 = vpop.f32.mrf.mxu0 }
 0x319   : > { %v7564_v27 = vpop.f32.mrf.mxu1  ;;  %v10647_v13 = vpop.f32.mrf.mxu0 }
 0x31a   : > { %v4356_v16 = vadd.f32 %v7564_v27, %v10469_v46 }
 0x31b   : > { %v4299_v8 = vpop.f32.mrf.mxu1 }
 0x31c   : > { %v4354_v3 = vadd.f32 %v4299_v8, %v10475_v17  ;;  %v10641_v9 = vadd.f32 %v10530_v41, %v4356_v16  ;;  %v10655_v17 = vpop.f32.mrf.mxu0 }
 0x31d   : > { %v7565_v36 = vpop.f32.mrf.mxu1 }
 0x31e   : > { %v4357_v54 = vadd.f32 %v7565_v36, %v10481_v24  ;;  %v10645_v53 = vadd.f32 %v10533_v51, %v4354_v3  ;;  %v10665_v36 = vpop.f32.mrf.mxu0 }
 0x31f   : > { %v10649_v0 = vpop.f32.mrf.mxu1 }
 0x320   : > { %v10652_v46 = vadd.f32 %v10541_v45, %v4357_v54 }
 0x322   : > { %v7568_v58 = vpop.f32.mrf.mxu1 }
 0x323   : > { %v4360_v27 = vadd.f32 %v7568_v58, %v10493_v7  ;;  %v4333_v7 = vadd.f32 %v10519_v34, %v10333_v4  ;;  %v10685_v4 = vld [vmem:[%s10994_s5] ss:$0 sm:$0xff] }
 0x324   : > { %v4315_v41 = vpop.f32.mrf.mxu1 }
 0x325   : > { %v4358_v16 = vadd.f32 %v4315_v41, %v10499_v2  ;;  %v10659_v24 = vadd.f32 %v10550_v30, %v4360_v27  ;;  %v4331_v30 = vadd.f32 %v10526_v28, %v10339_v55 }
 0x326   : > { %v7569_v51 = vpop.f32.mrf.mxu1 }
 0x327   : > { %v4361_v8 = vadd.f32 %v7569_v51, %v10505_v26  ;;  %v10663_v3 = vadd.f32 %v10553_v12, %v4358_v16  ;;  %v10677_v26 = vpop.f32.mrf.mxu0  ;;  %v4692_v16 = vadd.f32 %v10395_v39, %v4333_v7  ;;  %v11235_v39 = vld [vmem:[#allocation16_spill] sm:$0xff] }
 0x328   : > { %v10667_v45 = vpop.f32.mrf.mxu1  ;;  %v4337_v7 = vadd.f32 %v10539_v11, %v11235_v39 }
 0x329   : > { %v10672_v54 = vadd.f32 %v10559_v15, %v4361_v8  ;;  %v10689_v28 = vpop.f32.mrf.mxu0 }
 0x32a   : > { %v7608_v2 = vpop.f32.mrf.mxu1 }
 0x32b   : > { %v5417_v58 = vadd.f32 %v7608_v2, %v10517_v25  ;;  %v4690_v25 = vadd.f32 %v10401_v14, %v4331_v30  ;;  %v11236_v2 = vld [vmem:[#allocation39_spill] sm:$0xff] }
 0x32c   : > { %v5288_v12 = vpop.f32.mrf.mxu1 }
 0x32d   : > { %v5887_v27 = vadd.f32 %v10572_v40, %v5417_v58  ;;  %v5415_v41 = vadd.f32 %v5288_v12, %v10524_v37  ;;  %v4335_v58 = vadd.f32 %v10546_v19, %v11236_v2 }
 0x32e   : > { %v7609_v34 = vpop.f32.mrf.mxu1 }
 0x32f   : > { %v5885_v15 = vadd.f32 %v10575_v18, %v5415_v41  ;;  %v5418_v55 = vadd.f32 %v7609_v34, %v4692_v16  ;;  %v5926_v40 = vadd.f32 %v10685_v4, %v5887_v27  ;;  %v10701_v16 = vpop.f32.mrf.mxu0 }
 0x330   : > { %v5291_v51 = vpop.f32.mrf.mxu1 }
 0x331   : > { %v5888_v37 = vadd.f32 %v10581_v1, %v5418_v55  ;;  %v5416_v8 = vadd.f32 %v5291_v51, %v4690_v25  ;;  %v5924_v18 = vadd.f32 %v10685_v4, %v5885_v15  ;;  %v5958_v1 = vmax.f32 %v5926_v40, 0.0  ;;  %v10709_v39 = vpop.f32.mrf.mxu0 }
 0x332   : > { %v7612_v12 = vpop.f32.mrf.mxu1  ;;  %v4696_v25 = vadd.f32 %v10421_v42, %v4337_v7  ;;  %v4694_v51 = vadd.f32 %v10428_v49, %v4335_v58 }
 0x333   : > { %v5927_v41 = vadd.f32 %v10685_v4, %v5888_v37  ;;  %v5886_v14 = vadd.f32 %v10589_v62, %v5416_v8  ;;  %v5421_v30 = vadd.f32 %v7612_v12, %v10537_v48  ;;  %v5956_v37 = vmax.f32 %v5924_v18, 0.0  ;;  %v10719_v18 = vpop.f32.mrf.mxu0 }
 0x334   : > { %v5304_v27 = vpop.f32.mrf.mxu1 }
 0x335   : > { %v5959_v34 = vmax.f32 %v5927_v41, 0.0  ;;  %v5925_v55 = vadd.f32 %v10685_v4, %v5886_v14  ;;  %v5419_v11 = vadd.f32 %v5304_v27, %v10544_v20  ;;  %v5891_v19 = vadd.f32 %v10594_v50, %v5421_v30 }
 0x336   : > { %v7613_v15 = vpop.f32.mrf.mxu1 }
 0x337   : > { %v5989_v62 = vpack.c.bf16 %v5959_v34, %v5958_v1  ;;  %v5957_v8 = vmax.f32 %v5925_v55, 0.0  ;;  %v5889_v48 = vadd.f32 %v10597_v29, %v5419_v11  ;;  %v5422_v40 = vadd.f32 %v7613_v15, %v4696_v25  ;;  %v11237_v29 = vld [vmem:[#allocation17_spill] sm:$0xff]  ;;  %v10727_v25 = vpop.f32.mrf.mxu0 }
 0x338   : > { %v5307_v2 = vpop.f32.mrf.mxu1  ;;  %v5930_v20 = vadd.f32 %v10685_v4, %v5891_v19  ;;  %v4339_v58 = vadd.f32 %v10565_v57, %v11237_v29 }
 0x339   : > { %v5988_v12 = vpack.c.bf16 %v5957_v8, %v5956_v37  ;;  %v5420_v41 = vadd.f32 %v5307_v2, %v4694_v51  ;;  %v5892_v50 = vadd.f32 %v10603_v33, %v5422_v40  ;;  %v5928_v42 = vadd.f32 %v10685_v4, %v5889_v48 }
 0x33a   : > { %v7616_v14 = vpop.f32.mrf.mxu1  ;;  %v5962_v34 = vmax.f32 %v5930_v20, 0.0  ;;  %v4698_v37 = vadd.f32 %v10454_v38, %v4339_v58  ;;  %v4343_v2 = vadd.f32 %v10587_v47, %v10413_v44  ;;  %v11239_v58 = vld [vmem:[#allocation45_spill] sm:$0xff] }
 0x33b   : > { %v5890_v49 = vadd.f32 %v10611_v60, %v5420_v41  ;;  %v5425_v7 = vadd.f32 %v7616_v14, %v10557_v52  ;;  %7674 = vmatprep.mubr.msk.bf16.mxu1 %vm1845_vm12, %v5988_v12  ;;  %v5931_v30 = vadd.f32 %v10685_v4, %v5892_v50  ;;  %v5960_v11 = vmax.f32 %v5928_v42, 0.0 }
 0x33c   : > { %v5320_v27 = vpop.f32.mrf.mxu1  ;;  %7675 = vmatmul.mubr.msk.bf16.vlgmr.msra.gmra.mxu1 %vm1845_vm12, %v5989_v62 }
 0x33d   : > { %v5929_v33 = vadd.f32 %v10685_v4, %v5890_v49  ;;  %v5895_v1 = vadd.f32 %v10616_v10, %v5425_v7  ;;  %v5423_v60 = vadd.f32 %v5320_v27, %v10563_v31  ;;  %v5963_v52 = vmax.f32 %v5931_v30, 0.0  ;;  %v11238_v7 = vld [vmem:[#allocation52_spill] sm:$0xff] }
 0x33e   : > { %v7617_v55 = vpop.f32.mrf.mxu1  ;;  %v4702_v30 = vadd.f32 %v11239_v58, %v4343_v2 }
 0x33f   : > { %v5961_v19 = vmax.f32 %v5929_v33, 0.0  ;;  %v5426_v57 = vadd.f32 %v7617_v55, %v10570_v23  ;;  %v5991_v15 = vpack.c.bf16 %v5963_v52, %v5962_v34  ;;  %v5893_v51 = vadd.f32 %v10619_v61, %v5423_v60  ;;  %v10738_v61 = vpop.f32.mrf.mxu0 }
 0x340   : > { %v5323_v62 = vpop.f32.mrf.mxu1  ;;  %v5934_v10 = vadd.f32 %v10685_v4, %v5895_v1 }
 0x341   : > { %v5990_v8 = vpack.c.bf16 %v5961_v19, %v5960_v11  ;;  %v5896_v31 = vadd.f32 %v10629_v6, %v5426_v57  ;;  %v5424_v48 = vadd.f32 %v5323_v62, %v4698_v37  ;;  %v5932_v38 = vadd.f32 %v10685_v4, %v5893_v51 }
 0x342   : > { %v7620_v40 = vpop.f32.mrf.mxu1  ;;  %v5966_v6 = vmax.f32 %v5934_v10, 0.0  ;;  %v11241_v10 = vld [vmem:[#allocation28_spill] sm:$0xff] }
 0x343   : > { %v5935_v23 = vadd.f32 %v10685_v4, %v5896_v31  ;;  %v5429_v12 = vadd.f32 %v7620_v40, %v10579_v22  ;;  %7678 = vmatprep.mubr.msk.bf16.mxu1 %vm1845_vm12, %v5990_v8  ;;  %v5894_v41 = vadd.f32 %v10637_v63, %v5424_v48  ;;  %v7663_v63 = vpop.f32.mrf.mxu0  ;;  %v5964_v27 = vmax.f32 %v5932_v38, 0.0  ;;  %v11242_v40 = vld [vmem:[#allocation48_spill] sm:$0xff] }
 0x344   : > { %v5336_v20 = vpop.f32.mrf.mxu1  ;;  %7679 = vmatmul.mubr.msk.bf16.gmra.mxu1 %vm1845_vm12, %v5991_v15 }
 0x345   : > { %v5967_v50 = vmax.f32 %v5935_v23, 0.0  ;;  %v5899_v14 = vadd.f32 %v10647_v13, %v5429_v12  ;;  %v5427_v44 = vadd.f32 %v5336_v20, %v10585_v59  ;;  %v5933_v47 = vadd.f32 %v10685_v4, %v5894_v41  ;;  %v11240_v59 = vld [vmem:[#allocation42_spill] sm:$0xff]  ;;  %v5841_v51 = vpop.f32.mrf.mxu0  ;;  %v11243_v41 = vld [vmem:[#allocation55_spill] sm:$0xff] }
 0x346   : > { %v7621_v22 = vpop.f32.mrf.mxu1  ;;  %v4347_v52 = vadd.f32 %v10609_v5, %v11240_v59 }
 0x347   : > { %v5993_v42 = vpack.c.bf16 %v5967_v50, %v5966_v6  ;;  %v5897_v49 = vadd.f32 %v10655_v17, %v5427_v44  ;;  %v5430_v29 = vadd.f32 %v7621_v22, %v11238_v7  ;;  %v5965_v33 = vmax.f32 %v5933_v47, 0.0  ;;  %v7666_v38 = vpop.f32.mrf.mxu0 }
 0x348   : > { %v5339_v1 = vpop.f32.mrf.mxu1  ;;  %v5938_v60 = vadd.f32 %v10685_v4, %v5899_v14  ;;  %v4706_v2 = vadd.f32 %v11242_v40, %v4347_v52 }
 0x349   : > { %v5900_v13 = vadd.f32 %v10665_v36, %v5430_v29  ;;  %v5428_v34 = vadd.f32 %v5339_v1, %v4702_v30  ;;  %v5992_v55 = vpack.c.bf16 %v5965_v33, %v5964_v27  ;;  %v5936_v17 = vadd.f32 %v10685_v4, %v5897_v49  ;;  %v5854_v29 = vpop.f32.mrf.mxu0 }
 0x34a   : > { %v7624_v11 = vpop.f32.mrf.mxu1  ;;  %v5970_v62 = vmax.f32 %v5938_v60, 0.0 }
 0x34b   : > { %v5939_v19 = vadd.f32 %v10685_v4, %v5900_v13  ;;  %v5898_v57 = vadd.f32 %v10677_v26, %v5428_v34  ;;  %v5433_v15 = vadd.f32 %v7624_v11, %v10601_v35  ;;  %7682 = vmatprep.mubr.msk.bf16.mxu1 %vm1845_vm12, %v5992_v55  ;;  %v5968_v26 = vmax.f32 %v5936_v17, 0.0  ;;  %v11245_v55 = vld [vmem:[#allocation50_spill] sm:$0xff] }
 0x34c   : > { %v5352_v37 = vpop.f32.mrf.mxu1  ;;  %7683 = vmatmul.mubr.msk.bf16.gmra.mxu1 %vm1845_vm12, %v5993_v42 }
 0x34d   : > { %v5971_v36 = vmax.f32 %v5939_v19, 0.0  ;;  %v5937_v8 = vadd.f32 %v10685_v4, %v5898_v57  ;;  %v5431_v5 = vadd.f32 %v5352_v37, %v11241_v10  ;;  %v5903_v31 = vadd.f32 %v10689_v28, %v5433_v15  ;;  %v11246_v37 = vld [vmem:[#allocation19_spill] sm:$0xff] }
 0x34e   : > { %v7625_v48 = vpop.f32.mrf.mxu1 }
 0x34f   : > { %v5995_v23 = vpack.c.bf16 %v5971_v36, %v5970_v62  ;;  %v5969_v35 = vmax.f32 %v5937_v8, 0.0  ;;  %v5901_v12 = vadd.f32 %v10701_v16, %v5431_v5  ;;  %v5434_v20 = vadd.f32 %v7625_v48, %v11243_v41  ;;  %v11244_v16 = vld [vmem:[#allocation18_spill] sm:$0xff] }
 0x350   : > { %v5355_v6 = vpop.f32.mrf.mxu1  ;;  %v5942_v44 = vadd.f32 %v10685_v4, %v5903_v31  ;;  %v4351_v7 = vadd.f32 %v10631_v32, %v11244_v16  ;;  %v7667_v32 = vpop.f32.mrf.mxu0  ;;  %v4355_v62 = vadd.f32 %v10649_v0, %v11246_v37 }
 0x351   : > { %v5994_v50 = vpack.c.bf16 %v5969_v35, %v5968_v26  ;;  %v5432_v14 = vadd.f32 %v5355_v6, %v4706_v2  ;;  %v5904_v47 = vadd.f32 %v10709_v39, %v5434_v20  ;;  %v5940_v28 = vadd.f32 %v10685_v4, %v5901_v12  ;;  %v11247_v12 = vld [vmem:[#allocation53_spill] sm:$0xff] }
 0x352   : > { %v7628_v22 = vpop.f32.mrf.mxu1  ;;  %v4710_v11 = vadd.f32 %v11245_v55, %v4351_v7  ;;  %v5857_v8 = vpop.f32.mrf.mxu0  ;;  %v4714_v41 = vadd.f32 %v11247_v12, %v4355_v62 }
 0x353   : > { %v5902_v42 = vadd.f32 %v10719_v18, %v5432_v14  ;;  %v5437_v49 = vadd.f32 %v7628_v22, %v10623_v56  ;;  %7686 = vmatprep.mubr.msk.bf16.mxu1 %vm1845_vm12, %v5994_v50  ;;  %v5943_v58 = vadd.f32 %v10685_v4, %v5904_v47  ;;  %v5974_v18 = vmax.f32 %v5942_v44, 0.0 }
 0x354   : > { %v5368_v30 = vpop.f32.mrf.mxu1  ;;  %7687 = vmatmul.mubr.msk.bf16.gmra.mxu1 %vm1845_vm12, %v5995_v23  ;;  %v5972_v60 = vmax.f32 %v5940_v28, 0.0  ;;  %v7670_v26 = vpop.f32.mrf.mxu0 }
 0x355   : > { %v5941_v27 = vadd.f32 %v10685_v4, %v5902_v42  ;;  %v5907_v39 = vadd.f32 %v10727_v25, %v5437_v49  ;;  %v5435_v33 = vadd.f32 %v5368_v30, %v10627_v21  ;;  %v5975_v1 = vmax.f32 %v5943_v58, 0.0 }
 0x356   : > { %v7629_v56 = vpop.f32.mrf.mxu1  ;;  %v5870_v22 = vpop.f32.mrf.mxu0 }
 0x357   : > { %v5973_v13 = vmax.f32 %v5941_v27, 0.0  ;;  %v5438_v34 = vadd.f32 %v7629_v56, %v10634_v43  ;;  %v5997_v59 = vpack.c.bf16 %v5975_v1, %v5974_v18  ;;  %v5905_v52 = vadd.f32 %v10738_v61, %v5435_v33  ;;  %v11249_v18 = vld [vmem:[#allocation25_spill] sm:$0xff] }
 0x358   : > { %v5371_v17 = vpop.f32.mrf.mxu1  ;;  %v5946_v25 = vadd.f32 %v10685_v4, %v5907_v39  ;;  %v7671_v39 = vpop.f32.mrf.mxu0 }
 0x359   : > { %v5996_v19 = vpack.c.bf16 %v5973_v13, %v5972_v60  ;;  %v5908_v21 = vadd.f32 %v7663_v63, %v5438_v34  ;;  %v5436_v57 = vadd.f32 %v5371_v17, %v4710_v11  ;;  %v5944_v61 = vadd.f32 %v10685_v4, %v5905_v52 }
 0x35a   : > { %v7632_v15 = vpop.f32.mrf.mxu1  ;;  %v5978_v31 = vmax.f32 %v5946_v25, 0.0  ;;  %v5873_v11 = vpop.f32.mrf.mxu0 }
 0x35b   : > { %v5947_v36 = vadd.f32 %v10685_v4, %v5908_v21  ;;  %v5441_v43 = vadd.f32 %v7632_v15, %v10641_v9  ;;  %7690 = vmatprep.mubr.msk.bf16.mxu1 %vm1845_vm12, %v5996_v19  ;;  %v5906_v10 = vadd.f32 %v5841_v51, %v5436_v57  ;;  %v5976_v20 = vmax.f32 %v5944_v61, 0.0 }
 0x35c   : > { %v5384_v5 = vpop.f32.mrf.mxu1  ;;  %7691 = vmatmul.mubr.msk.bf16.gmra.mxu1 %vm1845_vm12, %v5997_v59 }
 0x35d   : > { %v5979_v48 = vmax.f32 %v5947_v36, 0.0  ;;  %v5911_v40 = vadd.f32 %v7666_v38, %v5441_v43  ;;  %v5439_v63 = vadd.f32 %v5384_v5, %v10645_v53  ;;  %v5945_v0 = vadd.f32 %v10685_v4, %v5906_v10  ;;  %v11248_v53 = vld [vmem:[#allocation22_spill] sm:$0xff]  ;;  %v10816_v43 = vld [vmem:[%s10996_s7] ss:$0 sm:$0xff]  ;;  %v7882_v10 = vld [vmem:[%s8149_s1] sm:$0xff]  }
 0x35e   : > { %v7633_v2 = vpop.f32.mrf.mxu1  ;;  %v4359_v44 = vadd.f32 %v10667_v45, %v11248_v53  ;;  %v6224_v5 = vunpack.c.l.bf16 %v7882_v10  ;;  %v7884_v53 = vld [vmem:[%s8149_s1 + $0x10] sm:$0xff]  }
 0x35f   : > { %v5999_v23 = vpack.c.bf16 %v5979_v48, %v5978_v31  ;;  %v5909_v9 = vadd.f32 %v5854_v29, %v5439_v63  ;;  %v5442_v35 = vadd.f32 %v7633_v2, %v10652_v46  ;;  %v5977_v51 = vmax.f32 %v5945_v0, 0.0 }
 0x360   : > { %v5387_v6 = vpop.f32.mrf.mxu1  ;;  %v5950_v50 = vadd.f32 %v10685_v4, %v5911_v40  ;;  %v4718_v1 = vadd.f32 %v11249_v18, %v4359_v44  ;;  %v6228_v44 = vunpack.c.l.bf16 %v7884_v53 }
 0x361   : > { %v5912_v38 = vadd.f32 %v7667_v32, %v5442_v35  ;;  %v5440_v14 = vadd.f32 %v5387_v6, %v4714_v41  ;;  %v5998_v47 = vpack.c.bf16 %v5977_v51, %v5976_v20  ;;  %v5948_v42 = vadd.f32 %v10685_v4, %v5909_v9  ;;  %v7883_v41 = vld [vmem:[%s8149_s1 + $0x18] sm:$0xff]  }
 0x362   : > { %v7636_v28 = vpop.f32.mrf.mxu1  ;;  %v5982_v29 = vmax.f32 %v5950_v50, 0.0  ;;  %v6230_v20 = vunpack.c.l.bf16 %v7883_v41 }
 0x363   : > { %v5951_v49 = vadd.f32 %v10685_v4, %v5912_v38  ;;  %v5910_v46 = vadd.f32 %v5857_v8, %v5440_v14  ;;  %v5445_v16 = vadd.f32 %v7636_v28, %v10659_v24  ;;  %7694 = vmatprep.mubr.msk.bf16.mxu1 %vm1845_vm12, %v5998_v47  ;;  %v5980_v56 = vmax.f32 %v5948_v42, 0.0  ;;  %v7881_v8 = vld [vmem:[%s8149_s1 + $0x8] sm:$0xff]  }
 0x364   : > { %v5400_v7 = vpop.f32.mrf.mxu1  ;;  %7695 = vmatmul.mubr.msk.bf16.gmra.mxu1 %vm1845_vm12, %v5999_v23  ;;  %v6226_v61 = vunpack.c.l.bf16 %v7881_v8  ;;  %v6227_v0 = vunpack.c.h.bf16 %v7881_v8 }
 0x365   : > { %v5983_v58 = vmax.f32 %v5951_v49, 0.0  ;;  %v5949_v30 = vadd.f32 %v10685_v4, %v5910_v46  ;;  %v5443_v27 = vadd.f32 %v5400_v7, %v10663_v3  ;;  %v5915_v45 = vadd.f32 %v7670_v26, %v5445_v16 }
 0x366   : > { %v7637_v33 = vpop.f32.mrf.mxu1  ;;  %v6225_v26 = vunpack.c.h.bf16 %v7882_v10  ;;  %v6231_v46 = vunpack.c.h.bf16 %v7883_v41 }
 0x367   : > { %v6001_v60 = vpack.c.bf16 %v5983_v58, %v5982_v29  ;;  %v5981_v13 = vmax.f32 %v5949_v30, 0.0  ;;  %v5913_v24 = vadd.f32 %v5870_v22, %v5443_v27  ;;  %v5446_v34 = vadd.f32 %v7637_v33, %v10672_v54 }
 0x368   : > { %v5403_v32 = vpop.f32.mrf.mxu1  ;;  %v5954_v55 = vadd.f32 %v10685_v4, %v5915_v45  ;;  %v6229_v27 = vunpack.c.h.bf16 %v7884_v53 }
 0x369   : > { %v6000_v59 = vpack.c.bf16 %v5981_v13, %v5980_v56  ;;  %v5444_v52 = vadd.f32 %v5403_v32, %v4718_v1  ;;  %v5916_v3 = vadd.f32 %v7671_v39, %v5446_v34  ;;  %v5952_v17 = vadd.f32 %v10685_v4, %v5913_v24  ;;  %v7885_v34 = vld [vmem:[%s8149_s1 + $0x28] sm:$0xff]  }
 0x36a   : > { %v5986_v54 = vmax.f32 %v5954_v55, 0.0  ;;  %v6234_v32 = vunpack.c.l.bf16 %v7885_v34 }
 0x36b   : > { %v5914_v19 = vadd.f32 %v5873_v11, %v5444_v52  ;;  %7698 = vmatprep.mubr.msk.bf16.mxu1 %vm1845_vm12, %v6000_v59  ;;  %v5955_v25 = vadd.f32 %v10685_v4, %v5916_v3  ;;  %v5984_v15 = vmax.f32 %v5952_v17, 0.0  ;;  %v7886_v17 = vld [vmem:[%s8149_s1 + $0x20] sm:$0xff]  }
 0x36c   : > { %7699 = vmatmul.mubr.msk.bf16.gmra.mxu1 %vm1845_vm12, %v6001_v60  ;;  %v6233_v10 = vunpack.c.h.bf16 %v7886_v17 }
 0x36d   : > { %v5953_v21 = vadd.f32 %v10685_v4, %v5914_v19  ;;  %v5987_v57 = vmax.f32 %v5955_v25, 0.0  ;;  %v6232_v19 = vunpack.c.l.bf16 %v7886_v17 }
 0x36f   : > { %v5985_v37 = vmax.f32 %v5953_v21, 0.0  ;;  %v6003_v62 = vpack.c.bf16 %v5987_v57, %v5986_v54 }
 0x371   : > { %v6002_v36 = vpack.c.bf16 %v5985_v37, %v5984_v15  ;;  %v6235_v37 = vunpack.c.h.bf16 %v7885_v34 }
 0x373   : > { %7702 = vmatprep.mubr.msk.bf16.mxu1 %vm1845_vm12, %v6002_v36 }
 0x374   : > { %7703 = vmatmul.mubr.msk.bf16.gmra.mxu1 %vm1845_vm12, %v6003_v62 }
 0x3fc   : > { %v7676_v4 = vpop.f32.mrf.mxu1 }
 0x3fd   : > { %v6106_v31 = vadd.f32 %v7676_v4, %v10816_v43 }
 0x3fe   : > { %v6097_v48 = vpop.f32.mrf.mxu1 }
 0x3ff   : > { %v6258_v40 = vadd.f32 %v6226_v61, %v6106_v31  ;;  %v6098_v63 = vadd.f32 %v10816_v43, %v6097_v48  ;;  %v7887_v31 = vld [vmem:[%s8149_s1 + $0x38] sm:$0xff]  }
 0x400   : > { %v7677_v2 = vpop.f32.mrf.mxu1  ;;  %v6238_v48 = vunpack.c.l.bf16 %v7887_v31 }
 0x401   : > { %v6290_v23 = vmax.f32 %v6258_v40, 0.0  ;;  %v6256_v9 = vadd.f32 %v6224_v5, %v6098_v63  ;;  %v6109_v35 = vadd.f32 %v7677_v2, %v10816_v43 }
 0x402   : > { %v6100_v12 = vpop.f32.mrf.mxu1 }
 0x403   : > { %v7111_v51 = vpack.c.bf16 %v6290_v23, %v6290_v23  ;;  %v6288_v6 = vmax.f32 %v6256_v9, 0.0  ;;  %v6259_v50 = vadd.f32 %v6227_v0, %v6109_v35  ;;  %v6101_v38 = vadd.f32 %v10816_v43, %v6100_v12  ;;  %v7888_v23 = vld [vmem:[%s8149_s1 + $0x30] sm:$0xff]  }
 0x404   : > { %v7680_v14 = vpop.f32.mrf.mxu1  ;;  %v6236_v9 = vunpack.c.l.bf16 %v7888_v23 }
 0x405   : > { %6451 = vst.msk [vmem:[%s10828_s10 + $0x8] sm:$0xf] %vm6448_vm2, %v7111_v51  ;;  %v7109_v47 = vpack.c.bf16 %v6288_v6, %v6288_v6  ;;  %v6291_v22 = vmax.f32 %v6259_v50, 0.0  ;;  %v6257_v28 = vadd.f32 %v6225_v26, %v6101_v38  ;;  %v6122_v42 = vadd.f32 %v7680_v14, %v10816_v43 }
 0x406   : > { %v6113_v49 = vpop.f32.mrf.mxu1  ;;  %v6239_v6 = vunpack.c.h.bf16 %v7887_v31 }
 0x407   : > { %6449 = vst.msk [vmem:[%s10828_s10] sm:$0xf] %vm6448_vm2, %v7109_v47  ;;  %v7112_v16 = vpack.c.bf16 %v6291_v22, %v6291_v22  ;;  %v6289_v7 = vmax.f32 %v6257_v28, 0.0  ;;  %v6262_v29 = vadd.f32 %v6230_v20, %v6122_v42  ;;  %v6114_v58 = vadd.f32 %v10816_v43, %v6113_v49 }
 0x408   : > { %v7681_v30 = vpop.f32.mrf.mxu1  ;;  %v6237_v47 = vunpack.c.h.bf16 %v7888_v23 }
 0x409   : > { %6452 = vst.msk [vmem:[%s10828_s10 + $0xc] sm:$0xf] %vm6448_vm2, %v7112_v16  ;;  %v7110_v45 = vpack.c.bf16 %v6289_v7, %v6289_v7  ;;  %v6294_v39 = vmax.f32 %v6262_v29, 0.0  ;;  %v6260_v33 = vadd.f32 %v6228_v44, %v6114_v58  ;;  %v6125_v18 = vadd.f32 %v7681_v30, %v10816_v43  ;;  %v7889_v16 = vld [vmem:[%s8149_s1 + $0x48] sm:$0xff]  }
 0x40a   : > { %v6116_v1 = vpop.f32.mrf.mxu1  ;;  %v6242_v7 = vunpack.c.l.bf16 %v7889_v16 }
 0x40b   : > { %6450 = vst.msk [vmem:[%s10828_s10 + $0x4] sm:$0xf] %vm6448_vm2, %v7110_v45  ;;  %v7115_v56 = vpack.c.bf16 %v6294_v39, %v6294_v39  ;;  %v6292_v60 = vmax.f32 %v6260_v33, 0.0  ;;  %v6263_v13 = vadd.f32 %v6231_v46, %v6125_v18  ;;  %v6117_v24 = vadd.f32 %v10816_v43, %v6116_v1  ;;  %v7890_v39 = vld [vmem:[%s8149_s1 + $0x40] sm:$0xff]  }
 0x40c   : > { %v7684_v11 = vpop.f32.mrf.mxu1  ;;  %v6240_v33 = vunpack.c.l.bf16 %v7890_v39 }
 0x40d   : > { %6455 = vst.msk [vmem:[%s10828_s10 + $0x18] sm:$0xf] %vm6448_vm2, %v7115_v56  ;;  %v7113_v59 = vpack.c.bf16 %v6292_v60, %v6292_v60  ;;  %v6295_v52 = vmax.f32 %v6263_v13, 0.0  ;;  %v6261_v55 = vadd.f32 %v6229_v27, %v6117_v24  ;;  %v6138_v3 = vadd.f32 %v7684_v11, %v10816_v43 }
 0x40e   : > { %v6129_v54 = vpop.f32.mrf.mxu1  ;;  %v6243_v24 = vunpack.c.h.bf16 %v7889_v16  ;;  %v6241_v11 = vunpack.c.h.bf16 %v7890_v39 }
 0x40f   : > { %6453 = vst.msk [vmem:[%s10828_s10 + $0x10] sm:$0xf] %vm6448_vm2, %v7113_v59  ;;  %v7116_v25 = vpack.c.bf16 %v6295_v52, %v6295_v52  ;;  %v6293_v21 = vmax.f32 %v6261_v55, 0.0  ;;  %v6266_v57 = vadd.f32 %v6234_v32, %v6138_v3  ;;  %v6130_v15 = vadd.f32 %v10816_v43, %v6129_v54  ;;  %v7891_v54 = vld [vmem:[%s8149_s1 + $0x58] sm:$0xff]  }
 0x410   : > { %v7685_v36 = vpop.f32.mrf.mxu1 }
 0x411   : > { %6456 = vst.msk [vmem:[%s10828_s10 + $0x1c] sm:$0xf] %vm6448_vm2, %v7116_v25  ;;  %v7114_v62 = vpack.c.bf16 %v6293_v21, %v6293_v21  ;;  %v6298_v8 = vmax.f32 %v6266_v57, 0.0  ;;  %v6264_v61 = vadd.f32 %v6232_v19, %v6130_v15  ;;  %v6141_v4 = vadd.f32 %v7685_v36, %v10816_v43 }
 0x412   : > { %v6132_v5 = vpop.f32.mrf.mxu1  ;;  %v6246_v57 = vunpack.c.l.bf16 %v7891_v54 }
 0x413   : > { %6454 = vst.msk [vmem:[%s10828_s10 + $0x14] sm:$0xf] %vm6448_vm2, %v7114_v62  ;;  %v7119_v40 = vpack.c.bf16 %v6298_v8, %v6298_v8  ;;  %v6296_v63 = vmax.f32 %v6264_v61, 0.0  ;;  %v6267_v0 = vadd.f32 %v6235_v37, %v6141_v4  ;;  %v6133_v2 = vadd.f32 %v10816_v43, %v6132_v5  ;;  %v7892_v61 = vld [vmem:[%s8149_s1 + $0x50] sm:$0xff]  }
 0x414   : > { %v7688_v26 = vpop.f32.mrf.mxu1  ;;  %v6244_v4 = vunpack.c.l.bf16 %v7892_v61 }
 0x415   : > { %6459 = vst.msk [vmem:[%s10828_s10 + $0x28] sm:$0xf] %vm6448_vm2, %v7119_v40  ;;  %v7117_v35 = vpack.c.bf16 %v6296_v63, %v6296_v63  ;;  %v6299_v12 = vmax.f32 %v6267_v0, 0.0  ;;  %v6265_v41 = vadd.f32 %v6233_v10, %v6133_v2  ;;  %v6154_v20 = vadd.f32 %v7688_v26, %v10816_v43 }
 0x416   : > { %v6145_v51 = vpop.f32.mrf.mxu1  ;;  %v6247_v63 = vunpack.c.h.bf16 %v7891_v54 }
 0x417   : > { %6457 = vst.msk [vmem:[%s10828_s10 + $0x20] sm:$0xf] %vm6448_vm2, %v7117_v35  ;;  %v7120_v50 = vpack.c.bf16 %v6299_v12, %v6299_v12  ;;  %v6297_v38 = vmax.f32 %v6265_v41, 0.0  ;;  %v6270_v14 = vadd.f32 %v6238_v48, %v6154_v20  ;;  %v6146_v53 = vadd.f32 %v10816_v43, %v6145_v51 }
 0x418   : > { %v7689_v44 = vpop.f32.mrf.mxu1  ;;  %v6245_v35 = vunpack.c.h.bf16 %v7892_v61 }
 0x419   : > { %6460 = vst.msk [vmem:[%s10828_s10 + $0x2c] sm:$0xf] %vm6448_vm2, %v7120_v50  ;;  %v7118_v22 = vpack.c.bf16 %v6297_v38, %v6297_v38  ;;  %v6302_v28 = vmax.f32 %v6270_v14, 0.0  ;;  %v6268_v42 = vadd.f32 %v6236_v9, %v6146_v53  ;;  %v6157_v49 = vadd.f32 %v7689_v44, %v10816_v43  ;;  %v7893_v50 = vld [vmem:[%s8149_s1 + $0x68] sm:$0xff]  }
 0x41a   : > { %v6148_v46 = vpop.f32.mrf.mxu1  ;;  %v6250_v38 = vunpack.c.l.bf16 %v7893_v50 }
 0x41b   : > { %6458 = vst.msk [vmem:[%s10828_s10 + $0x24] sm:$0xf] %vm6448_vm2, %v7118_v22  ;;  %v7123_v29 = vpack.c.bf16 %v6302_v28, %v6302_v28  ;;  %v6300_v58 = vmax.f32 %v6268_v42, 0.0  ;;  %v6271_v30 = vadd.f32 %v6239_v6, %v6157_v49  ;;  %v6149_v27 = vadd.f32 %v10816_v43, %v6148_v46  ;;  %v7894_v28 = vld [vmem:[%s8149_s1 + $0x60] sm:$0xff]  }
 0x41c   : > { %v7692_v45 = vpop.f32.mrf.mxu1  ;;  %v6248_v42 = vunpack.c.l.bf16 %v7894_v28 }
 0x41d   : > { %6463 = vst.msk [vmem:[%s10828_s10 + $0x38] sm:$0xf] %vm6448_vm2, %v7123_v29  ;;  %v7121_v18 = vpack.c.bf16 %v6300_v58, %v6300_v58  ;;  %v6303_v1 = vmax.f32 %v6271_v30, 0.0  ;;  %v6269_v56 = vadd.f32 %v6237_v47, %v6149_v27  ;;  %v6170_v60 = vadd.f32 %v7692_v45, %v10816_v43 }
 0x41e   : > { %v6161_v13 = vpop.f32.mrf.mxu1  ;;  %v6251_v58 = vunpack.c.h.bf16 %v7893_v50 }
 0x41f   : > { %6461 = vst.msk [vmem:[%s10828_s10 + $0x30] sm:$0xf] %vm6448_vm2, %v7121_v18  ;;  %v7124_v34 = vpack.c.bf16 %v6303_v1, %v6303_v1  ;;  %v6301_v32 = vmax.f32 %v6269_v56, 0.0  ;;  %v6274_v59 = vadd.f32 %v6242_v7, %v6170_v60  ;;  %v6162_v52 = vadd.f32 %v10816_v43, %v6161_v13 }
 0x420   : > { %v7693_v55 = vpop.f32.mrf.mxu1  ;;  %v6249_v18 = vunpack.c.h.bf16 %v7894_v28 }
 0x421   : > { %6464 = vst.msk [vmem:[%s10828_s10 + $0x3c] sm:$0xf] %vm6448_vm2, %v7124_v34  ;;  %v7122_v3 = vpack.c.bf16 %v6301_v32, %v6301_v32  ;;  %v6306_v17 = vmax.f32 %v6274_v59, 0.0  ;;  %v6272_v19 = vadd.f32 %v6240_v33, %v6162_v52  ;;  %v6173_v25 = vadd.f32 %v7693_v55, %v10816_v43  ;;  %v7895_v34 = vld [vmem:[%s8149_s1 + $0x78] sm:$0xff]  }
 0x422   : > { %v6164_v21 = vpop.f32.mrf.mxu1  ;;  %v6254_v32 = vunpack.c.l.bf16 %v7895_v34 }
 0x423   : > { %6462 = vst.msk [vmem:[%s10828_s10 + $0x34] sm:$0xf] %vm6448_vm2, %v7122_v3  ;;  %v7127_v15 = vpack.c.bf16 %v6306_v17, %v6306_v17  ;;  %v6304_v37 = vmax.f32 %v6272_v19, 0.0  ;;  %v6275_v62 = vadd.f32 %v6243_v24, %v6173_v25  ;;  %v6165_v36 = vadd.f32 %v10816_v43, %v6164_v21  ;;  %v7896_v17 = vld [vmem:[%s8149_s1 + $0x70] sm:$0xff]   ;;  %s6498_s1 = sshll.u32 %s10828_s10, 4  ;;  %s10937_s1 = int_to_ptr.vmem [resolvable:$true] %s6498_s1 }
 0x424   : > { %v7696_v8 = vpop.f32.mrf.mxu1  ;;  %v6252_v19 = vunpack.c.l.bf16 %v7896_v17  ;;  %s7925_s15 = scalar_lea.vmem %s10937_s1, 2048  ;;  %p7932_p1 = scmp.lt.s32.totalorder %s10937_s1, %s7930_s21 }
 0x425   : > { %6467 = vst.msk [vmem:[%s10828_s10 + $0x48] sm:$0xf] %vm6448_vm2, %v7127_v15  ;;  %v7125_v10 = vpack.c.bf16 %v6304_v37, %v6304_v37  ;;  %v6307_v5 = vmax.f32 %v6275_v62, 0.0  ;;  %v6273_v31 = vadd.f32 %v6241_v11, %v6165_v36  ;;  %v6186_v48 = vadd.f32 %v7696_v8, %v10816_v43  ;;  %p7926_p8 = scmp.ne.s32.totalorder %s10937_s1, %s7925_s15  ;;  %p7933_p3 = scmp.lt.s32.totalorder %s7931_s14, %s7925_s15 }
 0x426   : > { %v6177_v40 = vpop.f32.mrf.mxu1  ;;  %v6255_v37 = vunpack.c.h.bf16 %v7895_v34 }
 0x427   : > { %6465 = vst.msk [vmem:[%s10828_s10 + $0x40] sm:$0xf] %vm6448_vm2, %v7125_v10  ;;  %v7128_v0 = vpack.c.bf16 %v6307_v5, %v6307_v5  ;;  %v6305_v2 = vmax.f32 %v6273_v31, 0.0  ;;  %v6278_v26 = vadd.f32 %v6246_v57, %v6186_v48  ;;  %v6178_v23 = vadd.f32 %v10816_v43, %v6177_v40  ;;  %p7927_p12 = pnand %p7926_p8, %p8110_p9  ;;  %p7934_p5 = por %p7933_p3, %p7932_p1 }
 0x428   : > { %v7697_v9 = vpop.f32.mrf.mxu1  ;;  %v6253_v10 = vunpack.c.h.bf16 %v7896_v17 }
 0x429   : > { %6468 = vst.msk [vmem:[%s10828_s10 + $0x4c] sm:$0xf] %vm6448_vm2, %v7128_v0  ;;  %v7126_v12 = vpack.c.bf16 %v6305_v2, %v6305_v2  ;;  %v6310_v41 = vmax.f32 %v6278_v26, 0.0  ;;  %v6276_v20 = vadd.f32 %v6244_v4, %v6178_v23  ;;  %v6189_v51 = vadd.f32 %v7697_v9, %v10816_v43  ;;  %p7928_p0 = pneg %p7927_p12 }
 0x42a   : > { %v6180_v6 = vpop.f32.mrf.mxu1 }
 0x42b   : > { %6466 = vst.msk [vmem:[%s10828_s10 + $0x44] sm:$0xf] %vm6448_vm2, %v7126_v12  ;;  %v7131_v14 = vpack.c.bf16 %v6310_v41, %v6310_v41  ;;  %v6308_v53 = vmax.f32 %v6276_v20, 0.0  ;;  %v6279_v44 = vadd.f32 %v6247_v63, %v6189_v51  ;;  %v6181_v47 = vadd.f32 %v10816_v43, %v6180_v6  ;;  %p7935_p6 = pnand %p7934_p5, %p7928_p0 }
 0x42c   : > { %v7700_v22 = vpop.f32.mrf.mxu1 }
 0x42d   : > { %6471 = vst.msk [vmem:[%s10828_s10 + $0x58] sm:$0xf] %vm6448_vm2, %v7131_v14  ;;  %v7129_v49 = vpack.c.bf16 %v6308_v53, %v6308_v53  ;;  %v6311_v46 = vmax.f32 %v6279_v44, 0.0  ;;  %v6277_v16 = vadd.f32 %v6245_v35, %v6181_v47  ;;  %v6202_v7 = vadd.f32 %v7700_v22, %v10816_v43 }
 0x42e   : > { %v6193_v29 = vpop.f32.mrf.mxu1 }
 0x42f   : > { %6469 = vst.msk [vmem:[%s10828_s10 + $0x50] sm:$0xf] %vm6448_vm2, %v7129_v49  ;;  %v7132_v30 = vpack.c.bf16 %v6311_v46, %v6311_v46  ;;  %v6309_v27 = vmax.f32 %v6277_v16, 0.0  ;;  %v6282_v45 = vadd.f32 %v6250_v38, %v6202_v7  ;;  %v6194_v39 = vadd.f32 %v10816_v43, %v6193_v29 }
 0x430   : > { %v7701_v33 = vpop.f32.mrf.mxu1 }
 0x431   : > { %6472 = vst.msk [vmem:[%s10828_s10 + $0x5c] sm:$0xf] %vm6448_vm2, %v7132_v30  ;;  %v7130_v1 = vpack.c.bf16 %v6309_v27, %v6309_v27  ;;  %v6314_v56 = vmax.f32 %v6282_v45, 0.0  ;;  %v6280_v60 = vadd.f32 %v6248_v42, %v6194_v39  ;;  %v6205_v13 = vadd.f32 %v7701_v33, %v10816_v43 }
 0x432   : > { %v6196_v24 = vpop.f32.mrf.mxu1 }
 0x433   : > { %6470 = vst.msk [vmem:[%s10828_s10 + $0x54] sm:$0xf] %vm6448_vm2, %v7130_v1  ;;  %v7135_v59 = vpack.c.bf16 %v6314_v56, %v6314_v56  ;;  %v6312_v52 = vmax.f32 %v6280_v60, 0.0  ;;  %v6283_v55 = vadd.f32 %v6251_v58, %v6205_v13  ;;  %v6197_v11 = vadd.f32 %v10816_v43, %v6196_v24 }
 0x434   : > { %v7704_v3 = vpop.f32.mrf.mxu1 }
 0x435   : > { %6475 = vst.msk [vmem:[%s10828_s10 + $0x68] sm:$0xf] %vm6448_vm2, %v7135_v59  ;;  %v7133_v25 = vpack.c.bf16 %v6312_v52, %v6312_v52  ;;  %v6315_v21 = vmax.f32 %v6283_v55, 0.0  ;;  %v6281_v54 = vadd.f32 %v6249_v18, %v6197_v11  ;;  %v6218_v57 = vadd.f32 %v7704_v3, %v10816_v43 }
 0x436   : > { %v6209_v15 = vpop.f32.mrf.mxu1 }
 0x437   : > { %6473 = vst.msk [vmem:[%s10828_s10 + $0x60] sm:$0xf] %vm6448_vm2, %v7133_v25  ;;  %v7136_v62 = vpack.c.bf16 %v6315_v21, %v6315_v21  ;;  %v6313_v36 = vmax.f32 %v6281_v54, 0.0  ;;  %v6286_v8 = vadd.f32 %v6254_v32, %v6218_v57  ;;  %v6210_v61 = vadd.f32 %v10816_v43, %v6209_v15 }
 0x438   : > { %v7705_v4 = vpop.f32.mrf.mxu1 }
 0x439   : > { %6476 = vst.msk [vmem:[%s10828_s10 + $0x6c] sm:$0xf] %vm6448_vm2, %v7136_v62  ;;  %v7134_v5 = vpack.c.bf16 %v6313_v36, %v6313_v36  ;;  %v6318_v31 = vmax.f32 %v6286_v8, 0.0  ;;  %v6284_v48 = vadd.f32 %v6252_v19, %v6210_v61  ;;  %v6221_v40 = vadd.f32 %v7705_v4, %v10816_v43 }
 0x43a   : > { %v6212_v63 = vpop.f32.mrf.mxu1 }
 0x43b   : > { %6474 = vst.msk [vmem:[%s10828_s10 + $0x64] sm:$0xf] %vm6448_vm2, %v7134_v5  ;;  %v7139_v0 = vpack.c.bf16 %v6318_v31, %v6318_v31  ;;  %v6316_v2 = vmax.f32 %v6284_v48, 0.0  ;;  %v6287_v26 = vadd.f32 %v6255_v37, %v6221_v40  ;;  %v6213_v23 = vadd.f32 %v10816_v43, %v6212_v63 }
 0x43d   : > { %6479 = vst.msk [vmem:[%s10828_s10 + $0x78] sm:$0xf] %vm6448_vm2, %v7139_v0  ;;  %v7137_v9 = vpack.c.bf16 %v6316_v2, %v6316_v2  ;;  %v6319_v35 = vmax.f32 %v6287_v26, 0.0  ;;  %v6285_v12 = vadd.f32 %v6253_v10, %v6213_v23 }
 0x43f   : > { %6477 = vst.msk [vmem:[%s10828_s10 + $0x70] sm:$0xf] %vm6448_vm2, %v7137_v9  ;;  %v7140_v41 = vpack.c.bf16 %v6319_v35, %v6319_v35  ;;  %v6317_v20 = vmax.f32 %v6285_v12, 0.0 }
 0x441   : > { %6480 = vst.msk [vmem:[%s10828_s10 + $0x7c] sm:$0xf] %vm6448_vm2, %v7140_v41  ;;  %v7138_v43 = vpack.c.bf16 %v6317_v20, %v6317_v20 }
 0x443   : > { %6478 = vst.msk [vmem:[%s10828_s10 + $0x74] sm:$0xf] %vm6448_vm2, %v7138_v43 }
 0x444   : > { %7938 = shalt.err (!%p7935_p6)
}
 0x445   : > { %s7939_s20 = scalar_lea.hbm %s10935_s16, 2048  ;;  %s7943_s10 = scalar_lea.hbm %s10997_s8, 4096 }
 0x446   : > { %p7940_p7 = scmp.ne.s32.totalorder %s10935_s16, %s7939_s20  ;;  %p7944_p13 = scmp.lt.s32.totalorder %s10935_s16, %s10997_s8 }
 0x447   : > { %p7945_p2 = scmp.lt.s32.totalorder %s7943_s10, %s7939_s20 }
 0x448   : > { %p7941_p10 = pnand %p7940_p7, %p8110_p9 }
 0x449   : > { %p7946_p8 = por %p7945_p2, %p7944_p13 }
 0x44a   : > { %p7942_p4 = pneg %p7941_p10 }
 0x44c   : > { %p7947_p12 = pnand %p7946_p8, %p7942_p4 }
 0x44e   : > { %7950 = shalt.err (!%p7947_p12)
}
 0x44f   : > { %s8012_s13 = smov 64   ;;  %s8013_s15 = smov 4  }
 0x450   : > { %7721 = dma.vmem_to_hbm [thread:$0]  (%p8110_p9), %s10937_s1, 2048, %s10935_s16, %s6482_s29, %s8012_s13, %s8012_s13, %s8013_s15  }
 0x451 PF: > { %s6513_s23 = sand.u32 1, %s7985_s26   ;;  %p11250_p0 = scmp.ge.s32.totalorder %s8005_s9, 2 }
 0x452   : > { %s6514_s21 = scalar_lea.sflag [#allocation7], %s6513_s23 }
 0x453   : > { %p7728_p1 = pnand %p11250_p0, %p8117_p11 }
 0x455   : > { %p7729_p3 = pneg %p7728_p1 }
 0x457   : > { %7980 = dma.done.wait (%p7729_p3), %s6514_s21, 2048  }
 0x458   : > { %7982 = vsyncadd (%p7729_p3), %s6514_s21, 4294965248  ;;  %s24_s9 = sadd.s32 1, %s8005_s9   ;;  %s11251_s17 = sld [smem:[#allocation11_spill]] }
 0x459   : > { %p21_p5 = scmp.ge.s32.totalorder %s24_s9, 4   ;;  %s11252_s26 = smov %s7989_s27 }
 0x45a   : > { %s11253_s27 = smov %s7993_s28  ;;  %s11254_s28 = smov %s8115_s18 }
 0x45b   : > { %s11255_s29 = smov %s8001_s30  ;;  %23 = sbr.rel (!%p21_p5) target bundleno = 6 (0x6), region = 105 }
 0x45e   : > { %s11256_s30 = smov %s11251_s17 }
 0x460   :  { %6519 = vsyncpa [#allocation6], 1 }
 0x461   :  { %6521 = vsyncpa [#allocation6 + $0x1], 1 }
 0x462   :  { %6522 = vsyncpa [#allocation7], 1 }
 0x463   :  { %6524 = vsyncpa [#allocation7 + $0x1], 1 }
 0x464   :  { %6525 = vsyncmov [#allocation4] }
 0x467   :  { %s6526_s19 = vpop.sfrf %6525 }
 0x468   :  { %p7074_p9 = scmp.ne.s32.totalorder %s6526_s19, 0 }
 0x46a   :  { %6530 = shalt.err (%p7074_p9)  }
 0x46b   :  { %6532 = vsyncmov [#allocation4 + $0x1] }
 0x46e   :  { %s6533_s12 = vpop.sfrf %6532 }
 0x46f   :  { %p7075_p11 = scmp.ne.s32.totalorder %s6533_s12, 0 }
 0x471   :  { %6537 = shalt.err (%p7075_p11)  }

</bundles_post_ra>
